<compile_context>
chip_gen: v5e
topology: v5e:2x2
jax: 0.10.0
libtpu: 0.0.40
codegen_flags: <defaults>
</compile_context>

<pallas_src>
import jax
import jax.numpy as jnp
import numpy as np
from jax import lax
from jax.experimental import pallas as pl
from jax.experimental.pallas import tpu as pltpu

_GW = 128  # lane-tile width of one fused gate group


# ---------------------------------------------------------------- Pallas kernel
def _limnet_kernel(uid_ref, iid_ref,                              # scalar-prefetch (SMEM, flat S*B)
                   feat_ref, wmem_ref, wfeat_ref, brzn_ref, bhn_ref,
                   umem_in, imem_in,                               # HBM (pl.ANY), flat (B*N, E)
                   emb_ref, umem_out, imem_out,                    # outputs
                   um_tab, im_tab, xm_ref, sem):                   # scratch
    s = pl.program_id(0)
    n_steps = pl.num_programs(0)
    B, twoE = xm_ref.shape
    E = twoE // 2
    Nu = um_tab.shape[0] // B
    Ni = im_tab.shape[0] // B

    # ---- one-time bulk load of both memory tables into VMEM (resident across all steps)
    @pl.when(s == 0)
    def _():
        cu = pltpu.make_async_copy(umem_in, um_tab, sem.at[0])
        ci = pltpu.make_async_copy(imem_in, im_tab, sem.at[1])
        cu.start(); ci.start()
        cu.wait(); ci.wait()

    # ---- per-step ids (SMEM scalars)
    uids = [uid_ref[s * B + b] for b in range(B)]
    iids = [iid_ref[s * B + b] for b in range(B)]

    # ---- gather interacting rows into a packed (B, 2E) slab [u_mem | i_mem] (pure VMEM indexing)
    for b in range(B):
        xm_ref[pl.ds(b, 1), 0:E] = um_tab[pl.ds(b * Nu + uids[b], 1), :]
        xm_ref[pl.ds(b, 1), E:twoE] = im_tab[pl.ds(b * Ni + iids[b], 1), :]

    # ---- fused cross-GRU (both entities, all three gates) as two small MXU pushes.
    # Column layout of g: [r(128) | z(128) | n(128)], each group = [user(E) | item(E) | zeros].
    # torch.nn.GRUCell with zero hidden state: W_hh @ 0 == 0, only biases enter the gates.
    g = (jnp.dot(xm_ref[...], wmem_ref[...], preferred_element_type=jnp.float32)
         + jnp.dot(feat_ref[...], wfeat_ref[...], preferred_element_type=jnp.float32)
         + brzn_ref[...])                                          # (B, 3*128)

    r = jax.nn.sigmoid(g[:, 0:_GW])
    z = jax.nn.sigmoid(g[:, _GW:2 * _GW])
    n = jnp.tanh(g[:, 2 * _GW:3 * _GW] + r * bhn_ref[...])
    h = (1.0 - z) * n                                              # padded lanes are exactly zero

    # ---- per-entity L2 normalize (F.normalize(dim=1)) with lane masks + rsqrt
    lane = lax.broadcasted_iota(jnp.int32, h.shape, 1)
    hsq = h * h
    ss_u = jnp.sum(jnp.where(lane < E, hsq, 0.0), axis=1, keepdims=True)
    ss_i = jnp.sum(jnp.where(lane >= E, hsq, 0.0), axis=1, keepdims=True)   # pad lanes contribute 0
    inv = jnp.where(lane < E,
                    lax.rsqrt(jnp.maximum(ss_u, 1e-24)),
                    lax.rsqrt(jnp.maximum(ss_i, 1e-24)))
    emb_ref[...] = h * inv                                          # single lane-dense full-tile store

    # ---- scatter the new embeddings back into the VMEM-resident tables
    for b in range(B):
        um_tab[pl.ds(b * Nu + uids[b], 1), :] = emb_ref[pl.ds(b, 1), 0:E]
        im_tab[pl.ds(b * Ni + iids[b], 1), :] = emb_ref[pl.ds(b, 1), E:twoE]

    # ---- one-time bulk writeback of both tables on the last step
    @pl.when(s == n_steps - 1)
    def _():
        cu = pltpu.make_async_copy(um_tab, umem_out, sem.at[0])
        ci = pltpu.make_async_copy(im_tab, imem_out, sem.at[1])
        cu.start(); ci.start()
        cu.wait(); ci.wait()


# ---------------------------------------------------------------- wrapper
def limnet_forward_edge_sequence(fused, user_ids_seq, item_ids_seq,
                                 user_feats_seq, item_feats_seq,
                                 user_memory, item_memory):
    """Run S LiMNet interaction steps in one fused kernel.

    Args:
      user_ids_seq / item_ids_seq: (S, B) int
      user_feats_seq / item_feats_seq: (S, B, ufs) / (S, B, ifs)
      user_memory / item_memory: (B, Nu, E) / (B, Ni, E)
    Returns:
      (user_emb (S,B,E), item_emb (S,B,E), new_user_memory, new_item_memory)
    """
    S, B = user_ids_seq.shape
    E = user_memory.shape[-1]
    Nu, Ni = user_memory.shape[1], item_memory.shape[1]
    ufs = user_feats_seq.shape[-1]
    ifs = item_feats_seq.shape[-1]
    F = ufs + ifs
    assert F > 0, "zero-width feature path not implemented"
    assert 2 * E <= _GW, "embedding pair must fit one lane tile"

    # layout plumbing (wrapper side): pack features once, flatten tables/ids
    feats = jnp.concatenate([user_feats_seq, item_feats_seq], axis=-1).astype(jnp.float32)
    uid = user_ids_seq.reshape(-1).astype(jnp.int32)
    iid = item_ids_seq.reshape(-1).astype(jnp.int32)
    um_flat = user_memory.reshape(B * Nu, E).astype(jnp.float32)
    im_flat = item_memory.reshape(B * Ni, E).astype(jnp.float32)

    # VMEM budget: resident tables (lane-padded to 128) + weights + pipeline buffers, with headroom.
    resident = 4 * B * (Nu + Ni) * _GW
    vmem_limit = int(min(60 << 20, max(24 << 20, 6 * resident)))

    grid_spec = pltpu.PrefetchScalarGridSpec(
        num_scalar_prefetch=2,                 # uid, iid (flat) -> SMEM
        grid=(S,),
        in_specs=[
            pl.BlockSpec((None, B, F), lambda s, *_: (s, 0, 0)),        # per-step features
            pl.BlockSpec((2 * E, 3 * _GW), lambda s, *_: (0, 0)),       # fused mem-part weights
            pl.BlockSpec((F, 3 * _GW), lambda s, *_: (0, 0)),           # fused feat-part weights
            pl.BlockSpec((1, 3 * _GW), lambda s, *_: (0, 0)),           # folded r/z/n biases
            pl.BlockSpec((1, _GW), lambda s, *_: (0, 0)),               # b_hn
            pl.BlockSpec(memory_space=pl.ANY),                          # user memory (HBM)
            pl.BlockSpec(memory_space=pl.ANY),                          # item memory (HBM)
        ],
        out_specs=(
            pl.BlockSpec((None, B, _GW), lambda s, *_: (s, 0, 0)),      # packed [user|item] emb
            pl.BlockSpec(memory_space=pl.ANY),                          # new user memory (HBM)
            pl.BlockSpec(memory_space=pl.ANY),                          # new item memory (HBM)
        ),
        scratch_shapes=[
            pltpu.VMEM((B * Nu, E), jnp.float32),   # resident user memory table
            pltpu.VMEM((B * Ni, E), jnp.float32),   # resident item memory table
            pltpu.VMEM((B, 2 * E), jnp.float32),    # gathered [u_mem | i_mem] slab
            pltpu.SemaphoreType.DMA((2,)),
        ],
    )

    emb, new_um, new_im = pl.pallas_call(
        _limnet_kernel,
        grid_spec=grid_spec,
        out_shape=(
            jax.ShapeDtypeStruct((S, B, _GW), jnp.float32),
            jax.ShapeDtypeStruct((B * Nu, E), jnp.float32),
            jax.ShapeDtypeStruct((B * Ni, E), jnp.float32),
        ),
        compiler_params=pltpu.CompilerParams(
            dimension_semantics=("arbitrary",),      # recurrent over the sequence
            vmem_limit_bytes=vmem_limit,
        ),
    )(uid, iid, feats,
      fused["w_mem"], fused["w_feat"], fused["b_rzn"], fused["b_hn"],
      um_flat, im_flat)

    u_emb = emb[:, :, :E]
    i_emb = emb[:, :, E:2 * E]
    return u_emb, i_emb, new_um.reshape(B, Nu, E), new_im.reshape(B, Ni, E)


# ---------------------------------------------------------------- params
def init_limnet_params(key, embedding_size, user_feature_size, item_feature_size):
    """GRUCell-style init (uniform(-1/sqrt(E), 1/sqrt(E)) like torch defaults).
    W_hh is omitted: the layer always runs the cell with a zero hidden state (W_hh @ 0 == 0)."""
    E = embedding_size
    D = 2 * E + user_feature_size + item_feature_size
    k = 1.0 / np.sqrt(E)
    ks = jax.random.split(key, 6)
    u = lambda kk, shape: jax.random.uniform(kk, shape, jnp.float32, -k, k)
    return dict(
        w_ih_user=u(ks[0], (3, D, E)), b_ih_user=u(ks[1], (3, E)), b_hh_user=u(ks[2], (3, E)),
        w_ih_item=u(ks[3], (3, D, E)), b_ih_item=u(ks[4], (3, E)), b_hh_item=u(ks[5], (3, E)),
    )


def fuse_limnet_params(params, E, ufs, ifs):
    """Fuse both GRUs & all three gates into tile-aligned weights.

    w_mem  : (2E, 3*128) -- rows ordered [u_mem | i_mem]
    w_feat : (F , 3*128) -- rows ordered [u_feat | i_feat]
    columns per gate group (128 wide): [user(E) | item(E) | zeros]; groups ordered [r | z | n].
    b_rzn folds b_ih + b_hh for r/z (b_hn stays separate: it is scaled by r)."""
    D = 2 * E + ufs + ifs
    F = ufs + ifs
    wu = params["w_ih_user"]   # rows: [u_mem, u_feat, i_mem, i_feat]
    wi = params["w_ih_item"]   # rows: [i_mem, i_feat, u_mem, u_feat]

    def group(mat_u, mat_i, k):
        pad = jnp.zeros((k, _GW - 2 * E), jnp.float32)
        return jnp.concatenate([mat_u, mat_i, pad], axis=1)          # (k, 128)

    w_mem_groups, w_feat_groups = [], []
    for g in range(3):
        mem_u = jnp.concatenate([wu[g, 0:E], wu[g, E + ufs:2 * E + ufs]], axis=0)       # [u_mem|i_mem]
        mem_i = jnp.concatenate([wi[g, E + ifs:2 * E + ifs], wi[g, 0:E]], axis=0)       # [u_mem|i_mem]
        fea_u = jnp.concatenate([wu[g, E:E + ufs], wu[g, 2 * E + ufs:D]], axis=0)        # [u_feat|i_feat]
        fea_i = jnp.concatenate([wi[g, 2 * E + ifs:D], wi[g, E:E + ifs]], axis=0)        # [u_feat|i_feat]
        w_mem_groups.append(group(mem_u, mem_i, 2 * E))
        w_feat_groups.append(group(fea_u, fea_i, F))
    w_mem = jnp.concatenate(w_mem_groups, axis=1)                    # (2E, 384)
    w_feat = jnp.concatenate(w_feat_groups, axis=1)                  # (F , 384)

    def bias_group(bu, bi):
        return jnp.concatenate([bu, bi, jnp.zeros((_GW - 2 * E,), jnp.float32)])

    bu_ih, bu_hh = params["b_ih_user"], params["b_hh_user"]
    bi_ih, bi_hh = params["b_ih_item"], params["b_hh_item"]
    b_rzn = jnp.concatenate([
        bias_group(bu_ih[0] + bu_hh[0], bi_ih[0] + bi_hh[0]),        # r
        bias_group(bu_ih[1] + bu_hh[1], bi_ih[1] + bi_hh[1]),        # z
        bias_group(bu_ih[2],            bi_ih[2]),                   # n (ih only)
    ])[None, :]                                                      # (1, 384)
    b_hn = bias_group(bu_hh[2], bi_hh[2])[None, :]                   # (1, 128)

    return dict(w_mem=w_mem.astype(jnp.float32), w_feat=w_feat.astype(jnp.float32),
                b_rzn=b_rzn.astype(jnp.float32), b_hn=b_hn.astype(jnp.float32))


# ---------------------------------------------------------------- pure-JAX reference
def limnet_reference(params, user_memory, item_memory,
                     user_ids_seq, user_feats_seq, item_ids_seq, item_feats_seq):
    B = user_memory.shape[0]
    ar = jnp.arange(B)

    def cell(x, w, b_ih, b_hh):
        r = jax.nn.sigmoid(x @ w[0] + b_ih[0] + b_hh[0])
        z = jax.nn.sigmoid(x @ w[1] + b_ih[1] + b_hh[1])
        n = jnp.tanh(x @ w[2] + b_ih[2] + r * b_hh[2])
        h = (1.0 - z) * n
        return h / jnp.maximum(jnp.linalg.norm(h, axis=1, keepdims=True), 1e-12)

    um, im = user_memory, item_memory
    u_out, i_out = [], []
    for s in range(user_ids_seq.shape[0]):
        uid, iid = user_ids_seq[s], item_ids_seq[s]
        uf, itf = user_feats_seq[s], item_feats_seq[s]
        umem, imem = um[ar, uid], im[ar, iid]
        xu = jnp.concatenate([umem, uf, imem, itf], axis=1)
        xi = jnp.concatenate([imem, itf, umem, uf], axis=1)
        hu = cell(xu, params["w_ih_user"], params["b_ih_user"], params["b_hh_user"])
        hi = cell(xi, params["w_ih_item"], params["b_ih_item"], params["b_hh_item"])
        um = um.at[ar, uid].set(hu)
        im = im.at[ar, iid].set(hi)
        u_out.append(hu)
        i_out.append(hi)
    return jnp.stack(u_out), jnp.stack(i_out), um, im


# ---------------------------------------------------------------- main
if __name__ == "__main__":
    S, B, E = 8, 16, 32
    nb_users, nb_items = 40, 24
    ufs, ifs = 4, 4

    root = jax.random.PRNGKey(0)
    kp, kmu, kmi, kuid, kiid, kuf, kif = jax.random.split(root, 7)

    params = init_limnet_params(kp, E, ufs, ifs)
    fused = fuse_limnet_params(params, E, ufs, ifs)

    # initialize_memory: zeros then torch.nn.init.* -> use a deterministic normal init
    user_memory = jax.random.normal(kmu, (B, nb_users, E), jnp.float32)
    item_memory = jax.random.normal(kmi, (B, nb_items, E), jnp.float32)

    user_ids = jax.random.randint(kuid, (S, B), 0, nb_users, jnp.int32)
    item_ids = jax.random.randint(kiid, (S, B), 0, nb_items, jnp.int32)
    user_features = jax.random.normal(kuf, (S, B, ufs), jnp.float32)
    item_features = jax.random.normal(kif, (S, B, ifs), jnp.float32)

    ru, ri, r_umem, r_imem = limnet_reference(params, user_memory, item_memory,
                                              user_ids, user_features, item_ids, item_features)

    fwd = jax.jit(limnet_forward_edge_sequence)
    u_emb, i_emb, new_umem, new_imem = fwd(fused, user_ids, item_ids,
                                           user_features, item_features,
                                           user_memory, item_memory)
    jax.block_until_ready((u_emb, i_emb, new_umem, new_imem))

    # correctness checks vs pure-JAX reference (per-step embeddings + final memory tables)
    np.testing.assert_allclose(np.asarray(u_emb), np.asarray(ru), atol=1e-5, rtol=1e-5)
    np.testing.assert_allclose(np.asarray(i_emb), np.asarray(ri), atol=1e-5, rtol=1e-5)
    np.testing.assert_allclose(np.asarray(new_umem), np.asarray(r_umem), atol=1e-5, rtol=1e-5)
    np.testing.assert_allclose(np.asarray(new_imem), np.asarray(r_imem), atol=1e-5, rtol=1e-5)

    print("KERNEL_OK")
</pallas_src>

<mosaic_0001>
module attributes {stable_mosaic.version = 11 : i64} {
  func.func @_limnet_kernel(%arg0: i32, %arg1: memref<128xi32, #tpu.memory_space<smem>>, %arg2: memref<128xi32, #tpu.memory_space<smem>>, %arg3: memref<1x16x8xf32, #tpu.memory_space<vmem>>, %arg4: memref<64x384xf32, #tpu.memory_space<vmem>>, %arg5: memref<8x384xf32, #tpu.memory_space<vmem>>, %arg6: memref<1x384xf32, #tpu.memory_space<vmem>>, %arg7: memref<1x128xf32, #tpu.memory_space<vmem>>, %arg8: memref<640x32xf32, #tpu.memory_space<any>>, %arg9: memref<384x32xf32, #tpu.memory_space<any>>, %arg10: memref<1x16x128xf32, #tpu.memory_space<vmem>>, %arg11: memref<640x32xf32, #tpu.memory_space<any>>, %arg12: memref<384x32xf32, #tpu.memory_space<any>>, %arg13: memref<640x32xf32, #tpu.memory_space<vmem>>, %arg14: memref<384x32xf32, #tpu.memory_space<vmem>>, %arg15: memref<16x64xf32, #tpu.memory_space<vmem>>, %arg16: memref<2x!tpu.dma_semaphore, #tpu.memory_space<semaphore_mem>>) attributes {dimension_semantics = [#tpu.dimension_semantics<arbitrary>], iteration_bounds = array<i64: 8>, scalar_prefetch = 2 : i64, scratch_operands = 4 : i64, tpu.core_type = #tpu.core_type<tc>, window_params = [{transform_indices = @transform_0, window_bounds = array<i64: 1, 16, 8>}, {pipeline_mode = #tpu.pipeline_mode<synchronous>, transform_indices = @transform_1, window_bounds = array<i64: 64, 384>}, {pipeline_mode = #tpu.pipeline_mode<synchronous>, transform_indices = @transform_2, window_bounds = array<i64: 8, 384>}, {pipeline_mode = #tpu.pipeline_mode<synchronous>, transform_indices = @transform_3, window_bounds = array<i64: 1, 384>}, {pipeline_mode = #tpu.pipeline_mode<synchronous>, transform_indices = @transform_4, window_bounds = array<i64: 1, 128>}, {}, {}, {transform_indices = @transform_7, window_bounds = array<i64: 1, 16, 128>}, {}, {}]} {
    %c0_i32 = arith.constant 0 : i32
    %0 = arith.cmpi eq, %arg0, %c0_i32 : i32
    %1 = arith.extui %0 : i1 to i32
    %c0_i32_0 = arith.constant 0 : i32
    %2 = arith.cmpi ne, %1, %c0_i32_0 : i32
    scf.if %2 {
      %c0_i32_323 = arith.constant 0 : i32
      %485 = tpu.memref_slice %arg16[%c0_i32_323] : memref<2x!tpu.dma_semaphore, #tpu.memory_space<semaphore_mem>> -> memref<1x!tpu.dma_semaphore, #tpu.memory_space<semaphore_mem>>
      %486 = tpu.memref_squeeze %485 : memref<1x!tpu.dma_semaphore, #tpu.memory_space<semaphore_mem>> -> memref<!tpu.dma_semaphore, #tpu.memory_space<semaphore_mem>>
      tpu.enqueue_dma source(%arg8 : memref<640x32xf32, #tpu.memory_space<any>>) target(%arg13 : memref<640x32xf32, #tpu.memory_space<vmem>>) target_semaphore(%486 : memref<!tpu.dma_semaphore, #tpu.memory_space<semaphore_mem>>)
      %c1_i32_324 = arith.constant 1 : i32
      %487 = tpu.memref_slice %arg16[%c1_i32_324] : memref<2x!tpu.dma_semaphore, #tpu.memory_space<semaphore_mem>> -> memref<1x!tpu.dma_semaphore, #tpu.memory_space<semaphore_mem>>
      %488 = tpu.memref_squeeze %487 : memref<1x!tpu.dma_semaphore, #tpu.memory_space<semaphore_mem>> -> memref<!tpu.dma_semaphore, #tpu.memory_space<semaphore_mem>>
      tpu.enqueue_dma source(%arg9 : memref<384x32xf32, #tpu.memory_space<any>>) target(%arg14 : memref<384x32xf32, #tpu.memory_space<vmem>>) target_semaphore(%488 : memref<!tpu.dma_semaphore, #tpu.memory_space<semaphore_mem>>)
      %c0_i32_325 = arith.constant 0 : i32
      %489 = tpu.memref_slice %arg16[%c0_i32_325] : memref<2x!tpu.dma_semaphore, #tpu.memory_space<semaphore_mem>> -> memref<1x!tpu.dma_semaphore, #tpu.memory_space<semaphore_mem>>
      %490 = tpu.memref_squeeze %489 : memref<1x!tpu.dma_semaphore, #tpu.memory_space<semaphore_mem>> -> memref<!tpu.dma_semaphore, #tpu.memory_space<semaphore_mem>>
      tpu.wait_dma2 semaphore(%490 : memref<!tpu.dma_semaphore, #tpu.memory_space<semaphore_mem>>) src(%arg8 : memref<640x32xf32, #tpu.memory_space<any>>) dst(%arg13 : memref<640x32xf32, #tpu.memory_space<vmem>>)
      %c1_i32_326 = arith.constant 1 : i32
      %491 = tpu.memref_slice %arg16[%c1_i32_326] : memref<2x!tpu.dma_semaphore, #tpu.memory_space<semaphore_mem>> -> memref<1x!tpu.dma_semaphore, #tpu.memory_space<semaphore_mem>>
      %492 = tpu.memref_squeeze %491 : memref<1x!tpu.dma_semaphore, #tpu.memory_space<semaphore_mem>> -> memref<!tpu.dma_semaphore, #tpu.memory_space<semaphore_mem>>
      tpu.wait_dma2 semaphore(%492 : memref<!tpu.dma_semaphore, #tpu.memory_space<semaphore_mem>>) src(%arg9 : memref<384x32xf32, #tpu.memory_space<any>>) dst(%arg14 : memref<384x32xf32, #tpu.memory_space<vmem>>)
    } else {
    }
    %c16_i32 = arith.constant 16 : i32
    %3 = arith.muli %arg0, %c16_i32 : i32
    %c0_i32_1 = arith.constant 0 : i32
    %4 = arith.addi %3, %c0_i32_1 : i32
    %5 = arith.index_cast %4 : i32 to index
    %6 = memref.load %arg1[%5] : memref<128xi32, #tpu.memory_space<smem>>
    %c16_i32_2 = arith.constant 16 : i32
    %7 = arith.muli %arg0, %c16_i32_2 : i32
    %c1_i32 = arith.constant 1 : i32
    %8 = arith.addi %7, %c1_i32 : i32
    %9 = arith.index_cast %8 : i32 to index
    %10 = memref.load %arg1[%9] : memref<128xi32, #tpu.memory_space<smem>>
    %c16_i32_3 = arith.constant 16 : i32
    %11 = arith.muli %arg0, %c16_i32_3 : i32
    %c2_i32 = arith.constant 2 : i32
    %12 = arith.addi %11, %c2_i32 : i32
    %13 = arith.index_cast %12 : i32 to index
    %14 = memref.load %arg1[%13] : memref<128xi32, #tpu.memory_space<smem>>
    %c16_i32_4 = arith.constant 16 : i32
    %15 = arith.muli %arg0, %c16_i32_4 : i32
    %c3_i32 = arith.constant 3 : i32
    %16 = arith.addi %15, %c3_i32 : i32
    %17 = arith.index_cast %16 : i32 to index
    %18 = memref.load %arg1[%17] : memref<128xi32, #tpu.memory_space<smem>>
    %c16_i32_5 = arith.constant 16 : i32
    %19 = arith.muli %arg0, %c16_i32_5 : i32
    %c4_i32 = arith.constant 4 : i32
    %20 = arith.addi %19, %c4_i32 : i32
    %21 = arith.index_cast %20 : i32 to index
    %22 = memref.load %arg1[%21] : memref<128xi32, #tpu.memory_space<smem>>
    %c16_i32_6 = arith.constant 16 : i32
    %23 = arith.muli %arg0, %c16_i32_6 : i32
    %c5_i32 = arith.constant 5 : i32
    %24 = arith.addi %23, %c5_i32 : i32
    %25 = arith.index_cast %24 : i32 to index
    %26 = memref.load %arg1[%25] : memref<128xi32, #tpu.memory_space<smem>>
    %c16_i32_7 = arith.constant 16 : i32
    %27 = arith.muli %arg0, %c16_i32_7 : i32
    %c6_i32 = arith.constant 6 : i32
    %28 = arith.addi %27, %c6_i32 : i32
    %29 = arith.index_cast %28 : i32 to index
    %30 = memref.load %arg1[%29] : memref<128xi32, #tpu.memory_space<smem>>
    %c16_i32_8 = arith.constant 16 : i32
    %31 = arith.muli %arg0, %c16_i32_8 : i32
    %c7_i32 = arith.constant 7 : i32
    %32 = arith.addi %31, %c7_i32 : i32
    %33 = arith.index_cast %32 : i32 to index
    %34 = memref.load %arg1[%33] : memref<128xi32, #tpu.memory_space<smem>>
    %c16_i32_9 = arith.constant 16 : i32
    %35 = arith.muli %arg0, %c16_i32_9 : i32
    %c8_i32 = arith.constant 8 : i32
    %36 = arith.addi %35, %c8_i32 : i32
    %37 = arith.index_cast %36 : i32 to index
    %38 = memref.load %arg1[%37] : memref<128xi32, #tpu.memory_space<smem>>
    %c16_i32_10 = arith.constant 16 : i32
    %39 = arith.muli %arg0, %c16_i32_10 : i32
    %c9_i32 = arith.constant 9 : i32
    %40 = arith.addi %39, %c9_i32 : i32
    %41 = arith.index_cast %40 : i32 to index
    %42 = memref.load %arg1[%41] : memref<128xi32, #tpu.memory_space<smem>>
    %c16_i32_11 = arith.constant 16 : i32
    %43 = arith.muli %arg0, %c16_i32_11 : i32
    %c10_i32 = arith.constant 10 : i32
    %44 = arith.addi %43, %c10_i32 : i32
    %45 = arith.index_cast %44 : i32 to index
    %46 = memref.load %arg1[%45] : memref<128xi32, #tpu.memory_space<smem>>
    %c16_i32_12 = arith.constant 16 : i32
    %47 = arith.muli %arg0, %c16_i32_12 : i32
    %c11_i32 = arith.constant 11 : i32
    %48 = arith.addi %47, %c11_i32 : i32
    %49 = arith.index_cast %48 : i32 to index
    %50 = memref.load %arg1[%49] : memref<128xi32, #tpu.memory_space<smem>>
    %c16_i32_13 = arith.constant 16 : i32
    %51 = arith.muli %arg0, %c16_i32_13 : i32
    %c12_i32 = arith.constant 12 : i32
    %52 = arith.addi %51, %c12_i32 : i32
    %53 = arith.index_cast %52 : i32 to index
    %54 = memref.load %arg1[%53] : memref<128xi32, #tpu.memory_space<smem>>
    %c16_i32_14 = arith.constant 16 : i32
    %55 = arith.muli %arg0, %c16_i32_14 : i32
    %c13_i32 = arith.constant 13 : i32
    %56 = arith.addi %55, %c13_i32 : i32
    %57 = arith.index_cast %56 : i32 to index
    %58 = memref.load %arg1[%57] : memref<128xi32, #tpu.memory_space<smem>>
    %c16_i32_15 = arith.constant 16 : i32
    %59 = arith.muli %arg0, %c16_i32_15 : i32
    %c14_i32 = arith.constant 14 : i32
    %60 = arith.addi %59, %c14_i32 : i32
    %61 = arith.index_cast %60 : i32 to index
    %62 = memref.load %arg1[%61] : memref<128xi32, #tpu.memory_space<smem>>
    %c16_i32_16 = arith.constant 16 : i32
    %63 = arith.muli %arg0, %c16_i32_16 : i32
    %c15_i32 = arith.constant 15 : i32
    %64 = arith.addi %63, %c15_i32 : i32
    %65 = arith.index_cast %64 : i32 to index
    %66 = memref.load %arg1[%65] : memref<128xi32, #tpu.memory_space<smem>>
    %c16_i32_17 = arith.constant 16 : i32
    %67 = arith.muli %arg0, %c16_i32_17 : i32
    %c0_i32_18 = arith.constant 0 : i32
    %68 = arith.addi %67, %c0_i32_18 : i32
    %69 = arith.index_cast %68 : i32 to index
    %70 = memref.load %arg2[%69] : memref<128xi32, #tpu.memory_space<smem>>
    %c16_i32_19 = arith.constant 16 : i32
    %71 = arith.muli %arg0, %c16_i32_19 : i32
    %c1_i32_20 = arith.constant 1 : i32
    %72 = arith.addi %71, %c1_i32_20 : i32
    %73 = arith.index_cast %72 : i32 to index
    %74 = memref.load %arg2[%73] : memref<128xi32, #tpu.memory_space<smem>>
    %c16_i32_21 = arith.constant 16 : i32
    %75 = arith.muli %arg0, %c16_i32_21 : i32
    %c2_i32_22 = arith.constant 2 : i32
    %76 = arith.addi %75, %c2_i32_22 : i32
    %77 = arith.index_cast %76 : i32 to index
    %78 = memref.load %arg2[%77] : memref<128xi32, #tpu.memory_space<smem>>
    %c16_i32_23 = arith.constant 16 : i32
    %79 = arith.muli %arg0, %c16_i32_23 : i32
    %c3_i32_24 = arith.constant 3 : i32
    %80 = arith.addi %79, %c3_i32_24 : i32
    %81 = arith.index_cast %80 : i32 to index
    %82 = memref.load %arg2[%81] : memref<128xi32, #tpu.memory_space<smem>>
    %c16_i32_25 = arith.constant 16 : i32
    %83 = arith.muli %arg0, %c16_i32_25 : i32
    %c4_i32_26 = arith.constant 4 : i32
    %84 = arith.addi %83, %c4_i32_26 : i32
    %85 = arith.index_cast %84 : i32 to index
    %86 = memref.load %arg2[%85] : memref<128xi32, #tpu.memory_space<smem>>
    %c16_i32_27 = arith.constant 16 : i32
    %87 = arith.muli %arg0, %c16_i32_27 : i32
    %c5_i32_28 = arith.constant 5 : i32
    %88 = arith.addi %87, %c5_i32_28 : i32
    %89 = arith.index_cast %88 : i32 to index
    %90 = memref.load %arg2[%89] : memref<128xi32, #tpu.memory_space<smem>>
    %c16_i32_29 = arith.constant 16 : i32
    %91 = arith.muli %arg0, %c16_i32_29 : i32
    %c6_i32_30 = arith.constant 6 : i32
    %92 = arith.addi %91, %c6_i32_30 : i32
    %93 = arith.index_cast %92 : i32 to index
    %94 = memref.load %arg2[%93] : memref<128xi32, #tpu.memory_space<smem>>
    %c16_i32_31 = arith.constant 16 : i32
    %95 = arith.muli %arg0, %c16_i32_31 : i32
    %c7_i32_32 = arith.constant 7 : i32
    %96 = arith.addi %95, %c7_i32_32 : i32
    %97 = arith.index_cast %96 : i32 to index
    %98 = memref.load %arg2[%97] : memref<128xi32, #tpu.memory_space<smem>>
    %c16_i32_33 = arith.constant 16 : i32
    %99 = arith.muli %arg0, %c16_i32_33 : i32
    %c8_i32_34 = arith.constant 8 : i32
    %100 = arith.addi %99, %c8_i32_34 : i32
    %101 = arith.index_cast %100 : i32 to index
    %102 = memref.load %arg2[%101] : memref<128xi32, #tpu.memory_space<smem>>
    %c16_i32_35 = arith.constant 16 : i32
    %103 = arith.muli %arg0, %c16_i32_35 : i32
    %c9_i32_36 = arith.constant 9 : i32
    %104 = arith.addi %103, %c9_i32_36 : i32
    %105 = arith.index_cast %104 : i32 to index
    %106 = memref.load %arg2[%105] : memref<128xi32, #tpu.memory_space<smem>>
    %c16_i32_37 = arith.constant 16 : i32
    %107 = arith.muli %arg0, %c16_i32_37 : i32
    %c10_i32_38 = arith.constant 10 : i32
    %108 = arith.addi %107, %c10_i32_38 : i32
    %109 = arith.index_cast %108 : i32 to index
    %110 = memref.load %arg2[%109] : memref<128xi32, #tpu.memory_space<smem>>
    %c16_i32_39 = arith.constant 16 : i32
    %111 = arith.muli %arg0, %c16_i32_39 : i32
    %c11_i32_40 = arith.constant 11 : i32
    %112 = arith.addi %111, %c11_i32_40 : i32
    %113 = arith.index_cast %112 : i32 to index
    %114 = memref.load %arg2[%113] : memref<128xi32, #tpu.memory_space<smem>>
    %c16_i32_41 = arith.constant 16 : i32
    %115 = arith.muli %arg0, %c16_i32_41 : i32
    %c12_i32_42 = arith.constant 12 : i32
    %116 = arith.addi %115, %c12_i32_42 : i32
    %117 = arith.index_cast %116 : i32 to index
    %118 = memref.load %arg2[%117] : memref<128xi32, #tpu.memory_space<smem>>
    %c16_i32_43 = arith.constant 16 : i32
    %119 = arith.muli %arg0, %c16_i32_43 : i32
    %c13_i32_44 = arith.constant 13 : i32
    %120 = arith.addi %119, %c13_i32_44 : i32
    %121 = arith.index_cast %120 : i32 to index
    %122 = memref.load %arg2[%121] : memref<128xi32, #tpu.memory_space<smem>>
    %c16_i32_45 = arith.constant 16 : i32
    %123 = arith.muli %arg0, %c16_i32_45 : i32
    %c14_i32_46 = arith.constant 14 : i32
    %124 = arith.addi %123, %c14_i32_46 : i32
    %125 = arith.index_cast %124 : i32 to index
    %126 = memref.load %arg2[%125] : memref<128xi32, #tpu.memory_space<smem>>
    %c16_i32_47 = arith.constant 16 : i32
    %127 = arith.muli %arg0, %c16_i32_47 : i32
    %c15_i32_48 = arith.constant 15 : i32
    %128 = arith.addi %127, %c15_i32_48 : i32
    %129 = arith.index_cast %128 : i32 to index
    %130 = memref.load %arg2[%129] : memref<128xi32, #tpu.memory_space<smem>>
    %c0_i32_49 = arith.constant 0 : i32
    %131 = arith.addi %c0_i32_49, %6 : i32
    %132 = arith.index_cast %131 : i32 to index
    %c0 = arith.constant 0 : index
    %133 = vector.load %arg13[%132, %c0] : memref<640x32xf32, #tpu.memory_space<vmem>>, vector<1x32xf32>
    %c0_50 = arith.constant 0 : index
    %c0_51 = arith.constant 0 : index
    %134 = vector.load %arg15[%c0_50, %c0_51] : memref<16x64xf32, #tpu.memory_space<vmem>>, vector<1x32xf32>
    tpu.vector_store %arg15[%c0_50, %c0_51], %133 {strides = array<i32>} : memref<16x64xf32, #tpu.memory_space<vmem>>, vector<1x32xf32>,
    %c0_i32_52 = arith.constant 0 : i32
    %135 = arith.addi %c0_i32_52, %70 : i32
    %136 = arith.index_cast %135 : i32 to index
    %c0_53 = arith.constant 0 : index
    %137 = vector.load %arg14[%136, %c0_53] : memref<384x32xf32, #tpu.memory_space<vmem>>, vector<1x32xf32>
    %c0_54 = arith.constant 0 : index
    %c32 = arith.constant 32 : index
    %138 = vector.load %arg15[%c0_54, %c32] : memref<16x64xf32, #tpu.memory_space<vmem>>, vector<1x32xf32>
    tpu.vector_store %arg15[%c0_54, %c32], %137 {strides = array<i32>} : memref<16x64xf32, #tpu.memory_space<vmem>>, vector<1x32xf32>,
    %c40_i32 = arith.constant 40 : i32
    %139 = arith.addi %c40_i32, %10 : i32
    %140 = arith.index_cast %139 : i32 to index
    %c0_55 = arith.constant 0 : index
    %141 = vector.load %arg13[%140, %c0_55] : memref<640x32xf32, #tpu.memory_space<vmem>>, vector<1x32xf32>
    %c1 = arith.constant 1 : index
    %c0_56 = arith.constant 0 : index
    %142 = vector.load %arg15[%c1, %c0_56] : memref<16x64xf32, #tpu.memory_space<vmem>>, vector<1x32xf32>
    tpu.vector_store %arg15[%c1, %c0_56], %141 {strides = array<i32>} : memref<16x64xf32, #tpu.memory_space<vmem>>, vector<1x32xf32>,
    %c24_i32 = arith.constant 24 : i32
    %143 = arith.addi %c24_i32, %74 : i32
    %144 = arith.index_cast %143 : i32 to index
    %c0_57 = arith.constant 0 : index
    %145 = vector.load %arg14[%144, %c0_57] : memref<384x32xf32, #tpu.memory_space<vmem>>, vector<1x32xf32>
    %c1_58 = arith.constant 1 : index
    %c32_59 = arith.constant 32 : index
    %146 = vector.load %arg15[%c1_58, %c32_59] : memref<16x64xf32, #tpu.memory_space<vmem>>, vector<1x32xf32>
    tpu.vector_store %arg15[%c1_58, %c32_59], %145 {strides = array<i32>} : memref<16x64xf32, #tpu.memory_space<vmem>>, vector<1x32xf32>,
    %c80_i32 = arith.constant 80 : i32
    %147 = arith.addi %c80_i32, %14 : i32
    %148 = arith.index_cast %147 : i32 to index
    %c0_60 = arith.constant 0 : index
    %149 = vector.load %arg13[%148, %c0_60] : memref<640x32xf32, #tpu.memory_space<vmem>>, vector<1x32xf32>
    %c2 = arith.constant 2 : index
    %c0_61 = arith.constant 0 : index
    %150 = vector.load %arg15[%c2, %c0_61] : memref<16x64xf32, #tpu.memory_space<vmem>>, vector<1x32xf32>
    tpu.vector_store %arg15[%c2, %c0_61], %149 {strides = array<i32>} : memref<16x64xf32, #tpu.memory_space<vmem>>, vector<1x32xf32>,
    %c48_i32 = arith.constant 48 : i32
    %151 = arith.addi %c48_i32, %78 : i32
    %152 = arith.index_cast %151 : i32 to index
    %c0_62 = arith.constant 0 : index
    %153 = vector.load %arg14[%152, %c0_62] : memref<384x32xf32, #tpu.memory_space<vmem>>, vector<1x32xf32>
    %c2_63 = arith.constant 2 : index
    %c32_64 = arith.constant 32 : index
    %154 = vector.load %arg15[%c2_63, %c32_64] : memref<16x64xf32, #tpu.memory_space<vmem>>, vector<1x32xf32>
    tpu.vector_store %arg15[%c2_63, %c32_64], %153 {strides = array<i32>} : memref<16x64xf32, #tpu.memory_space<vmem>>, vector<1x32xf32>,
    %c120_i32 = arith.constant 120 : i32
    %155 = arith.addi %c120_i32, %18 : i32
    %156 = arith.index_cast %155 : i32 to index
    %c0_65 = arith.constant 0 : index
    %157 = vector.load %arg13[%156, %c0_65] : memref<640x32xf32, #tpu.memory_space<vmem>>, vector<1x32xf32>
    %c3 = arith.constant 3 : index
    %c0_66 = arith.constant 0 : index
    %158 = vector.load %arg15[%c3, %c0_66] : memref<16x64xf32, #tpu.memory_space<vmem>>, vector<1x32xf32>
    tpu.vector_store %arg15[%c3, %c0_66], %157 {strides = array<i32>} : memref<16x64xf32, #tpu.memory_space<vmem>>, vector<1x32xf32>,
    %c72_i32 = arith.constant 72 : i32
    %159 = arith.addi %c72_i32, %82 : i32
    %160 = arith.index_cast %159 : i32 to index
    %c0_67 = arith.constant 0 : index
    %161 = vector.load %arg14[%160, %c0_67] : memref<384x32xf32, #tpu.memory_space<vmem>>, vector<1x32xf32>
    %c3_68 = arith.constant 3 : index
    %c32_69 = arith.constant 32 : index
    %162 = vector.load %arg15[%c3_68, %c32_69] : memref<16x64xf32, #tpu.memory_space<vmem>>, vector<1x32xf32>
    tpu.vector_store %arg15[%c3_68, %c32_69], %161 {strides = array<i32>} : memref<16x64xf32, #tpu.memory_space<vmem>>, vector<1x32xf32>,
    %c160_i32 = arith.constant 160 : i32
    %163 = arith.addi %c160_i32, %22 : i32
    %164 = arith.index_cast %163 : i32 to index
    %c0_70 = arith.constant 0 : index
    %165 = vector.load %arg13[%164, %c0_70] : memref<640x32xf32, #tpu.memory_space<vmem>>, vector<1x32xf32>
    %c4 = arith.constant 4 : index
    %c0_71 = arith.constant 0 : index
    %166 = vector.load %arg15[%c4, %c0_71] : memref<16x64xf32, #tpu.memory_space<vmem>>, vector<1x32xf32>
    tpu.vector_store %arg15[%c4, %c0_71], %165 {strides = array<i32>} : memref<16x64xf32, #tpu.memory_space<vmem>>, vector<1x32xf32>,
    %c96_i32 = arith.constant 96 : i32
    %167 = arith.addi %c96_i32, %86 : i32
    %168 = arith.index_cast %167 : i32 to index
    %c0_72 = arith.constant 0 : index
    %169 = vector.load %arg14[%168, %c0_72] : memref<384x32xf32, #tpu.memory_space<vmem>>, vector<1x32xf32>
    %c4_73 = arith.constant 4 : index
    %c32_74 = arith.constant 32 : index
    %170 = vector.load %arg15[%c4_73, %c32_74] : memref<16x64xf32, #tpu.memory_space<vmem>>, vector<1x32xf32>
    tpu.vector_store %arg15[%c4_73, %c32_74], %169 {strides = array<i32>} : memref<16x64xf32, #tpu.memory_space<vmem>>, vector<1x32xf32>,
    %c200_i32 = arith.constant 200 : i32
    %171 = arith.addi %c200_i32, %26 : i32
    %172 = arith.index_cast %171 : i32 to index
    %c0_75 = arith.constant 0 : index
    %173 = vector.load %arg13[%172, %c0_75] : memref<640x32xf32, #tpu.memory_space<vmem>>, vector<1x32xf32>
    %c5 = arith.constant 5 : index
    %c0_76 = arith.constant 0 : index
    %174 = vector.load %arg15[%c5, %c0_76] : memref<16x64xf32, #tpu.memory_space<vmem>>, vector<1x32xf32>
    tpu.vector_store %arg15[%c5, %c0_76], %173 {strides = array<i32>} : memref<16x64xf32, #tpu.memory_space<vmem>>, vector<1x32xf32>,
    %c120_i32_77 = arith.constant 120 : i32
    %175 = arith.addi %c120_i32_77, %90 : i32
    %176 = arith.index_cast %175 : i32 to index
    %c0_78 = arith.constant 0 : index
    %177 = vector.load %arg14[%176, %c0_78] : memref<384x32xf32, #tpu.memory_space<vmem>>, vector<1x32xf32>
    %c5_79 = arith.constant 5 : index
    %c32_80 = arith.constant 32 : index
    %178 = vector.load %arg15[%c5_79, %c32_80] : memref<16x64xf32, #tpu.memory_space<vmem>>, vector<1x32xf32>
    tpu.vector_store %arg15[%c5_79, %c32_80], %177 {strides = array<i32>} : memref<16x64xf32, #tpu.memory_space<vmem>>, vector<1x32xf32>,
    %c240_i32 = arith.constant 240 : i32
    %179 = arith.addi %c240_i32, %30 : i32
    %180 = arith.index_cast %179 : i32 to index
    %c0_81 = arith.constant 0 : index
    %181 = vector.load %arg13[%180, %c0_81] : memref<640x32xf32, #tpu.memory_space<vmem>>, vector<1x32xf32>
    %c6 = arith.constant 6 : index
    %c0_82 = arith.constant 0 : index
    %182 = vector.load %arg15[%c6, %c0_82] : memref<16x64xf32, #tpu.memory_space<vmem>>, vector<1x32xf32>
    tpu.vector_store %arg15[%c6, %c0_82], %181 {strides = array<i32>} : memref<16x64xf32, #tpu.memory_space<vmem>>, vector<1x32xf32>,
    %c144_i32 = arith.constant 144 : i32
    %183 = arith.addi %c144_i32, %94 : i32
    %184 = arith.index_cast %183 : i32 to index
    %c0_83 = arith.constant 0 : index
    %185 = vector.load %arg14[%184, %c0_83] : memref<384x32xf32, #tpu.memory_space<vmem>>, vector<1x32xf32>
    %c6_84 = arith.constant 6 : index
    %c32_85 = arith.constant 32 : index
    %186 = vector.load %arg15[%c6_84, %c32_85] : memref<16x64xf32, #tpu.memory_space<vmem>>, vector<1x32xf32>
    tpu.vector_store %arg15[%c6_84, %c32_85], %185 {strides = array<i32>} : memref<16x64xf32, #tpu.memory_space<vmem>>, vector<1x32xf32>,
    %c280_i32 = arith.constant 280 : i32
    %187 = arith.addi %c280_i32, %34 : i32
    %188 = arith.index_cast %187 : i32 to index
    %c0_86 = arith.constant 0 : index
    %189 = vector.load %arg13[%188, %c0_86] : memref<640x32xf32, #tpu.memory_space<vmem>>, vector<1x32xf32>
    %c7 = arith.constant 7 : index
    %c0_87 = arith.constant 0 : index
    %190 = vector.load %arg15[%c7, %c0_87] : memref<16x64xf32, #tpu.memory_space<vmem>>, vector<1x32xf32>
    tpu.vector_store %arg15[%c7, %c0_87], %189 {strides = array<i32>} : memref<16x64xf32, #tpu.memory_space<vmem>>, vector<1x32xf32>,
    %c168_i32 = arith.constant 168 : i32
    %191 = arith.addi %c168_i32, %98 : i32
    %192 = arith.index_cast %191 : i32 to index
    %c0_88 = arith.constant 0 : index
    %193 = vector.load %arg14[%192, %c0_88] : memref<384x32xf32, #tpu.memory_space<vmem>>, vector<1x32xf32>
    %c7_89 = arith.constant 7 : index
    %c32_90 = arith.constant 32 : index
    %194 = vector.load %arg15[%c7_89, %c32_90] : memref<16x64xf32, #tpu.memory_space<vmem>>, vector<1x32xf32>
    tpu.vector_store %arg15[%c7_89, %c32_90], %193 {strides = array<i32>} : memref<16x64xf32, #tpu.memory_space<vmem>>, vector<1x32xf32>,
    %c320_i32 = arith.constant 320 : i32
    %195 = arith.addi %c320_i32, %38 : i32
    %196 = arith.index_cast %195 : i32 to index
    %c0_91 = arith.constant 0 : index
    %197 = vector.load %arg13[%196, %c0_91] : memref<640x32xf32, #tpu.memory_space<vmem>>, vector<1x32xf32>
    %c8 = arith.constant 8 : index
    %c0_92 = arith.constant 0 : index
    %198 = vector.load %arg15[%c8, %c0_92] : memref<16x64xf32, #tpu.memory_space<vmem>>, vector<1x32xf32>
    tpu.vector_store %arg15[%c8, %c0_92], %197 {strides = array<i32>} : memref<16x64xf32, #tpu.memory_space<vmem>>, vector<1x32xf32>,
    %c192_i32 = arith.constant 192 : i32
    %199 = arith.addi %c192_i32, %102 : i32
    %200 = arith.index_cast %199 : i32 to index
    %c0_93 = arith.constant 0 : index
    %201 = vector.load %arg14[%200, %c0_93] : memref<384x32xf32, #tpu.memory_space<vmem>>, vector<1x32xf32>
    %c8_94 = arith.constant 8 : index
    %c32_95 = arith.constant 32 : index
    %202 = vector.load %arg15[%c8_94, %c32_95] : memref<16x64xf32, #tpu.memory_space<vmem>>, vector<1x32xf32>
    tpu.vector_store %arg15[%c8_94, %c32_95], %201 {strides = array<i32>} : memref<16x64xf32, #tpu.memory_space<vmem>>, vector<1x32xf32>,
    %c360_i32 = arith.constant 360 : i32
    %203 = arith.addi %c360_i32, %42 : i32
    %204 = arith.index_cast %203 : i32 to index
    %c0_96 = arith.constant 0 : index
    %205 = vector.load %arg13[%204, %c0_96] : memref<640x32xf32, #tpu.memory_space<vmem>>, vector<1x32xf32>
    %c9 = arith.constant 9 : index
    %c0_97 = arith.constant 0 : index
    %206 = vector.load %arg15[%c9, %c0_97] : memref<16x64xf32, #tpu.memory_space<vmem>>, vector<1x32xf32>
    tpu.vector_store %arg15[%c9, %c0_97], %205 {strides = array<i32>} : memref<16x64xf32, #tpu.memory_space<vmem>>, vector<1x32xf32>,
    %c216_i32 = arith.constant 216 : i32
    %207 = arith.addi %c216_i32, %106 : i32
    %208 = arith.index_cast %207 : i32 to index
    %c0_98 = arith.constant 0 : index
    %209 = vector.load %arg14[%208, %c0_98] : memref<384x32xf32, #tpu.memory_space<vmem>>, vector<1x32xf32>
    %c9_99 = arith.constant 9 : index
    %c32_100 = arith.constant 32 : index
    %210 = vector.load %arg15[%c9_99, %c32_100] : memref<16x64xf32, #tpu.memory_space<vmem>>, vector<1x32xf32>
    tpu.vector_store %arg15[%c9_99, %c32_100], %209 {strides = array<i32>} : memref<16x64xf32, #tpu.memory_space<vmem>>, vector<1x32xf32>,
    %c400_i32 = arith.constant 400 : i32
    %211 = arith.addi %c400_i32, %46 : i32
    %212 = arith.index_cast %211 : i32 to index
    %c0_101 = arith.constant 0 : index
    %213 = vector.load %arg13[%212, %c0_101] : memref<640x32xf32, #tpu.memory_space<vmem>>, vector<1x32xf32>
    %c10 = arith.constant 10 : index
    %c0_102 = arith.constant 0 : index
    %214 = vector.load %arg15[%c10, %c0_102] : memref<16x64xf32, #tpu.memory_space<vmem>>, vector<1x32xf32>
    tpu.vector_store %arg15[%c10, %c0_102], %213 {strides = array<i32>} : memref<16x64xf32, #tpu.memory_space<vmem>>, vector<1x32xf32>,
    %c240_i32_103 = arith.constant 240 : i32
    %215 = arith.addi %c240_i32_103, %110 : i32
    %216 = arith.index_cast %215 : i32 to index
    %c0_104 = arith.constant 0 : index
    %217 = vector.load %arg14[%216, %c0_104] : memref<384x32xf32, #tpu.memory_space<vmem>>, vector<1x32xf32>
    %c10_105 = arith.constant 10 : index
    %c32_106 = arith.constant 32 : index
    %218 = vector.load %arg15[%c10_105, %c32_106] : memref<16x64xf32, #tpu.memory_space<vmem>>, vector<1x32xf32>
    tpu.vector_store %arg15[%c10_105, %c32_106], %217 {strides = array<i32>} : memref<16x64xf32, #tpu.memory_space<vmem>>, vector<1x32xf32>,
    %c440_i32 = arith.constant 440 : i32
    %219 = arith.addi %c440_i32, %50 : i32
    %220 = arith.index_cast %219 : i32 to index
    %c0_107 = arith.constant 0 : index
    %221 = vector.load %arg13[%220, %c0_107] : memref<640x32xf32, #tpu.memory_space<vmem>>, vector<1x32xf32>
    %c11 = arith.constant 11 : index
    %c0_108 = arith.constant 0 : index
    %222 = vector.load %arg15[%c11, %c0_108] : memref<16x64xf32, #tpu.memory_space<vmem>>, vector<1x32xf32>
    tpu.vector_store %arg15[%c11, %c0_108], %221 {strides = array<i32>} : memref<16x64xf32, #tpu.memory_space<vmem>>, vector<1x32xf32>,
    %c264_i32 = arith.constant 264 : i32
    %223 = arith.addi %c264_i32, %114 : i32
    %224 = arith.index_cast %223 : i32 to index
    %c0_109 = arith.constant 0 : index
    %225 = vector.load %arg14[%224, %c0_109] : memref<384x32xf32, #tpu.memory_space<vmem>>, vector<1x32xf32>
    %c11_110 = arith.constant 11 : index
    %c32_111 = arith.constant 32 : index
    %226 = vector.load %arg15[%c11_110, %c32_111] : memref<16x64xf32, #tpu.memory_space<vmem>>, vector<1x32xf32>
    tpu.vector_store %arg15[%c11_110, %c32_111], %225 {strides = array<i32>} : memref<16x64xf32, #tpu.memory_space<vmem>>, vector<1x32xf32>,
    %c480_i32 = arith.constant 480 : i32
    %227 = arith.addi %c480_i32, %54 : i32
    %228 = arith.index_cast %227 : i32 to index
    %c0_112 = arith.constant 0 : index
    %229 = vector.load %arg13[%228, %c0_112] : memref<640x32xf32, #tpu.memory_space<vmem>>, vector<1x32xf32>
    %c12 = arith.constant 12 : index
    %c0_113 = arith.constant 0 : index
    %230 = vector.load %arg15[%c12, %c0_113] : memref<16x64xf32, #tpu.memory_space<vmem>>, vector<1x32xf32>
    tpu.vector_store %arg15[%c12, %c0_113], %229 {strides = array<i32>} : memref<16x64xf32, #tpu.memory_space<vmem>>, vector<1x32xf32>,
    %c288_i32 = arith.constant 288 : i32
    %231 = arith.addi %c288_i32, %118 : i32
    %232 = arith.index_cast %231 : i32 to index
    %c0_114 = arith.constant 0 : index
    %233 = vector.load %arg14[%232, %c0_114] : memref<384x32xf32, #tpu.memory_space<vmem>>, vector<1x32xf32>
    %c12_115 = arith.constant 12 : index
    %c32_116 = arith.constant 32 : index
    %234 = vector.load %arg15[%c12_115, %c32_116] : memref<16x64xf32, #tpu.memory_space<vmem>>, vector<1x32xf32>
    tpu.vector_store %arg15[%c12_115, %c32_116], %233 {strides = array<i32>} : memref<16x64xf32, #tpu.memory_space<vmem>>, vector<1x32xf32>,
    %c520_i32 = arith.constant 520 : i32
    %235 = arith.addi %c520_i32, %58 : i32
    %236 = arith.index_cast %235 : i32 to index
    %c0_117 = arith.constant 0 : index
    %237 = vector.load %arg13[%236, %c0_117] : memref<640x32xf32, #tpu.memory_space<vmem>>, vector<1x32xf32>
    %c13 = arith.constant 13 : index
    %c0_118 = arith.constant 0 : index
    %238 = vector.load %arg15[%c13, %c0_118] : memref<16x64xf32, #tpu.memory_space<vmem>>, vector<1x32xf32>
    tpu.vector_store %arg15[%c13, %c0_118], %237 {strides = array<i32>} : memref<16x64xf32, #tpu.memory_space<vmem>>, vector<1x32xf32>,
    %c312_i32 = arith.constant 312 : i32
    %239 = arith.addi %c312_i32, %122 : i32
    %240 = arith.index_cast %239 : i32 to index
    %c0_119 = arith.constant 0 : index
    %241 = vector.load %arg14[%240, %c0_119] : memref<384x32xf32, #tpu.memory_space<vmem>>, vector<1x32xf32>
    %c13_120 = arith.constant 13 : index
    %c32_121 = arith.constant 32 : index
    %242 = vector.load %arg15[%c13_120, %c32_121] : memref<16x64xf32, #tpu.memory_space<vmem>>, vector<1x32xf32>
    tpu.vector_store %arg15[%c13_120, %c32_121], %241 {strides = array<i32>} : memref<16x64xf32, #tpu.memory_space<vmem>>, vector<1x32xf32>,
    %c560_i32 = arith.constant 560 : i32
    %243 = arith.addi %c560_i32, %62 : i32
    %244 = arith.index_cast %243 : i32 to index
    %c0_122 = arith.constant 0 : index
    %245 = vector.load %arg13[%244, %c0_122] : memref<640x32xf32, #tpu.memory_space<vmem>>, vector<1x32xf32>
    %c14 = arith.constant 14 : index
    %c0_123 = arith.constant 0 : index
    %246 = vector.load %arg15[%c14, %c0_123] : memref<16x64xf32, #tpu.memory_space<vmem>>, vector<1x32xf32>
    tpu.vector_store %arg15[%c14, %c0_123], %245 {strides = array<i32>} : memref<16x64xf32, #tpu.memory_space<vmem>>, vector<1x32xf32>,
    %c336_i32 = arith.constant 336 : i32
    %247 = arith.addi %c336_i32, %126 : i32
    %248 = arith.index_cast %247 : i32 to index
    %c0_124 = arith.constant 0 : index
    %249 = vector.load %arg14[%248, %c0_124] : memref<384x32xf32, #tpu.memory_space<vmem>>, vector<1x32xf32>
    %c14_125 = arith.constant 14 : index
    %c32_126 = arith.constant 32 : index
    %250 = vector.load %arg15[%c14_125, %c32_126] : memref<16x64xf32, #tpu.memory_space<vmem>>, vector<1x32xf32>
    tpu.vector_store %arg15[%c14_125, %c32_126], %249 {strides = array<i32>} : memref<16x64xf32, #tpu.memory_space<vmem>>, vector<1x32xf32>,
    %c600_i32 = arith.constant 600 : i32
    %251 = arith.addi %c600_i32, %66 : i32
    %252 = arith.index_cast %251 : i32 to index
    %c0_127 = arith.constant 0 : index
    %253 = vector.load %arg13[%252, %c0_127] : memref<640x32xf32, #tpu.memory_space<vmem>>, vector<1x32xf32>
    %c15 = arith.constant 15 : index
    %c0_128 = arith.constant 0 : index
    %254 = vector.load %arg15[%c15, %c0_128] : memref<16x64xf32, #tpu.memory_space<vmem>>, vector<1x32xf32>
    tpu.vector_store %arg15[%c15, %c0_128], %253 {strides = array<i32>} : memref<16x64xf32, #tpu.memory_space<vmem>>, vector<1x32xf32>,
    %c360_i32_129 = arith.constant 360 : i32
    %255 = arith.addi %c360_i32_129, %130 : i32
    %256 = arith.index_cast %255 : i32 to index
    %c0_130 = arith.constant 0 : index
    %257 = vector.load %arg14[%256, %c0_130] : memref<384x32xf32, #tpu.memory_space<vmem>>, vector<1x32xf32>
    %c15_131 = arith.constant 15 : index
    %c32_132 = arith.constant 32 : index
    %258 = vector.load %arg15[%c15_131, %c32_132] : memref<16x64xf32, #tpu.memory_space<vmem>>, vector<1x32xf32>
    tpu.vector_store %arg15[%c15_131, %c32_132], %257 {strides = array<i32>} : memref<16x64xf32, #tpu.memory_space<vmem>>, vector<1x32xf32>,
    %c0_133 = arith.constant 0 : index
    %c0_134 = arith.constant 0 : index
    %259 = vector.load %arg15[%c0_133, %c0_134] : memref<16x64xf32, #tpu.memory_space<vmem>>, vector<16x64xf32>
    %c0_135 = arith.constant 0 : index
    %c0_136 = arith.constant 0 : index
    %260 = vector.load %arg4[%c0_135, %c0_136] : memref<64x384xf32, #tpu.memory_space<vmem>>, vector<64x384xf32>
    %cst = arith.constant dense<0.000000e+00> : vector<16x384xf32>
    %261 = tpu.matmul %259, %260, %cst {dimension_numbers = #tpu.dot_dimension_numbers<[1], [0], [0], [1], [0, 0, 1, 1], [], []>} : vector<16x64xf32>, vector<64x384xf32>, vector<16x384xf32> -> vector<16x384xf32>
    %c0_137 = arith.constant 0 : index
    %c0_138 = arith.constant 0 : index
    %c0_139 = arith.constant 0 : index
    %262 = vector.load %arg3[%c0_137, %c0_138, %c0_139] : memref<1x16x8xf32, #tpu.memory_space<vmem>>, vector<1x16x8xf32>
    %263 = vector.shape_cast %262 : vector<1x16x8xf32> to vector<16x8xf32>
    %c0_140 = arith.constant 0 : index
    %c0_141 = arith.constant 0 : index
    %264 = vector.load %arg5[%c0_140, %c0_141] : memref<8x384xf32, #tpu.memory_space<vmem>>, vector<8x384xf32>
    %cst_142 = arith.constant dense<0.000000e+00> : vector<16x384xf32>
    %265 = tpu.matmul %263, %264, %cst_142 {dimension_numbers = #tpu.dot_dimension_numbers<[1], [0], [0], [1], [0, 0, 1, 1], [], []>} : vector<16x8xf32>, vector<8x384xf32>, vector<16x384xf32> -> vector<16x384xf32>
    %266 = arith.addf %261, %265 : vector<16x384xf32>
    %c0_143 = arith.constant 0 : index
    %c0_144 = arith.constant 0 : index
    %267 = vector.load %arg6[%c0_143, %c0_144] : memref<1x384xf32, #tpu.memory_space<vmem>>, vector<1x384xf32>
    %268 = vector.broadcast %267 : vector<1x384xf32> to vector<16x384xf32>
    %269 = arith.addf %266, %268 : vector<16x384xf32>
    %270 = vector.extract_strided_slice %269 {offsets = [0, 0], sizes = [16, 128], strides = [1, 1]} : vector<16x384xf32> to vector<16x128xf32>
    %271 = arith.negf %270 : vector<16x128xf32>
    %272 = math.exp %271 : vector<16x128xf32>
    %cst_145 = arith.constant 1.000000e+00 : f32
    %273 = vector.broadcast %cst_145 : f32 to vector<16x128xf32>
    %274 = arith.addf %273, %272 : vector<16x128xf32>
    %275 = arith.divf %273, %274 : vector<16x128xf32>
    %276 = vector.extract_strided_slice %269 {offsets = [0, 128], sizes = [16, 128], strides = [1, 1]} : vector<16x384xf32> to vector<16x128xf32>
    %277 = arith.negf %276 : vector<16x128xf32>
    %278 = math.exp %277 : vector<16x128xf32>
    %cst_146 = arith.constant 1.000000e+00 : f32
    %279 = vector.broadcast %cst_146 : f32 to vector<16x128xf32>
    %280 = arith.addf %279, %278 : vector<16x128xf32>
    %281 = arith.divf %279, %280 : vector<16x128xf32>
    %282 = vector.extract_strided_slice %269 {offsets = [0, 256], sizes = [16, 128], strides = [1, 1]} : vector<16x384xf32> to vector<16x128xf32>
    %c0_147 = arith.constant 0 : index
    %c0_148 = arith.constant 0 : index
    %283 = vector.load %arg7[%c0_147, %c0_148] : memref<1x128xf32, #tpu.memory_space<vmem>>, vector<1x128xf32>
    %284 = vector.broadcast %283 : vector<1x128xf32> to vector<16x128xf32>
    %285 = arith.mulf %275, %284 : vector<16x128xf32>
    %286 = arith.addf %282, %285 : vector<16x128xf32>
    %287 = math.tanh %286 : vector<16x128xf32>
    %cst_149 = arith.constant 1.000000e+00 : f32
    %288 = vector.broadcast %cst_149 : f32 to vector<16x128xf32>
    %289 = arith.subf %288, %281 : vector<16x128xf32>
    %290 = arith.mulf %289, %287 : vector<16x128xf32>
    %291 = tpu.iota {dimensions = array<i32: 1>} : vector<16x128xi32>
    %292 = arith.mulf %290, %290 : vector<16x128xf32>
    %c32_i32 = arith.constant 32 : i32
    %293 = vector.broadcast %c32_i32 : i32 to vector<16x128xi32>
    %294 = arith.cmpi slt, %291, %293 : vector<16x128xi32>
    %cst_150 = arith.constant 0.000000e+00 : f32
    %295 = vector.broadcast %cst_150 : f32 to vector<16x128xf32>
    %296 = arith.select %294, %292, %295 : vector<16x128xi1>, vector<16x128xf32>
    %cst_151 = arith.constant dense<0.000000e+00> : vector<16xf32>
    %297 = vector.multi_reduction <add>, %296, %cst_151 [1] : vector<16x128xf32> to vector<16xf32>
    %298 = vector.shape_cast %297 : vector<16xf32> to vector<16x1xf32>
    %c32_i32_152 = arith.constant 32 : i32
    %299 = vector.broadcast %c32_i32_152 : i32 to vector<16x128xi32>
    %300 = arith.cmpi sge, %291, %299 : vector<16x128xi32>
    %cst_153 = arith.constant 0.000000e+00 : f32
    %301 = vector.broadcast %cst_153 : f32 to vector<16x128xf32>
    %302 = arith.select %300, %292, %301 : vector<16x128xi1>, vector<16x128xf32>
    %cst_154 = arith.constant dense<0.000000e+00> : vector<16xf32>
    %303 = vector.multi_reduction <add>, %302, %cst_154 [1] : vector<16x128xf32> to vector<16xf32>
    %304 = vector.shape_cast %303 : vector<16xf32> to vector<16x1xf32>
    %c32_i32_155 = arith.constant 32 : i32
    %305 = vector.broadcast %c32_i32_155 : i32 to vector<16x128xi32>
    %306 = arith.cmpi slt, %291, %305 : vector<16x128xi32>
    %cst_156 = arith.constant 1.000000e-24 : f32
    %307 = vector.broadcast %cst_156 : f32 to vector<16x1xf32>
    %308 = arith.maximumf %298, %307 : vector<16x1xf32>
    %309 = math.rsqrt %308 : vector<16x1xf32>
    %cst_157 = arith.constant 1.000000e-24 : f32
    %310 = vector.broadcast %cst_157 : f32 to vector<16x1xf32>
    %311 = arith.maximumf %304, %310 : vector<16x1xf32>
    %312 = math.rsqrt %311 : vector<16x1xf32>
    %313 = vector.shape_cast %309 : vector<16x1xf32> to vector<16x1xf32>
    %314 = vector.broadcast %313 : vector<16x1xf32> to vector<16x128xf32>
    %315 = vector.shape_cast %312 : vector<16x1xf32> to vector<16x1xf32>
    %316 = vector.broadcast %315 : vector<16x1xf32> to vector<16x128xf32>
    %317 = arith.select %306, %314, %316 : vector<16x128xi1>, vector<16x128xf32>
    %318 = arith.mulf %290, %317 : vector<16x128xf32>
    %c0_158 = arith.constant 0 : index
    %c0_159 = arith.constant 0 : index
    %c0_160 = arith.constant 0 : index
    %319 = vector.load %arg10[%c0_158, %c0_159, %c0_160] : memref<1x16x128xf32, #tpu.memory_space<vmem>>, vector<1x16x128xf32>
    %320 = vector.shape_cast %319 : vector<1x16x128xf32> to vector<16x128xf32>
    %321 = vector.shape_cast %318 : vector<16x128xf32> to vector<1x16x128xf32>
    tpu.vector_store %arg10[%c0_158, %c0_159, %c0_160], %321 {strides = array<i32>} : memref<1x16x128xf32, #tpu.memory_space<vmem>>, vector<1x16x128xf32>,
    %c0_161 = arith.constant 0 : index
    %c0_162 = arith.constant 0 : index
    %c0_163 = arith.constant 0 : index
    %322 = vector.load %arg10[%c0_161, %c0_162, %c0_163] : memref<1x16x128xf32, #tpu.memory_space<vmem>>, vector<1x1x32xf32>
    %323 = vector.shape_cast %322 : vector<1x1x32xf32> to vector<1x32xf32>
    %c0_i32_164 = arith.constant 0 : i32
    %324 = arith.addi %c0_i32_164, %6 : i32
    %325 = arith.index_cast %324 : i32 to index
    %c0_165 = arith.constant 0 : index
    %326 = vector.load %arg13[%325, %c0_165] : memref<640x32xf32, #tpu.memory_space<vmem>>, vector<1x32xf32>
    tpu.vector_store %arg13[%325, %c0_165], %323 {strides = array<i32>} : memref<640x32xf32, #tpu.memory_space<vmem>>, vector<1x32xf32>,
    %c0_166 = arith.constant 0 : index
    %c0_167 = arith.constant 0 : index
    %c32_168 = arith.constant 32 : index
    %327 = vector.load %arg10[%c0_166, %c0_167, %c32_168] : memref<1x16x128xf32, #tpu.memory_space<vmem>>, vector<1x1x32xf32>
    %328 = vector.shape_cast %327 : vector<1x1x32xf32> to vector<1x32xf32>
    %c0_i32_169 = arith.constant 0 : i32
    %329 = arith.addi %c0_i32_169, %70 : i32
    %330 = arith.index_cast %329 : i32 to index
    %c0_170 = arith.constant 0 : index
    %331 = vector.load %arg14[%330, %c0_170] : memref<384x32xf32, #tpu.memory_space<vmem>>, vector<1x32xf32>
    tpu.vector_store %arg14[%330, %c0_170], %328 {strides = array<i32>} : memref<384x32xf32, #tpu.memory_space<vmem>>, vector<1x32xf32>,
    %c0_171 = arith.constant 0 : index
    %c1_172 = arith.constant 1 : index
    %c0_173 = arith.constant 0 : index
    %332 = vector.load %arg10[%c0_171, %c1_172, %c0_173] : memref<1x16x128xf32, #tpu.memory_space<vmem>>, vector<1x1x32xf32>
    %333 = vector.shape_cast %332 : vector<1x1x32xf32> to vector<1x32xf32>
    %c40_i32_174 = arith.constant 40 : i32
    %334 = arith.addi %c40_i32_174, %10 : i32
    %335 = arith.index_cast %334 : i32 to index
    %c0_175 = arith.constant 0 : index
    %336 = vector.load %arg13[%335, %c0_175] : memref<640x32xf32, #tpu.memory_space<vmem>>, vector<1x32xf32>
    tpu.vector_store %arg13[%335, %c0_175], %333 {strides = array<i32>} : memref<640x32xf32, #tpu.memory_space<vmem>>, vector<1x32xf32>,
    %c0_176 = arith.constant 0 : index
    %c1_177 = arith.constant 1 : index
    %c32_178 = arith.constant 32 : index
    %337 = vector.load %arg10[%c0_176, %c1_177, %c32_178] : memref<1x16x128xf32, #tpu.memory_space<vmem>>, vector<1x1x32xf32>
    %338 = vector.shape_cast %337 : vector<1x1x32xf32> to vector<1x32xf32>
    %c24_i32_179 = arith.constant 24 : i32
    %339 = arith.addi %c24_i32_179, %74 : i32
    %340 = arith.index_cast %339 : i32 to index
    %c0_180 = arith.constant 0 : index
    %341 = vector.load %arg14[%340, %c0_180] : memref<384x32xf32, #tpu.memory_space<vmem>>, vector<1x32xf32>
    tpu.vector_store %arg14[%340, %c0_180], %338 {strides = array<i32>} : memref<384x32xf32, #tpu.memory_space<vmem>>, vector<1x32xf32>,
    %c0_181 = arith.constant 0 : index
    %c2_182 = arith.constant 2 : index
    %c0_183 = arith.constant 0 : index
    %342 = vector.load %arg10[%c0_181, %c2_182, %c0_183] : memref<1x16x128xf32, #tpu.memory_space<vmem>>, vector<1x1x32xf32>
    %343 = vector.shape_cast %342 : vector<1x1x32xf32> to vector<1x32xf32>
    %c80_i32_184 = arith.constant 80 : i32
    %344 = arith.addi %c80_i32_184, %14 : i32
    %345 = arith.index_cast %344 : i32 to index
    %c0_185 = arith.constant 0 : index
    %346 = vector.load %arg13[%345, %c0_185] : memref<640x32xf32, #tpu.memory_space<vmem>>, vector<1x32xf32>
    tpu.vector_store %arg13[%345, %c0_185], %343 {strides = array<i32>} : memref<640x32xf32, #tpu.memory_space<vmem>>, vector<1x32xf32>,
    %c0_186 = arith.constant 0 : index
    %c2_187 = arith.constant 2 : index
    %c32_188 = arith.constant 32 : index
    %347 = vector.load %arg10[%c0_186, %c2_187, %c32_188] : memref<1x16x128xf32, #tpu.memory_space<vmem>>, vector<1x1x32xf32>
    %348 = vector.shape_cast %347 : vector<1x1x32xf32> to vector<1x32xf32>
    %c48_i32_189 = arith.constant 48 : i32
    %349 = arith.addi %c48_i32_189, %78 : i32
    %350 = arith.index_cast %349 : i32 to index
    %c0_190 = arith.constant 0 : index
    %351 = vector.load %arg14[%350, %c0_190] : memref<384x32xf32, #tpu.memory_space<vmem>>, vector<1x32xf32>
    tpu.vector_store %arg14[%350, %c0_190], %348 {strides = array<i32>} : memref<384x32xf32, #tpu.memory_space<vmem>>, vector<1x32xf32>,
    %c0_191 = arith.constant 0 : index
    %c3_192 = arith.constant 3 : index
    %c0_193 = arith.constant 0 : index
    %352 = vector.load %arg10[%c0_191, %c3_192, %c0_193] : memref<1x16x128xf32, #tpu.memory_space<vmem>>, vector<1x1x32xf32>
    %353 = vector.shape_cast %352 : vector<1x1x32xf32> to vector<1x32xf32>
    %c120_i32_194 = arith.constant 120 : i32
    %354 = arith.addi %c120_i32_194, %18 : i32
    %355 = arith.index_cast %354 : i32 to index
    %c0_195 = arith.constant 0 : index
    %356 = vector.load %arg13[%355, %c0_195] : memref<640x32xf32, #tpu.memory_space<vmem>>, vector<1x32xf32>
    tpu.vector_store %arg13[%355, %c0_195], %353 {strides = array<i32>} : memref<640x32xf32, #tpu.memory_space<vmem>>, vector<1x32xf32>,
    %c0_196 = arith.constant 0 : index
    %c3_197 = arith.constant 3 : index
    %c32_198 = arith.constant 32 : index
    %357 = vector.load %arg10[%c0_196, %c3_197, %c32_198] : memref<1x16x128xf32, #tpu.memory_space<vmem>>, vector<1x1x32xf32>
    %358 = vector.shape_cast %357 : vector<1x1x32xf32> to vector<1x32xf32>
    %c72_i32_199 = arith.constant 72 : i32
    %359 = arith.addi %c72_i32_199, %82 : i32
    %360 = arith.index_cast %359 : i32 to index
    %c0_200 = arith.constant 0 : index
    %361 = vector.load %arg14[%360, %c0_200] : memref<384x32xf32, #tpu.memory_space<vmem>>, vector<1x32xf32>
    tpu.vector_store %arg14[%360, %c0_200], %358 {strides = array<i32>} : memref<384x32xf32, #tpu.memory_space<vmem>>, vector<1x32xf32>,
    %c0_201 = arith.constant 0 : index
    %c4_202 = arith.constant 4 : index
    %c0_203 = arith.constant 0 : index
    %362 = vector.load %arg10[%c0_201, %c4_202, %c0_203] : memref<1x16x128xf32, #tpu.memory_space<vmem>>, vector<1x1x32xf32>
    %363 = vector.shape_cast %362 : vector<1x1x32xf32> to vector<1x32xf32>
    %c160_i32_204 = arith.constant 160 : i32
    %364 = arith.addi %c160_i32_204, %22 : i32
    %365 = arith.index_cast %364 : i32 to index
    %c0_205 = arith.constant 0 : index
    %366 = vector.load %arg13[%365, %c0_205] : memref<640x32xf32, #tpu.memory_space<vmem>>, vector<1x32xf32>
    tpu.vector_store %arg13[%365, %c0_205], %363 {strides = array<i32>} : memref<640x32xf32, #tpu.memory_space<vmem>>, vector<1x32xf32>,
    %c0_206 = arith.constant 0 : index
    %c4_207 = arith.constant 4 : index
    %c32_208 = arith.constant 32 : index
    %367 = vector.load %arg10[%c0_206, %c4_207, %c32_208] : memref<1x16x128xf32, #tpu.memory_space<vmem>>, vector<1x1x32xf32>
    %368 = vector.shape_cast %367 : vector<1x1x32xf32> to vector<1x32xf32>
    %c96_i32_209 = arith.constant 96 : i32
    %369 = arith.addi %c96_i32_209, %86 : i32
    %370 = arith.index_cast %369 : i32 to index
    %c0_210 = arith.constant 0 : index
    %371 = vector.load %arg14[%370, %c0_210] : memref<384x32xf32, #tpu.memory_space<vmem>>, vector<1x32xf32>
    tpu.vector_store %arg14[%370, %c0_210], %368 {strides = array<i32>} : memref<384x32xf32, #tpu.memory_space<vmem>>, vector<1x32xf32>,
    %c0_211 = arith.constant 0 : index
    %c5_212 = arith.constant 5 : index
    %c0_213 = arith.constant 0 : index
    %372 = vector.load %arg10[%c0_211, %c5_212, %c0_213] : memref<1x16x128xf32, #tpu.memory_space<vmem>>, vector<1x1x32xf32>
    %373 = vector.shape_cast %372 : vector<1x1x32xf32> to vector<1x32xf32>
    %c200_i32_214 = arith.constant 200 : i32
    %374 = arith.addi %c200_i32_214, %26 : i32
    %375 = arith.index_cast %374 : i32 to index
    %c0_215 = arith.constant 0 : index
    %376 = vector.load %arg13[%375, %c0_215] : memref<640x32xf32, #tpu.memory_space<vmem>>, vector<1x32xf32>
    tpu.vector_store %arg13[%375, %c0_215], %373 {strides = array<i32>} : memref<640x32xf32, #tpu.memory_space<vmem>>, vector<1x32xf32>,
    %c0_216 = arith.constant 0 : index
    %c5_217 = arith.constant 5 : index
    %c32_218 = arith.constant 32 : index
    %377 = vector.load %arg10[%c0_216, %c5_217, %c32_218] : memref<1x16x128xf32, #tpu.memory_space<vmem>>, vector<1x1x32xf32>
    %378 = vector.shape_cast %377 : vector<1x1x32xf32> to vector<1x32xf32>
    %c120_i32_219 = arith.constant 120 : i32
    %379 = arith.addi %c120_i32_219, %90 : i32
    %380 = arith.index_cast %379 : i32 to index
    %c0_220 = arith.constant 0 : index
    %381 = vector.load %arg14[%380, %c0_220] : memref<384x32xf32, #tpu.memory_space<vmem>>, vector<1x32xf32>
    tpu.vector_store %arg14[%380, %c0_220], %378 {strides = array<i32>} : memref<384x32xf32, #tpu.memory_space<vmem>>, vector<1x32xf32>,
    %c0_221 = arith.constant 0 : index
    %c6_222 = arith.constant 6 : index
    %c0_223 = arith.constant 0 : index
    %382 = vector.load %arg10[%c0_221, %c6_222, %c0_223] : memref<1x16x128xf32, #tpu.memory_space<vmem>>, vector<1x1x32xf32>
    %383 = vector.shape_cast %382 : vector<1x1x32xf32> to vector<1x32xf32>
    %c240_i32_224 = arith.constant 240 : i32
    %384 = arith.addi %c240_i32_224, %30 : i32
    %385 = arith.index_cast %384 : i32 to index
    %c0_225 = arith.constant 0 : index
    %386 = vector.load %arg13[%385, %c0_225] : memref<640x32xf32, #tpu.memory_space<vmem>>, vector<1x32xf32>
    tpu.vector_store %arg13[%385, %c0_225], %383 {strides = array<i32>} : memref<640x32xf32, #tpu.memory_space<vmem>>, vector<1x32xf32>,
    %c0_226 = arith.constant 0 : index
    %c6_227 = arith.constant 6 : index
    %c32_228 = arith.constant 32 : index
    %387 = vector.load %arg10[%c0_226, %c6_227, %c32_228] : memref<1x16x128xf32, #tpu.memory_space<vmem>>, vector<1x1x32xf32>
    %388 = vector.shape_cast %387 : vector<1x1x32xf32> to vector<1x32xf32>
    %c144_i32_229 = arith.constant 144 : i32
    %389 = arith.addi %c144_i32_229, %94 : i32
    %390 = arith.index_cast %389 : i32 to index
    %c0_230 = arith.constant 0 : index
    %391 = vector.load %arg14[%390, %c0_230] : memref<384x32xf32, #tpu.memory_space<vmem>>, vector<1x32xf32>
    tpu.vector_store %arg14[%390, %c0_230], %388 {strides = array<i32>} : memref<384x32xf32, #tpu.memory_space<vmem>>, vector<1x32xf32>,
    %c0_231 = arith.constant 0 : index
    %c7_232 = arith.constant 7 : index
    %c0_233 = arith.constant 0 : index
    %392 = vector.load %arg10[%c0_231, %c7_232, %c0_233] : memref<1x16x128xf32, #tpu.memory_space<vmem>>, vector<1x1x32xf32>
    %393 = vector.shape_cast %392 : vector<1x1x32xf32> to vector<1x32xf32>
    %c280_i32_234 = arith.constant 280 : i32
    %394 = arith.addi %c280_i32_234, %34 : i32
    %395 = arith.index_cast %394 : i32 to index
    %c0_235 = arith.constant 0 : index
    %396 = vector.load %arg13[%395, %c0_235] : memref<640x32xf32, #tpu.memory_space<vmem>>, vector<1x32xf32>
    tpu.vector_store %arg13[%395, %c0_235], %393 {strides = array<i32>} : memref<640x32xf32, #tpu.memory_space<vmem>>, vector<1x32xf32>,
    %c0_236 = arith.constant 0 : index
    %c7_237 = arith.constant 7 : index
    %c32_238 = arith.constant 32 : index
    %397 = vector.load %arg10[%c0_236, %c7_237, %c32_238] : memref<1x16x128xf32, #tpu.memory_space<vmem>>, vector<1x1x32xf32>
    %398 = vector.shape_cast %397 : vector<1x1x32xf32> to vector<1x32xf32>
    %c168_i32_239 = arith.constant 168 : i32
    %399 = arith.addi %c168_i32_239, %98 : i32
    %400 = arith.index_cast %399 : i32 to index
    %c0_240 = arith.constant 0 : index
    %401 = vector.load %arg14[%400, %c0_240] : memref<384x32xf32, #tpu.memory_space<vmem>>, vector<1x32xf32>
    tpu.vector_store %arg14[%400, %c0_240], %398 {strides = array<i32>} : memref<384x32xf32, #tpu.memory_space<vmem>>, vector<1x32xf32>,
    %c0_241 = arith.constant 0 : index
    %c8_242 = arith.constant 8 : index
    %c0_243 = arith.constant 0 : index
    %402 = vector.load %arg10[%c0_241, %c8_242, %c0_243] : memref<1x16x128xf32, #tpu.memory_space<vmem>>, vector<1x1x32xf32>
    %403 = vector.shape_cast %402 : vector<1x1x32xf32> to vector<1x32xf32>
    %c320_i32_244 = arith.constant 320 : i32
    %404 = arith.addi %c320_i32_244, %38 : i32
    %405 = arith.index_cast %404 : i32 to index
    %c0_245 = arith.constant 0 : index
    %406 = vector.load %arg13[%405, %c0_245] : memref<640x32xf32, #tpu.memory_space<vmem>>, vector<1x32xf32>
    tpu.vector_store %arg13[%405, %c0_245], %403 {strides = array<i32>} : memref<640x32xf32, #tpu.memory_space<vmem>>, vector<1x32xf32>,
    %c0_246 = arith.constant 0 : index
    %c8_247 = arith.constant 8 : index
    %c32_248 = arith.constant 32 : index
    %407 = vector.load %arg10[%c0_246, %c8_247, %c32_248] : memref<1x16x128xf32, #tpu.memory_space<vmem>>, vector<1x1x32xf32>
    %408 = vector.shape_cast %407 : vector<1x1x32xf32> to vector<1x32xf32>
    %c192_i32_249 = arith.constant 192 : i32
    %409 = arith.addi %c192_i32_249, %102 : i32
    %410 = arith.index_cast %409 : i32 to index
    %c0_250 = arith.constant 0 : index
    %411 = vector.load %arg14[%410, %c0_250] : memref<384x32xf32, #tpu.memory_space<vmem>>, vector<1x32xf32>
    tpu.vector_store %arg14[%410, %c0_250], %408 {strides = array<i32>} : memref<384x32xf32, #tpu.memory_space<vmem>>, vector<1x32xf32>,
    %c0_251 = arith.constant 0 : index
    %c9_252 = arith.constant 9 : index
    %c0_253 = arith.constant 0 : index
    %412 = vector.load %arg10[%c0_251, %c9_252, %c0_253] : memref<1x16x128xf32, #tpu.memory_space<vmem>>, vector<1x1x32xf32>
    %413 = vector.shape_cast %412 : vector<1x1x32xf32> to vector<1x32xf32>
    %c360_i32_254 = arith.constant 360 : i32
    %414 = arith.addi %c360_i32_254, %42 : i32
    %415 = arith.index_cast %414 : i32 to index
    %c0_255 = arith.constant 0 : index
    %416 = vector.load %arg13[%415, %c0_255] : memref<640x32xf32, #tpu.memory_space<vmem>>, vector<1x32xf32>
    tpu.vector_store %arg13[%415, %c0_255], %413 {strides = array<i32>} : memref<640x32xf32, #tpu.memory_space<vmem>>, vector<1x32xf32>,
    %c0_256 = arith.constant 0 : index
    %c9_257 = arith.constant 9 : index
    %c32_258 = arith.constant 32 : index
    %417 = vector.load %arg10[%c0_256, %c9_257, %c32_258] : memref<1x16x128xf32, #tpu.memory_space<vmem>>, vector<1x1x32xf32>
    %418 = vector.shape_cast %417 : vector<1x1x32xf32> to vector<1x32xf32>
    %c216_i32_259 = arith.constant 216 : i32
    %419 = arith.addi %c216_i32_259, %106 : i32
    %420 = arith.index_cast %419 : i32 to index
    %c0_260 = arith.constant 0 : index
    %421 = vector.load %arg14[%420, %c0_260] : memref<384x32xf32, #tpu.memory_space<vmem>>, vector<1x32xf32>
    tpu.vector_store %arg14[%420, %c0_260], %418 {strides = array<i32>} : memref<384x32xf32, #tpu.memory_space<vmem>>, vector<1x32xf32>,
    %c0_261 = arith.constant 0 : index
    %c10_262 = arith.constant 10 : index
    %c0_263 = arith.constant 0 : index
    %422 = vector.load %arg10[%c0_261, %c10_262, %c0_263] : memref<1x16x128xf32, #tpu.memory_space<vmem>>, vector<1x1x32xf32>
    %423 = vector.shape_cast %422 : vector<1x1x32xf32> to vector<1x32xf32>
    %c400_i32_264 = arith.constant 400 : i32
    %424 = arith.addi %c400_i32_264, %46 : i32
    %425 = arith.index_cast %424 : i32 to index
    %c0_265 = arith.constant 0 : index
    %426 = vector.load %arg13[%425, %c0_265] : memref<640x32xf32, #tpu.memory_space<vmem>>, vector<1x32xf32>
    tpu.vector_store %arg13[%425, %c0_265], %423 {strides = array<i32>} : memref<640x32xf32, #tpu.memory_space<vmem>>, vector<1x32xf32>,
    %c0_266 = arith.constant 0 : index
    %c10_267 = arith.constant 10 : index
    %c32_268 = arith.constant 32 : index
    %427 = vector.load %arg10[%c0_266, %c10_267, %c32_268] : memref<1x16x128xf32, #tpu.memory_space<vmem>>, vector<1x1x32xf32>
    %428 = vector.shape_cast %427 : vector<1x1x32xf32> to vector<1x32xf32>
    %c240_i32_269 = arith.constant 240 : i32
    %429 = arith.addi %c240_i32_269, %110 : i32
    %430 = arith.index_cast %429 : i32 to index
    %c0_270 = arith.constant 0 : index
    %431 = vector.load %arg14[%430, %c0_270] : memref<384x32xf32, #tpu.memory_space<vmem>>, vector<1x32xf32>
    tpu.vector_store %arg14[%430, %c0_270], %428 {strides = array<i32>} : memref<384x32xf32, #tpu.memory_space<vmem>>, vector<1x32xf32>,
    %c0_271 = arith.constant 0 : index
    %c11_272 = arith.constant 11 : index
    %c0_273 = arith.constant 0 : index
    %432 = vector.load %arg10[%c0_271, %c11_272, %c0_273] : memref<1x16x128xf32, #tpu.memory_space<vmem>>, vector<1x1x32xf32>
    %433 = vector.shape_cast %432 : vector<1x1x32xf32> to vector<1x32xf32>
    %c440_i32_274 = arith.constant 440 : i32
    %434 = arith.addi %c440_i32_274, %50 : i32
    %435 = arith.index_cast %434 : i32 to index
    %c0_275 = arith.constant 0 : index
    %436 = vector.load %arg13[%435, %c0_275] : memref<640x32xf32, #tpu.memory_space<vmem>>, vector<1x32xf32>
    tpu.vector_store %arg13[%435, %c0_275], %433 {strides = array<i32>} : memref<640x32xf32, #tpu.memory_space<vmem>>, vector<1x32xf32>,
    %c0_276 = arith.constant 0 : index
    %c11_277 = arith.constant 11 : index
    %c32_278 = arith.constant 32 : index
    %437 = vector.load %arg10[%c0_276, %c11_277, %c32_278] : memref<1x16x128xf32, #tpu.memory_space<vmem>>, vector<1x1x32xf32>
    %438 = vector.shape_cast %437 : vector<1x1x32xf32> to vector<1x32xf32>
    %c264_i32_279 = arith.constant 264 : i32
    %439 = arith.addi %c264_i32_279, %114 : i32
    %440 = arith.index_cast %439 : i32 to index
    %c0_280 = arith.constant 0 : index
    %441 = vector.load %arg14[%440, %c0_280] : memref<384x32xf32, #tpu.memory_space<vmem>>, vector<1x32xf32>
    tpu.vector_store %arg14[%440, %c0_280], %438 {strides = array<i32>} : memref<384x32xf32, #tpu.memory_space<vmem>>, vector<1x32xf32>,
    %c0_281 = arith.constant 0 : index
    %c12_282 = arith.constant 12 : index
    %c0_283 = arith.constant 0 : index
    %442 = vector.load %arg10[%c0_281, %c12_282, %c0_283] : memref<1x16x128xf32, #tpu.memory_space<vmem>>, vector<1x1x32xf32>
    %443 = vector.shape_cast %442 : vector<1x1x32xf32> to vector<1x32xf32>
    %c480_i32_284 = arith.constant 480 : i32
    %444 = arith.addi %c480_i32_284, %54 : i32
    %445 = arith.index_cast %444 : i32 to index
    %c0_285 = arith.constant 0 : index
    %446 = vector.load %arg13[%445, %c0_285] : memref<640x32xf32, #tpu.memory_space<vmem>>, vector<1x32xf32>
    tpu.vector_store %arg13[%445, %c0_285], %443 {strides = array<i32>} : memref<640x32xf32, #tpu.memory_space<vmem>>, vector<1x32xf32>,
    %c0_286 = arith.constant 0 : index
    %c12_287 = arith.constant 12 : index
    %c32_288 = arith.constant 32 : index
    %447 = vector.load %arg10[%c0_286, %c12_287, %c32_288] : memref<1x16x128xf32, #tpu.memory_space<vmem>>, vector<1x1x32xf32>
    %448 = vector.shape_cast %447 : vector<1x1x32xf32> to vector<1x32xf32>
    %c288_i32_289 = arith.constant 288 : i32
    %449 = arith.addi %c288_i32_289, %118 : i32
    %450 = arith.index_cast %449 : i32 to index
    %c0_290 = arith.constant 0 : index
    %451 = vector.load %arg14[%450, %c0_290] : memref<384x32xf32, #tpu.memory_space<vmem>>, vector<1x32xf32>
    tpu.vector_store %arg14[%450, %c0_290], %448 {strides = array<i32>} : memref<384x32xf32, #tpu.memory_space<vmem>>, vector<1x32xf32>,
    %c0_291 = arith.constant 0 : index
    %c13_292 = arith.constant 13 : index
    %c0_293 = arith.constant 0 : index
    %452 = vector.load %arg10[%c0_291, %c13_292, %c0_293] : memref<1x16x128xf32, #tpu.memory_space<vmem>>, vector<1x1x32xf32>
    %453 = vector.shape_cast %452 : vector<1x1x32xf32> to vector<1x32xf32>
    %c520_i32_294 = arith.constant 520 : i32
    %454 = arith.addi %c520_i32_294, %58 : i32
    %455 = arith.index_cast %454 : i32 to index
    %c0_295 = arith.constant 0 : index
    %456 = vector.load %arg13[%455, %c0_295] : memref<640x32xf32, #tpu.memory_space<vmem>>, vector<1x32xf32>
    tpu.vector_store %arg13[%455, %c0_295], %453 {strides = array<i32>} : memref<640x32xf32, #tpu.memory_space<vmem>>, vector<1x32xf32>,
    %c0_296 = arith.constant 0 : index
    %c13_297 = arith.constant 13 : index
    %c32_298 = arith.constant 32 : index
    %457 = vector.load %arg10[%c0_296, %c13_297, %c32_298] : memref<1x16x128xf32, #tpu.memory_space<vmem>>, vector<1x1x32xf32>
    %458 = vector.shape_cast %457 : vector<1x1x32xf32> to vector<1x32xf32>
    %c312_i32_299 = arith.constant 312 : i32
    %459 = arith.addi %c312_i32_299, %122 : i32
    %460 = arith.index_cast %459 : i32 to index
    %c0_300 = arith.constant 0 : index
    %461 = vector.load %arg14[%460, %c0_300] : memref<384x32xf32, #tpu.memory_space<vmem>>, vector<1x32xf32>
    tpu.vector_store %arg14[%460, %c0_300], %458 {strides = array<i32>} : memref<384x32xf32, #tpu.memory_space<vmem>>, vector<1x32xf32>,
    %c0_301 = arith.constant 0 : index
    %c14_302 = arith.constant 14 : index
    %c0_303 = arith.constant 0 : index
    %462 = vector.load %arg10[%c0_301, %c14_302, %c0_303] : memref<1x16x128xf32, #tpu.memory_space<vmem>>, vector<1x1x32xf32>
    %463 = vector.shape_cast %462 : vector<1x1x32xf32> to vector<1x32xf32>
    %c560_i32_304 = arith.constant 560 : i32
    %464 = arith.addi %c560_i32_304, %62 : i32
    %465 = arith.index_cast %464 : i32 to index
    %c0_305 = arith.constant 0 : index
    %466 = vector.load %arg13[%465, %c0_305] : memref<640x32xf32, #tpu.memory_space<vmem>>, vector<1x32xf32>
    tpu.vector_store %arg13[%465, %c0_305], %463 {strides = array<i32>} : memref<640x32xf32, #tpu.memory_space<vmem>>, vector<1x32xf32>,
    %c0_306 = arith.constant 0 : index
    %c14_307 = arith.constant 14 : index
    %c32_308 = arith.constant 32 : index
    %467 = vector.load %arg10[%c0_306, %c14_307, %c32_308] : memref<1x16x128xf32, #tpu.memory_space<vmem>>, vector<1x1x32xf32>
    %468 = vector.shape_cast %467 : vector<1x1x32xf32> to vector<1x32xf32>
    %c336_i32_309 = arith.constant 336 : i32
    %469 = arith.addi %c336_i32_309, %126 : i32
    %470 = arith.index_cast %469 : i32 to index
    %c0_310 = arith.constant 0 : index
    %471 = vector.load %arg14[%470, %c0_310] : memref<384x32xf32, #tpu.memory_space<vmem>>, vector<1x32xf32>
    tpu.vector_store %arg14[%470, %c0_310], %468 {strides = array<i32>} : memref<384x32xf32, #tpu.memory_space<vmem>>, vector<1x32xf32>,
    %c0_311 = arith.constant 0 : index
    %c15_312 = arith.constant 15 : index
    %c0_313 = arith.constant 0 : index
    %472 = vector.load %arg10[%c0_311, %c15_312, %c0_313] : memref<1x16x128xf32, #tpu.memory_space<vmem>>, vector<1x1x32xf32>
    %473 = vector.shape_cast %472 : vector<1x1x32xf32> to vector<1x32xf32>
    %c600_i32_314 = arith.constant 600 : i32
    %474 = arith.addi %c600_i32_314, %66 : i32
    %475 = arith.index_cast %474 : i32 to index
    %c0_315 = arith.constant 0 : index
    %476 = vector.load %arg13[%475, %c0_315] : memref<640x32xf32, #tpu.memory_space<vmem>>, vector<1x32xf32>
    tpu.vector_store %arg13[%475, %c0_315], %473 {strides = array<i32>} : memref<640x32xf32, #tpu.memory_space<vmem>>, vector<1x32xf32>,
    %c0_316 = arith.constant 0 : index
    %c15_317 = arith.constant 15 : index
    %c32_318 = arith.constant 32 : index
    %477 = vector.load %arg10[%c0_316, %c15_317, %c32_318] : memref<1x16x128xf32, #tpu.memory_space<vmem>>, vector<1x1x32xf32>
    %478 = vector.shape_cast %477 : vector<1x1x32xf32> to vector<1x32xf32>
    %c360_i32_319 = arith.constant 360 : i32
    %479 = arith.addi %c360_i32_319, %130 : i32
    %480 = arith.index_cast %479 : i32 to index
    %c0_320 = arith.constant 0 : index
    %481 = vector.load %arg14[%480, %c0_320] : memref<384x32xf32, #tpu.memory_space<vmem>>, vector<1x32xf32>
    tpu.vector_store %arg14[%480, %c0_320], %478 {strides = array<i32>} : memref<384x32xf32, #tpu.memory_space<vmem>>, vector<1x32xf32>,
    %c7_i32_321 = arith.constant 7 : i32
    %482 = arith.cmpi eq, %arg0, %c7_i32_321 : i32
    %483 = arith.extui %482 : i1 to i32
    %c0_i32_322 = arith.constant 0 : i32
    %484 = arith.cmpi ne, %483, %c0_i32_322 : i32
    scf.if %484 {
      %c0_i32_323 = arith.constant 0 : i32
      %485 = tpu.memref_slice %arg16[%c0_i32_323] : memref<2x!tpu.dma_semaphore, #tpu.memory_space<semaphore_mem>> -> memref<1x!tpu.dma_semaphore, #tpu.memory_space<semaphore_mem>>
      %486 = tpu.memref_squeeze %485 : memref<1x!tpu.dma_semaphore, #tpu.memory_space<semaphore_mem>> -> memref<!tpu.dma_semaphore, #tpu.memory_space<semaphore_mem>>
      tpu.enqueue_dma source(%arg13 : memref<640x32xf32, #tpu.memory_space<vmem>>) target(%arg11 : memref<640x32xf32, #tpu.memory_space<any>>) target_semaphore(%486 : memref<!tpu.dma_semaphore, #tpu.memory_space<semaphore_mem>>)
      %c1_i32_324 = arith.constant 1 : i32
      %487 = tpu.memref_slice %arg16[%c1_i32_324] : memref<2x!tpu.dma_semaphore, #tpu.memory_space<semaphore_mem>> -> memref<1x!tpu.dma_semaphore, #tpu.memory_space<semaphore_mem>>
      %488 = tpu.memref_squeeze %487 : memref<1x!tpu.dma_semaphore, #tpu.memory_space<semaphore_mem>> -> memref<!tpu.dma_semaphore, #tpu.memory_space<semaphore_mem>>
      tpu.enqueue_dma source(%arg14 : memref<384x32xf32, #tpu.memory_space<vmem>>) target(%arg12 : memref<384x32xf32, #tpu.memory_space<any>>) target_semaphore(%488 : memref<!tpu.dma_semaphore, #tpu.memory_space<semaphore_mem>>)
      %c0_i32_325 = arith.constant 0 : i32
      %489 = tpu.memref_slice %arg16[%c0_i32_325] : memref<2x!tpu.dma_semaphore, #tpu.memory_space<semaphore_mem>> -> memref<1x!tpu.dma_semaphore, #tpu.memory_space<semaphore_mem>>
      %490 = tpu.memref_squeeze %489 : memref<1x!tpu.dma_semaphore, #tpu.memory_space<semaphore_mem>> -> memref<!tpu.dma_semaphore, #tpu.memory_space<semaphore_mem>>
      tpu.wait_dma2 semaphore(%490 : memref<!tpu.dma_semaphore, #tpu.memory_space<semaphore_mem>>) src(%arg13 : memref<640x32xf32, #tpu.memory_space<vmem>>) dst(%arg11 : memref<640x32xf32, #tpu.memory_space<any>>)
      %c1_i32_326 = arith.constant 1 : i32
      %491 = tpu.memref_slice %arg16[%c1_i32_326] : memref<2x!tpu.dma_semaphore, #tpu.memory_space<semaphore_mem>> -> memref<1x!tpu.dma_semaphore, #tpu.memory_space<semaphore_mem>>
      %492 = tpu.memref_squeeze %491 : memref<1x!tpu.dma_semaphore, #tpu.memory_space<semaphore_mem>> -> memref<!tpu.dma_semaphore, #tpu.memory_space<semaphore_mem>>
      tpu.wait_dma2 semaphore(%492 : memref<!tpu.dma_semaphore, #tpu.memory_space<semaphore_mem>>) src(%arg14 : memref<384x32xf32, #tpu.memory_space<vmem>>) dst(%arg12 : memref<384x32xf32, #tpu.memory_space<any>>)
    } else {
    }
    return
  }
  func.func @transform_0(%arg0: i32, %arg1: memref<128xi32, #tpu.memory_space<smem>>, %arg2: memref<128xi32, #tpu.memory_space<smem>>) -> (i32, i32, i32) {
    %c0_i32 = arith.constant 0 : i32
    %c0_i32_0 = arith.constant 0 : i32
    %c0_i32_1 = arith.constant 0 : i32
    return %arg0, %c0_i32, %c0_i32_0 : i32, i32, i32
  }
  func.func @transform_1(%arg0: i32, %arg1: memref<128xi32, #tpu.memory_space<smem>>, %arg2: memref<128xi32, #tpu.memory_space<smem>>) -> (i32, i32) {
    %c0_i32 = arith.constant 0 : i32
    %c0_i32_0 = arith.constant 0 : i32
    %c0_i32_1 = arith.constant 0 : i32
    return %c0_i32, %c0_i32_0 : i32, i32
  }
  func.func @transform_2(%arg0: i32, %arg1: memref<128xi32, #tpu.memory_space<smem>>, %arg2: memref<128xi32, #tpu.memory_space<smem>>) -> (i32, i32) {
    %c0_i32 = arith.constant 0 : i32
    %c0_i32_0 = arith.constant 0 : i32
    %c0_i32_1 = arith.constant 0 : i32
    return %c0_i32, %c0_i32_0 : i32, i32
  }
  func.func @transform_3(%arg0: i32, %arg1: memref<128xi32, #tpu.memory_space<smem>>, %arg2: memref<128xi32, #tpu.memory_space<smem>>) -> (i32, i32) {
    %c0_i32 = arith.constant 0 : i32
    %c0_i32_0 = arith.constant 0 : i32
    %c0_i32_1 = arith.constant 0 : i32
    return %c0_i32, %c0_i32_0 : i32, i32
  }
  func.func @transform_4(%arg0: i32, %arg1: memref<128xi32, #tpu.memory_space<smem>>, %arg2: memref<128xi32, #tpu.memory_space<smem>>) -> (i32, i32) {
    %c0_i32 = arith.constant 0 : i32
    %c0_i32_0 = arith.constant 0 : i32
    %c0_i32_1 = arith.constant 0 : i32
    return %c0_i32, %c0_i32_0 : i32, i32
  }
  func.func @transform_7(%arg0: i32, %arg1: memref<128xi32, #tpu.memory_space<smem>>, %arg2: memref<128xi32, #tpu.memory_space<smem>>) -> (i32, i32, i32) {
    %c0_i32 = arith.constant 0 : i32
    %c0_i32_0 = arith.constant 0 : i32
    %c0_i32_1 = arith.constant 0 : i32
    return %arg0, %c0_i32, %c0_i32_0 : i32, i32, i32
  }
}

</mosaic_0001>

<bundles_post_ra>
// kernel: limnet_forward_edge_sequence.1
= control target key start
LH: loop header
LB: loop body
LE: loop exit
PB: predicated region body
PF: predicated region fallthrough
CT: control target
= control target key end

     0   :  { %s1819_s23 = smov [#allocation7]   ;;  %s1820_s24 = smov [#allocation8]   ;;  %s3137_s0 = inlined_call_operand.vmem [shape: s32[128], index: 0, kind: input, shape index: {}]   ;;  %s3138_s2 = inlined_call_operand.vmem [shape: f32[8,16,8], index: 2, kind: input, shape index: {}]   ;;  %s3139_s3 = inlined_call_operand.vmem [shape: f32[64,384], index: 3, kind: input, shape index: {}]   ;;  %s3140_s4 = inlined_call_operand.vmem [shape: f32[8,384], index: 4, kind: input, shape index: {}]   ;;  %s3141_s5 = inlined_call_operand.vmem [shape: f32[1,384], index: 5, kind: input, shape index: {}]   ;;  %s3142_s6 = inlined_call_operand.vmem [shape: f32[1,128], index: 6, kind: input, shape index: {}]   ;;  %s3143_s7 = inlined_call_operand.vmem [shape: f32[640,32], index: 7, kind: input, shape index: {}]   ;;  %s3144_s8 = inlined_call_operand.vmem [shape: f32[384,32], index: 8, kind: input, shape index: {}]   ;;  %s3145_s9 = inlined_call_operand.vmem [shape: f32[8,16,128], index: 9, kind: output, shape index: {0}]   ;;  %s3146_s10 = inlined_call_operand.vmem [shape: f32[640,32], index: 10, kind: output, shape index: {1}]   ;;  %s3147_s11 = inlined_call_operand.hbm [shape: f32[384,32], index: 11, kind: output, shape index: {2}]   ;;  %s3148_s1 = inlined_call_operand.vmem [shape: s32[128], index: 1, kind: input, shape index: {}]  }
   0x1   :  { %3209 = sst [smem:[#allocation36_spill]] %s3138_s2  ;;  %s18_s19 = sshll.u32 %s3137_s0, 4  ;;  %s19_s19 = int_to_ptr.vmem [resolvable:$true] %s18_s19 }
   0x2   :  { %3210 = sst [smem:[#allocation37_spill]] %s3140_s4  ;;  %s23_s22 = sshll.u32 %s3148_s1, 4  ;;  %s24_s22 = int_to_ptr.vmem [resolvable:$true] %s23_s22 }
   0x3   :  { %3211 = sst [smem:[#allocation38_spill]] %s3143_s7 }
   0x4   :  { %3212 = sst [smem:[#allocation39_spill]] %s3144_s8 }
   0x5   :  { %3213 = sst [smem:[#allocation40_spill]] %s3145_s9 }
   0x6   :  { %3214 = sst [smem:[#allocation41_spill]] %s3146_s10 }
   0x7   :  { %3215 = sst [smem:[#allocation42_spill]] %s3147_s11 }
   0x8   :  { %21 = dma.vmem_to_smem %s19_s19, 16, %s1819_s23, [#allocation6] }
   0x9   :  { %26 = dma.vmem_to_smem %s24_s22, 16, %s1820_s24, [#allocation6] }
   0xa   :  { %1805 = dma.done.wait [#allocation6], 32 }
   0xb   :  { %1806 = vsyncadd [#allocation6], 4294967264 }
   0xc   :  { %29 = sfence }
   0xd   :  { %s1890_s25 = smov 0  }
   0xe LB: > { %3216 = sst [smem:[#allocation21_spill]] %s1817_s25  ;;  %s1896_s0 = sadd.s32 4294967295, %s1817_s25   ;;  %s1817_s25 = sphi %s1890_s25, %s35_s25  }
   0xf   : > { %3217 = sst [smem:[#allocation22_spill]] %s1896_s0  ;;  %p1613_p0 = scmp.ge.s32.totalorder %s1817_s25, 1 }
  0x10   : > { %p207_p1 = scmp.lt.s32.totalorder %s1817_s25, 9 }
  0x12   : > { %p208_p2 = pnand %p1613_p0, %p207_p1 }
  0x14   : > { %211 = sbr.rel (%p208_p2) target bundleno = 904 (0x388), region = 40 }
  0x19   : > { %p235_p3 = scmp.lt.s32.totalorder %s1896_s0, 7  ;;  %s3218_s2 = sld [smem:[#allocation36_spill]] }
  0x1a   : > { %s3219_s9 = sld [smem:[#allocation40_spill]]  ;;  %p1618_p4 = scmp.ne.s32.totalorder %s1896_s0, 0 }
  0x1b   : > { %s236_s1 = scalar_select %p235_p3, %s1896_s0, 7 }
  0x1c   : > { %248 = sbr.rel (%p1618_p4) target bundleno = 175 (0xaf), region = 44  ;;  %s3220_s7 = sld [smem:[#allocation38_spill]] (!%p1618_p4) }
  0x1d   : > { %s1701_s26 = sshll.u32 %s236_s1, 4 }
  0x1f   : > { %s1905_s29 = scalar_lea.vmem %s3218_s2, %s1701_s26 }
  0x20   : > { %s1910_s13 = scalar_lea.vmem %s3219_s9, %s1701_s26 }
  0x22   : > { %v259_v0 = vld [vmem:[%s3220_s7] sm:$0xff]  ;;  %v261_v1 = vld [vmem:[%s3220_s7 + $0x8] sm:$0xff]  ;;  %v263_v2 = vld [vmem:[%s3220_s7 + $0x10] sm:$0xff] }
  0x23   : > { %260 = vst [vmem:[#allocation2] sm:$0xff] %v259_v0  ;;  %v265_v3 = vld [vmem:[%s3220_s7 + $0x18] sm:$0xff]  ;;  %v267_v4 = vld [vmem:[%s3220_s7 + $0x20] sm:$0xff]  ;;  %v269_v5 = vld [vmem:[%s3220_s7 + $0x28] sm:$0xff] }
  0x24   : > { %262 = vst [vmem:[#allocation2 + $0x8] sm:$0xff] %v261_v1  ;;  %v271_v6 = vld [vmem:[%s3220_s7 + $0x30] sm:$0xff]  ;;  %v273_v7 = vld [vmem:[%s3220_s7 + $0x38] sm:$0xff]  ;;  %v275_v8 = vld [vmem:[%s3220_s7 + $0x40] sm:$0xff] }
  0x25   : > { %264 = vst [vmem:[#allocation2 + $0x10] sm:$0xff] %v263_v2  ;;  %v277_v9 = vld [vmem:[%s3220_s7 + $0x48] sm:$0xff]  ;;  %v279_v10 = vld [vmem:[%s3220_s7 + $0x50] sm:$0xff]  ;;  %v281_v11 = vld [vmem:[%s3220_s7 + $0x58] sm:$0xff] }
  0x26   : > { %266 = vst [vmem:[#allocation2 + $0x18] sm:$0xff] %v265_v3  ;;  %v283_v12 = vld [vmem:[%s3220_s7 + $0x60] sm:$0xff]  ;;  %v285_v13 = vld [vmem:[%s3220_s7 + $0x68] sm:$0xff]  ;;  %v287_v14 = vld [vmem:[%s3220_s7 + $0x70] sm:$0xff] }
  0x27   : > { %268 = vst [vmem:[#allocation2 + $0x20] sm:$0xff] %v267_v4  ;;  %v289_v15 = vld [vmem:[%s3220_s7 + $0x78] sm:$0xff]  ;;  %v291_v16 = vld [vmem:[%s3220_s7 + $0x80] sm:$0xff]  ;;  %v293_v17 = vld [vmem:[%s3220_s7 + $0x88] sm:$0xff] }
  0x28   : > { %270 = vst [vmem:[#allocation2 + $0x28] sm:$0xff] %v269_v5  ;;  %v295_v18 = vld [vmem:[%s3220_s7 + $0x90] sm:$0xff]  ;;  %v297_v19 = vld [vmem:[%s3220_s7 + $0x98] sm:$0xff]  ;;  %v299_v20 = vld [vmem:[%s3220_s7 + $0xa0] sm:$0xff] }
  0x29   : > { %272 = vst [vmem:[#allocation2 + $0x30] sm:$0xff] %v271_v6  ;;  %v301_v21 = vld [vmem:[%s3220_s7 + $0xa8] sm:$0xff]  ;;  %v303_v22 = vld [vmem:[%s3220_s7 + $0xb0] sm:$0xff]  ;;  %v305_v23 = vld [vmem:[%s3220_s7 + $0xb8] sm:$0xff] }
  0x2a   : > { %274 = vst [vmem:[#allocation2 + $0x38] sm:$0xff] %v273_v7  ;;  %v307_v24 = vld [vmem:[%s3220_s7 + $0xc0] sm:$0xff]  ;;  %v309_v25 = vld [vmem:[%s3220_s7 + $0xc8] sm:$0xff]  ;;  %v311_v26 = vld [vmem:[%s3220_s7 + $0xd0] sm:$0xff] }
  0x2b   : > { %276 = vst [vmem:[#allocation2 + $0x40] sm:$0xff] %v275_v8  ;;  %v313_v27 = vld [vmem:[%s3220_s7 + $0xd8] sm:$0xff]  ;;  %v315_v28 = vld [vmem:[%s3220_s7 + $0xe0] sm:$0xff]  ;;  %v317_v29 = vld [vmem:[%s3220_s7 + $0xe8] sm:$0xff] }
  0x2c   : > { %278 = vst [vmem:[#allocation2 + $0x48] sm:$0xff] %v277_v9  ;;  %v319_v30 = vld [vmem:[%s3220_s7 + $0xf0] sm:$0xff]  ;;  %v321_v31 = vld [vmem:[%s3220_s7 + $0xf8] sm:$0xff]  ;;  %v323_v32 = vld [vmem:[%s3220_s7 + $0x100] sm:$0xff] }
  0x2d   : > { %280 = vst [vmem:[#allocation2 + $0x50] sm:$0xff] %v279_v10  ;;  %v325_v33 = vld [vmem:[%s3220_s7 + $0x108] sm:$0xff]  ;;  %v327_v34 = vld [vmem:[%s3220_s7 + $0x110] sm:$0xff]  ;;  %v329_v35 = vld [vmem:[%s3220_s7 + $0x118] sm:$0xff] }
  0x2e   : > { %282 = vst [vmem:[#allocation2 + $0x58] sm:$0xff] %v281_v11  ;;  %v331_v36 = vld [vmem:[%s3220_s7 + $0x120] sm:$0xff]  ;;  %v333_v37 = vld [vmem:[%s3220_s7 + $0x128] sm:$0xff]  ;;  %v335_v38 = vld [vmem:[%s3220_s7 + $0x130] sm:$0xff] }
  0x2f   : > { %284 = vst [vmem:[#allocation2 + $0x60] sm:$0xff] %v283_v12  ;;  %v337_v39 = vld [vmem:[%s3220_s7 + $0x138] sm:$0xff]  ;;  %v339_v40 = vld [vmem:[%s3220_s7 + $0x140] sm:$0xff]  ;;  %v341_v41 = vld [vmem:[%s3220_s7 + $0x148] sm:$0xff] }
  0x30   : > { %286 = vst [vmem:[#allocation2 + $0x68] sm:$0xff] %v285_v13  ;;  %v343_v42 = vld [vmem:[%s3220_s7 + $0x150] sm:$0xff]  ;;  %v345_v43 = vld [vmem:[%s3220_s7 + $0x158] sm:$0xff]  ;;  %v347_v44 = vld [vmem:[%s3220_s7 + $0x160] sm:$0xff] }
  0x31   : > { %288 = vst [vmem:[#allocation2 + $0x70] sm:$0xff] %v287_v14  ;;  %v349_v45 = vld [vmem:[%s3220_s7 + $0x168] sm:$0xff]  ;;  %v351_v46 = vld [vmem:[%s3220_s7 + $0x170] sm:$0xff]  ;;  %v353_v47 = vld [vmem:[%s3220_s7 + $0x178] sm:$0xff] }
  0x32   : > { %290 = vst [vmem:[#allocation2 + $0x78] sm:$0xff] %v289_v15  ;;  %v355_v48 = vld [vmem:[%s3220_s7 + $0x180] sm:$0xff]  ;;  %v357_v49 = vld [vmem:[%s3220_s7 + $0x188] sm:$0xff]  ;;  %v359_v50 = vld [vmem:[%s3220_s7 + $0x190] sm:$0xff] }
  0x33   : > { %292 = vst [vmem:[#allocation2 + $0x80] sm:$0xff] %v291_v16  ;;  %v361_v51 = vld [vmem:[%s3220_s7 + $0x198] sm:$0xff]  ;;  %v363_v52 = vld [vmem:[%s3220_s7 + $0x1a0] sm:$0xff]  ;;  %v365_v53 = vld [vmem:[%s3220_s7 + $0x1a8] sm:$0xff] }
  0x34   : > { %294 = vst [vmem:[#allocation2 + $0x88] sm:$0xff] %v293_v17  ;;  %v367_v54 = vld [vmem:[%s3220_s7 + $0x1b0] sm:$0xff]  ;;  %v369_v55 = vld [vmem:[%s3220_s7 + $0x1b8] sm:$0xff]  ;;  %v371_v56 = vld [vmem:[%s3220_s7 + $0x1c0] sm:$0xff] }
  0x35   : > { %296 = vst [vmem:[#allocation2 + $0x90] sm:$0xff] %v295_v18  ;;  %v373_v57 = vld [vmem:[%s3220_s7 + $0x1c8] sm:$0xff]  ;;  %v375_v58 = vld [vmem:[%s3220_s7 + $0x1d0] sm:$0xff]  ;;  %v377_v59 = vld [vmem:[%s3220_s7 + $0x1d8] sm:$0xff] }
  0x36   : > { %298 = vst [vmem:[#allocation2 + $0x98] sm:$0xff] %v297_v19  ;;  %v379_v60 = vld [vmem:[%s3220_s7 + $0x1e0] sm:$0xff]  ;;  %v381_v61 = vld [vmem:[%s3220_s7 + $0x1e8] sm:$0xff]  ;;  %v383_v62 = vld [vmem:[%s3220_s7 + $0x1f0] sm:$0xff] }
  0x37   : > { %300 = vst [vmem:[#allocation2 + $0xa0] sm:$0xff] %v299_v20  ;;  %v385_v63 = vld [vmem:[%s3220_s7 + $0x1f8] sm:$0xff]  ;;  %v387_v0 = vld [vmem:[%s3220_s7 + $0x200] sm:$0xff]  ;;  %v389_v1 = vld [vmem:[%s3220_s7 + $0x208] sm:$0xff] }
  0x38   : > { %302 = vst [vmem:[#allocation2 + $0xa8] sm:$0xff] %v301_v21  ;;  %v391_v2 = vld [vmem:[%s3220_s7 + $0x210] sm:$0xff]  ;;  %v393_v3 = vld [vmem:[%s3220_s7 + $0x218] sm:$0xff]  ;;  %v395_v4 = vld [vmem:[%s3220_s7 + $0x220] sm:$0xff] }
  0x39   : > { %304 = vst [vmem:[#allocation2 + $0xb0] sm:$0xff] %v303_v22  ;;  %v397_v5 = vld [vmem:[%s3220_s7 + $0x228] sm:$0xff]  ;;  %v399_v6 = vld [vmem:[%s3220_s7 + $0x230] sm:$0xff]  ;;  %v401_v7 = vld [vmem:[%s3220_s7 + $0x238] sm:$0xff] }
  0x3a   : > { %306 = vst [vmem:[#allocation2 + $0xb8] sm:$0xff] %v305_v23  ;;  %v403_v8 = vld [vmem:[%s3220_s7 + $0x240] sm:$0xff]  ;;  %v405_v9 = vld [vmem:[%s3220_s7 + $0x248] sm:$0xff]  ;;  %v407_v10 = vld [vmem:[%s3220_s7 + $0x250] sm:$0xff] }
  0x3b   : > { %308 = vst [vmem:[#allocation2 + $0xc0] sm:$0xff] %v307_v24  ;;  %v409_v11 = vld [vmem:[%s3220_s7 + $0x258] sm:$0xff]  ;;  %v411_v12 = vld [vmem:[%s3220_s7 + $0x260] sm:$0xff]  ;;  %v413_v13 = vld [vmem:[%s3220_s7 + $0x268] sm:$0xff] }
  0x3c   : > { %310 = vst [vmem:[#allocation2 + $0xc8] sm:$0xff] %v309_v25  ;;  %v415_v14 = vld [vmem:[%s3220_s7 + $0x270] sm:$0xff]  ;;  %v417_v15 = vld [vmem:[%s3220_s7 + $0x278] sm:$0xff] }
  0x3d   : > { %312 = vst [vmem:[#allocation2 + $0xd0] sm:$0xff] %v311_v26 }
  0x3e   : > { %314 = vst [vmem:[#allocation2 + $0xd8] sm:$0xff] %v313_v27 }
  0x3f   : > { %316 = vst [vmem:[#allocation2 + $0xe0] sm:$0xff] %v315_v28 }
  0x40   : > { %318 = vst [vmem:[#allocation2 + $0xe8] sm:$0xff] %v317_v29 }
  0x41   : > { %320 = vst [vmem:[#allocation2 + $0xf0] sm:$0xff] %v319_v30 }
  0x42   : > { %322 = vst [vmem:[#allocation2 + $0xf8] sm:$0xff] %v321_v31 }
  0x43   : > { %324 = vst [vmem:[#allocation2 + $0x100] sm:$0xff] %v323_v32 }
  0x44   : > { %326 = vst [vmem:[#allocation2 + $0x108] sm:$0xff] %v325_v33 }
  0x45   : > { %328 = vst [vmem:[#allocation2 + $0x110] sm:$0xff] %v327_v34 }
  0x46   : > { %330 = vst [vmem:[#allocation2 + $0x118] sm:$0xff] %v329_v35 }
  0x47   : > { %332 = vst [vmem:[#allocation2 + $0x120] sm:$0xff] %v331_v36 }
  0x48   : > { %334 = vst [vmem:[#allocation2 + $0x128] sm:$0xff] %v333_v37 }
  0x49   : > { %336 = vst [vmem:[#allocation2 + $0x130] sm:$0xff] %v335_v38 }
  0x4a   : > { %338 = vst [vmem:[#allocation2 + $0x138] sm:$0xff] %v337_v39 }
  0x4b   : > { %340 = vst [vmem:[#allocation2 + $0x140] sm:$0xff] %v339_v40 }
  0x4c   : > { %342 = vst [vmem:[#allocation2 + $0x148] sm:$0xff] %v341_v41 }
  0x4d   : > { %344 = vst [vmem:[#allocation2 + $0x150] sm:$0xff] %v343_v42 }
  0x4e   : > { %346 = vst [vmem:[#allocation2 + $0x158] sm:$0xff] %v345_v43 }
  0x4f   : > { %348 = vst [vmem:[#allocation2 + $0x160] sm:$0xff] %v347_v44 }
  0x50   : > { %350 = vst [vmem:[#allocation2 + $0x168] sm:$0xff] %v349_v45 }
  0x51   : > { %352 = vst [vmem:[#allocation2 + $0x170] sm:$0xff] %v351_v46 }
  0x52   : > { %354 = vst [vmem:[#allocation2 + $0x178] sm:$0xff] %v353_v47 }
  0x53   : > { %356 = vst [vmem:[#allocation2 + $0x180] sm:$0xff] %v355_v48 }
  0x54   : > { %358 = vst [vmem:[#allocation2 + $0x188] sm:$0xff] %v357_v49 }
  0x55   : > { %360 = vst [vmem:[#allocation2 + $0x190] sm:$0xff] %v359_v50 }
  0x56   : > { %362 = vst [vmem:[#allocation2 + $0x198] sm:$0xff] %v361_v51 }
  0x57   : > { %364 = vst [vmem:[#allocation2 + $0x1a0] sm:$0xff] %v363_v52 }
  0x58   : > { %366 = vst [vmem:[#allocation2 + $0x1a8] sm:$0xff] %v365_v53 }
  0x59   : > { %368 = vst [vmem:[#allocation2 + $0x1b0] sm:$0xff] %v367_v54 }
  0x5a   : > { %370 = vst [vmem:[#allocation2 + $0x1b8] sm:$0xff] %v369_v55 }
  0x5b   : > { %372 = vst [vmem:[#allocation2 + $0x1c0] sm:$0xff] %v371_v56 }
  0x5c   : > { %374 = vst [vmem:[#allocation2 + $0x1c8] sm:$0xff] %v373_v57 }
  0x5d   : > { %376 = vst [vmem:[#allocation2 + $0x1d0] sm:$0xff] %v375_v58 }
  0x5e   : > { %378 = vst [vmem:[#allocation2 + $0x1d8] sm:$0xff] %v377_v59 }
  0x5f   : > { %380 = vst [vmem:[#allocation2 + $0x1e0] sm:$0xff] %v379_v60 }
  0x60   : > { %382 = vst [vmem:[#allocation2 + $0x1e8] sm:$0xff] %v381_v61 }
  0x61   : > { %384 = vst [vmem:[#allocation2 + $0x1f0] sm:$0xff] %v383_v62 }
  0x62   : > { %386 = vst [vmem:[#allocation2 + $0x1f8] sm:$0xff] %v385_v63 }
  0x63   : > { %388 = vst [vmem:[#allocation2 + $0x200] sm:$0xff] %v387_v0 }
  0x64   : > { %390 = vst [vmem:[#allocation2 + $0x208] sm:$0xff] %v389_v1 }
  0x65   : > { %392 = vst [vmem:[#allocation2 + $0x210] sm:$0xff] %v391_v2 }
  0x66   : > { %394 = vst [vmem:[#allocation2 + $0x218] sm:$0xff] %v393_v3 }
  0x67   : > { %396 = vst [vmem:[#allocation2 + $0x220] sm:$0xff] %v395_v4 }
  0x68   : > { %398 = vst [vmem:[#allocation2 + $0x228] sm:$0xff] %v397_v5 }
  0x69   : > { %400 = vst [vmem:[#allocation2 + $0x230] sm:$0xff] %v399_v6 }
  0x6a   : > { %402 = vst [vmem:[#allocation2 + $0x238] sm:$0xff] %v401_v7 }
  0x6b   : > { %404 = vst [vmem:[#allocation2 + $0x240] sm:$0xff] %v403_v8 }
  0x6c   : > { %406 = vst [vmem:[#allocation2 + $0x248] sm:$0xff] %v405_v9 }
  0x6d   : > { %408 = vst [vmem:[#allocation2 + $0x250] sm:$0xff] %v407_v10 }
  0x6e   : > { %410 = vst [vmem:[#allocation2 + $0x258] sm:$0xff] %v409_v11 }
  0x6f   : > { %412 = vst [vmem:[#allocation2 + $0x260] sm:$0xff] %v411_v12 }
  0x70   : > { %414 = vst [vmem:[#allocation2 + $0x268] sm:$0xff] %v413_v13 }
  0x71   : > { %416 = vst [vmem:[#allocation2 + $0x270] sm:$0xff] %v415_v14 }
  0x72   : > { %418 = vst [vmem:[#allocation2 + $0x278] sm:$0xff] %v417_v15 }
  0x73   : > { %424 = vsyncadd [#allocation5], 10240  ;;  %s3221_s8 = sld [smem:[#allocation39_spill]] }
  0x79   : > { %v436_v16 = vld [vmem:[%s3221_s8] sm:$0xff]  ;;  %v438_v17 = vld [vmem:[%s3221_s8 + $0x8] sm:$0xff]  ;;  %v440_v18 = vld [vmem:[%s3221_s8 + $0x10] sm:$0xff] }
  0x7a   : > { %437 = vst [vmem:[#allocation3] sm:$0xff] %v436_v16  ;;  %v442_v19 = vld [vmem:[%s3221_s8 + $0x18] sm:$0xff]  ;;  %v444_v20 = vld [vmem:[%s3221_s8 + $0x20] sm:$0xff]  ;;  %v446_v21 = vld [vmem:[%s3221_s8 + $0x28] sm:$0xff] }
  0x7b   : > { %439 = vst [vmem:[#allocation3 + $0x8] sm:$0xff] %v438_v17  ;;  %v448_v22 = vld [vmem:[%s3221_s8 + $0x30] sm:$0xff]  ;;  %v450_v23 = vld [vmem:[%s3221_s8 + $0x38] sm:$0xff]  ;;  %v452_v24 = vld [vmem:[%s3221_s8 + $0x40] sm:$0xff] }
  0x7c   : > { %441 = vst [vmem:[#allocation3 + $0x10] sm:$0xff] %v440_v18  ;;  %v454_v25 = vld [vmem:[%s3221_s8 + $0x48] sm:$0xff]  ;;  %v456_v26 = vld [vmem:[%s3221_s8 + $0x50] sm:$0xff]  ;;  %v458_v27 = vld [vmem:[%s3221_s8 + $0x58] sm:$0xff] }
  0x7d   : > { %443 = vst [vmem:[#allocation3 + $0x18] sm:$0xff] %v442_v19  ;;  %v460_v28 = vld [vmem:[%s3221_s8 + $0x60] sm:$0xff]  ;;  %v462_v29 = vld [vmem:[%s3221_s8 + $0x68] sm:$0xff]  ;;  %v464_v30 = vld [vmem:[%s3221_s8 + $0x70] sm:$0xff] }
  0x7e   : > { %445 = vst [vmem:[#allocation3 + $0x20] sm:$0xff] %v444_v20  ;;  %v466_v31 = vld [vmem:[%s3221_s8 + $0x78] sm:$0xff]  ;;  %v468_v32 = vld [vmem:[%s3221_s8 + $0x80] sm:$0xff]  ;;  %v470_v33 = vld [vmem:[%s3221_s8 + $0x88] sm:$0xff] }
  0x7f   : > { %447 = vst [vmem:[#allocation3 + $0x28] sm:$0xff] %v446_v21  ;;  %v472_v34 = vld [vmem:[%s3221_s8 + $0x90] sm:$0xff]  ;;  %v474_v35 = vld [vmem:[%s3221_s8 + $0x98] sm:$0xff]  ;;  %v476_v36 = vld [vmem:[%s3221_s8 + $0xa0] sm:$0xff] }
  0x80   : > { %449 = vst [vmem:[#allocation3 + $0x30] sm:$0xff] %v448_v22  ;;  %v478_v37 = vld [vmem:[%s3221_s8 + $0xa8] sm:$0xff]  ;;  %v480_v38 = vld [vmem:[%s3221_s8 + $0xb0] sm:$0xff]  ;;  %v482_v39 = vld [vmem:[%s3221_s8 + $0xb8] sm:$0xff] }
  0x81   : > { %451 = vst [vmem:[#allocation3 + $0x38] sm:$0xff] %v450_v23  ;;  %v484_v40 = vld [vmem:[%s3221_s8 + $0xc0] sm:$0xff]  ;;  %v486_v41 = vld [vmem:[%s3221_s8 + $0xc8] sm:$0xff]  ;;  %v488_v42 = vld [vmem:[%s3221_s8 + $0xd0] sm:$0xff] }
  0x82   : > { %453 = vst [vmem:[#allocation3 + $0x40] sm:$0xff] %v452_v24  ;;  %v490_v43 = vld [vmem:[%s3221_s8 + $0xd8] sm:$0xff]  ;;  %v492_v44 = vld [vmem:[%s3221_s8 + $0xe0] sm:$0xff]  ;;  %v494_v45 = vld [vmem:[%s3221_s8 + $0xe8] sm:$0xff] }
  0x83   : > { %455 = vst [vmem:[#allocation3 + $0x48] sm:$0xff] %v454_v25  ;;  %v496_v46 = vld [vmem:[%s3221_s8 + $0xf0] sm:$0xff]  ;;  %v498_v47 = vld [vmem:[%s3221_s8 + $0xf8] sm:$0xff]  ;;  %v500_v48 = vld [vmem:[%s3221_s8 + $0x100] sm:$0xff] }
  0x84   : > { %457 = vst [vmem:[#allocation3 + $0x50] sm:$0xff] %v456_v26  ;;  %v502_v49 = vld [vmem:[%s3221_s8 + $0x108] sm:$0xff]  ;;  %v504_v50 = vld [vmem:[%s3221_s8 + $0x110] sm:$0xff]  ;;  %v506_v51 = vld [vmem:[%s3221_s8 + $0x118] sm:$0xff] }
  0x85   : > { %459 = vst [vmem:[#allocation3 + $0x58] sm:$0xff] %v458_v27  ;;  %v508_v52 = vld [vmem:[%s3221_s8 + $0x120] sm:$0xff]  ;;  %v510_v53 = vld [vmem:[%s3221_s8 + $0x128] sm:$0xff]  ;;  %v512_v54 = vld [vmem:[%s3221_s8 + $0x130] sm:$0xff] }
  0x86   : > { %461 = vst [vmem:[#allocation3 + $0x60] sm:$0xff] %v460_v28  ;;  %v514_v55 = vld [vmem:[%s3221_s8 + $0x138] sm:$0xff]  ;;  %v516_v56 = vld [vmem:[%s3221_s8 + $0x140] sm:$0xff]  ;;  %v518_v57 = vld [vmem:[%s3221_s8 + $0x148] sm:$0xff] }
  0x87   : > { %463 = vst [vmem:[#allocation3 + $0x68] sm:$0xff] %v462_v29  ;;  %v520_v58 = vld [vmem:[%s3221_s8 + $0x150] sm:$0xff]  ;;  %v522_v59 = vld [vmem:[%s3221_s8 + $0x158] sm:$0xff]  ;;  %v524_v60 = vld [vmem:[%s3221_s8 + $0x160] sm:$0xff] }
  0x88   : > { %465 = vst [vmem:[#allocation3 + $0x70] sm:$0xff] %v464_v30  ;;  %v526_v61 = vld [vmem:[%s3221_s8 + $0x168] sm:$0xff]  ;;  %v528_v62 = vld [vmem:[%s3221_s8 + $0x170] sm:$0xff]  ;;  %v530_v63 = vld [vmem:[%s3221_s8 + $0x178] sm:$0xff] }
  0x89   : > { %467 = vst [vmem:[#allocation3 + $0x78] sm:$0xff] %v466_v31 }
  0x8a   : > { %469 = vst [vmem:[#allocation3 + $0x80] sm:$0xff] %v468_v32 }
  0x8b   : > { %471 = vst [vmem:[#allocation3 + $0x88] sm:$0xff] %v470_v33 }
  0x8c   : > { %473 = vst [vmem:[#allocation3 + $0x90] sm:$0xff] %v472_v34 }
  0x8d   : > { %475 = vst [vmem:[#allocation3 + $0x98] sm:$0xff] %v474_v35 }
  0x8e   : > { %477 = vst [vmem:[#allocation3 + $0xa0] sm:$0xff] %v476_v36 }
  0x8f   : > { %479 = vst [vmem:[#allocation3 + $0xa8] sm:$0xff] %v478_v37 }
  0x90   : > { %481 = vst [vmem:[#allocation3 + $0xb0] sm:$0xff] %v480_v38 }
  0x91   : > { %483 = vst [vmem:[#allocation3 + $0xb8] sm:$0xff] %v482_v39 }
  0x92   : > { %485 = vst [vmem:[#allocation3 + $0xc0] sm:$0xff] %v484_v40 }
  0x93   : > { %487 = vst [vmem:[#allocation3 + $0xc8] sm:$0xff] %v486_v41 }
  0x94   : > { %489 = vst [vmem:[#allocation3 + $0xd0] sm:$0xff] %v488_v42 }
  0x95   : > { %491 = vst [vmem:[#allocation3 + $0xd8] sm:$0xff] %v490_v43 }
  0x96   : > { %493 = vst [vmem:[#allocation3 + $0xe0] sm:$0xff] %v492_v44 }
  0x97   : > { %495 = vst [vmem:[#allocation3 + $0xe8] sm:$0xff] %v494_v45 }
  0x98   : > { %497 = vst [vmem:[#allocation3 + $0xf0] sm:$0xff] %v496_v46 }
  0x99   : > { %499 = vst [vmem:[#allocation3 + $0xf8] sm:$0xff] %v498_v47 }
  0x9a   : > { %501 = vst [vmem:[#allocation3 + $0x100] sm:$0xff] %v500_v48 }
  0x9b   : > { %503 = vst [vmem:[#allocation3 + $0x108] sm:$0xff] %v502_v49 }
  0x9c   : > { %505 = vst [vmem:[#allocation3 + $0x110] sm:$0xff] %v504_v50 }
  0x9d   : > { %507 = vst [vmem:[#allocation3 + $0x118] sm:$0xff] %v506_v51 }
  0x9e   : > { %509 = vst [vmem:[#allocation3 + $0x120] sm:$0xff] %v508_v52 }
  0x9f   : > { %511 = vst [vmem:[#allocation3 + $0x128] sm:$0xff] %v510_v53 }
  0xa0   : > { %513 = vst [vmem:[#allocation3 + $0x130] sm:$0xff] %v512_v54 }
  0xa1   : > { %515 = vst [vmem:[#allocation3 + $0x138] sm:$0xff] %v514_v55 }
  0xa2   : > { %517 = vst [vmem:[#allocation3 + $0x140] sm:$0xff] %v516_v56 }
  0xa3   : > { %519 = vst [vmem:[#allocation3 + $0x148] sm:$0xff] %v518_v57 }
  0xa4   : > { %521 = vst [vmem:[#allocation3 + $0x150] sm:$0xff] %v520_v58 }
  0xa5   : > { %523 = vst [vmem:[#allocation3 + $0x158] sm:$0xff] %v522_v59 }
  0xa6   : > { %525 = vst [vmem:[#allocation3 + $0x160] sm:$0xff] %v524_v60 }
  0xa7   : > { %527 = vst [vmem:[#allocation3 + $0x168] sm:$0xff] %v526_v61 }
  0xa8   : > { %529 = vst [vmem:[#allocation3 + $0x170] sm:$0xff] %v528_v62 }
  0xa9   : > { %531 = vst [vmem:[#allocation3 + $0x178] sm:$0xff] %v530_v63 }
  0xaa   : > { %537 = vsyncadd [#allocation5 + $0x1], 6144 }
  0xab   : > { %1807 = dma.done.wait [#allocation5], 10240 }
  0xac   : > { %1808 = vsyncadd [#allocation5], 4294957056 }
  0xad   : > { %1809 = dma.done.wait [#allocation5 + $0x1], 6144 }
  0xae   : > { %1810 = vsyncadd [#allocation5 + $0x1], 4294961152 }
  0xaf PF: > { %s2298_s15 = sshll.u32 %s1896_s0, 4  ;;  %s3165_s26 = smov 32   ;;  %vm594_vm0 = vcmask 253952   ;;  %v810_v23 = vld [vmem:[%s1905_s29] sm:$0xff]  ;;  %vm815_vm1 = vcmask 64512   ;;  %v807_v24 = vld [vmem:[%s3139_s3 + $0xa8] sm:$0xff] }
  0xb0   : > { %s2301_s16 = sld [smem:[#allocation8 + %s2298_s15]]  ;;  %s3158_s17 = sadd.s32 2, %s2298_s15  ;;  %v2516_v25 = vld [vmem:[%s3139_s3 + $0xb0] sm:$0xff]  ;;  %v809_v26 = vld [vmem:[%s3139_s3 + $0xb8] sm:$0xff]  ;;  %906 = vmatpush.msra.mxu3 %v807_v24  ;;  %v806_v29 = vld [vmem:[%s3139_s3 + $0xa0] sm:$0xff]  ;;  %vm602_vm2 = vcmask 516352  }
  0xb1   : > { %s2306_s18 = sld [smem:[#allocation8 + %s3158_s17]]  ;;  %s3155_s19 = sadd.s32 1, %s2298_s15  ;;  %v804_v27 = vld [vmem:[%s3139_s3 + $0x90] sm:$0xff]  ;;  %v2528_v28 = vld [vmem:[%s3139_s3 + $0x98] sm:$0xff]  ;;  %v2539_v31 = vld [vmem:[%s3139_s3 + $0x80] sm:$0xff]  ;;  %vm891_vm3 = vcmask 523264  }
  0xb2   : > { %s2311_s20 = sld [smem:[#allocation8 + %s3155_s19]]  ;;  %s3154_s21 = sadd.s32 3, %s2298_s15  ;;  %v801_v30 = vld [vmem:[%s3139_s3 + $0x78] sm:$0xff]  ;;  %907 = vmatpush.msra.mxu3 %v804_v27  ;;  %v803_v32 = vld [vmem:[%s3139_s3 + $0x88] sm:$0xff]  ;;  %v798_v35 = vld [vmem:[%s3139_s3 + $0x60] sm:$0xff] }
  0xb3   : > { %s3151_s22 = sadd.s32 6, %s2298_s15  ;;  %s2317_s23 = sld [smem:[#allocation8 + %s3154_s21]]  ;;  %v2568_v36 = vld [vmem:[%s3139_s3 + $0x68] sm:$0xff]  ;;  %v800_v37 = vld [vmem:[%s3139_s3 + $0x70] sm:$0xff]  ;;  %v797_v43 = vld [vmem:[%s3139_s3 + $0x58] sm:$0xff] }
  0xb4   : > { %s3152_s1 = sadd.s32 7, %s2298_s15  ;;  %s2330_s28 = sld [smem:[#allocation8 + %s3151_s22]]  ;;  %908 = vmatpush.msra.mxu3 %v801_v30  ;;  %v811_v39 = vld [vmem:[%s1905_s29 + $0x8] sm:$0xff]  ;;  %v796_v42 = vld [vmem:[%s3139_s3 + $0x50] sm:$0xff]  ;;  %v793_v45 = vld [vmem:[%s3139_s3 + $0x38] sm:$0xff] }
  0xb5   : > { %s3156_s30 = sadd.s32 4, %s2298_s15  ;;  %s2335_s12 = sld [smem:[#allocation8 + %s3152_s1]]  ;;  %v795_v41 = vld [vmem:[%s3139_s3 + $0x48] sm:$0xff]  ;;  %v792_v44 = vld [vmem:[%s3139_s3 + $0x30] sm:$0xff]  ;;  %v794_v46 = vld [vmem:[%s3139_s3 + $0x40] sm:$0xff] }
  0xb6   : > { %s3149_s24 = scalar_lea.vmem [#allocation3], %s2301_s16  ;;  %s3159_s22 = sadd.s32 9, %s2298_s15  ;;  %909 = vmatpush.msra.mxu3 %v798_v35  ;;  %v789_v47 = vld [vmem:[%s3139_s3 + $0x18] sm:$0xff]  ;;  %v790_v49 = vld [vmem:[%s3139_s3 + $0x20] sm:$0xff]  ;;  %v791_v52 = vld [vmem:[%s3139_s3 + $0x28] sm:$0xff] }
  0xb7   : > { %v597_v0 = vld [vmem:[%s3149_s24] sm:$0x1]  ;;  %s3150_s27 = scalar_lea.vmem [#allocation3], %s2306_s18  ;;  %s2342_s24 = sld [smem:[#allocation8 + %s3156_s30]]  ;;  %v787_v54 = vld [vmem:[%s3139_s3 + $0x8] sm:$0xff]  ;;  %v788_v55 = vld [vmem:[%s3139_s3 + $0x10] sm:$0xff] }
  0xb8   : > { %599 = vrot.lane.b32.xlu0 %v597_v0, %s3165_s26  ;;  %v1623_v1 = vld [vmem:[%s3150_s27 + $0x30] sm:$0x1]  ;;  %s3153_s14 = scalar_lea.vmem [#allocation3], %s2311_s20  ;;  %s3161_s1 = sadd.s32 10, %s2298_s15  ;;  %910 = vmatpush.msra.mxu3 %v795_v41  ;;  %v786_v53 = vld [vmem:[%s3139_s3] sm:$0xff] }
  0xb9   : > { %3222 = sst [smem:[#allocation23_spill]] %s2317_s23  ;;  %624 = vrot.lane.b32.xlu1 %v1623_v1, %s3165_s26  ;;  %v1621_v2 = vld [vmem:[%s3153_s14 + $0x18] sm:$0x1]  ;;  %s3157_s27 = scalar_lea.vmem [#allocation3], %s2317_s23 }
  0xba   : > { %3223 = sst [smem:[#allocation24_spill]] %s2330_s28  ;;  %v1625_v3 = vld [vmem:[%s3157_s27 + $0x48] sm:$0x1]  ;;  %s3162_s21 = sadd.s32 5, %s2298_s15  ;;  %911 = vmatpush.msra.mxu3 %v792_v44 }
  0xbb   : > { %3224 = sst [smem:[#allocation25_spill]] %s2335_s12  ;;  %s3163_s17 = scalar_lea.vmem [#allocation3], %s2330_s28 }
  0xbc   : > { %s2353_s14 = sld [smem:[#allocation8 + %s3159_s22]]  ;;  %v1631_v5 = vld [vmem:[%s3163_s17 + $0x90] sm:$0x1]  ;;  %s3164_s22 = scalar_lea.vmem [#allocation3], %s2335_s12  ;;  %912 = vmatpush.msra.mxu3 %v789_v47 }
  0xbd   : > { %3225 = sst [smem:[#allocation26_spill]] %s2342_s24  ;;  %s3160_s30 = scalar_lea.vmem [#allocation3], %s2342_s24  ;;  %v1633_v6 = vld [vmem:[%s3164_s22 + $0xa8] sm:$0x1] }
  0xbe   : > { %s2358_s19 = sld [smem:[#allocation8 + %s3161_s1]]  ;;  %v1627_v4 = vld [vmem:[%s3160_s30 + $0x60] sm:$0x1]  ;;  %s3167_s30 = sadd.s32 12, %s2298_s15  ;;  %913 = vmatpush.msra.mxu3 %v786_v53 }
  0xbf   : > { %s2365_s27 = sld [smem:[#allocation8 + %s3162_s21]]  ;;  %648 = vrot.lane.b32.xlu2 %v1627_v4, %s3165_s26  ;;  %s3168_s1 = sadd.s32 8, %s2298_s15 }
  0xc0   : > { %612 = vrot.lane.b32.xlu0 %v1621_v2, %s3165_s26  ;;  %s3170_s21 = sadd.s32 13, %s2298_s15  ;;  %s2381_s17 = sld [smem:[#allocation8 + %s3167_s30]] }
  0xc1   : > { %636 = vrot.lane.b32.xlu1 %v1625_v3, %s3165_s26  ;;  %s2385_s2 = sld [smem:[#allocation8 + %s3168_s1]]  ;;  %s3174_s8 = sadd.s32 11, %s2298_s15 }
  0xc2   : > { %3226 = sst [smem:[#allocation27_spill]] %s2353_s14  ;;  %s3232_s30 = smov 32  }
  0xc3   : > { %s2392_s7 = sld [smem:[#allocation8 + %s3170_s21]]  ;;  %s3175_s9 = sadd.s32 15, %s2298_s15 }
  0xc4   : > { %3227 = sst [smem:[#allocation28_spill]] %s2358_s19  ;;  %s3173_s1 = scalar_lea.vmem [#allocation3], %s2358_s19 }
  0xc5   : > { %3228 = sst [smem:[#allocation29_spill]] %s2365_s27  ;;  %s3169_s22 = scalar_lea.vmem [#allocation3], %s2365_s27  ;;  %v1639_v9 = vld [vmem:[%s3173_s1 + $0xf0] sm:$0x1] }
  0xc6   : > { %3229 = sst [smem:[#allocation30_spill]] %s2381_s17  ;;  %v1629_v7 = vld [vmem:[%s3169_s22 + $0x78] sm:$0x1]  ;;  %s3179_s25 = sadd.s32 14, %s2298_s15 }
  0xc7   : > { %3230 = sst [smem:[#allocation31_spill]] %s2385_s2  ;;  %660 = vrot.lane.b32.xlu2 %v1629_v7, %s3232_s30  ;;  %s3176_s1 = scalar_lea.vmem [#allocation3], %s2381_s17 }
  0xc8   : > { %672 = vrot.lane.b32.xlu0 %v1631_v5, %s3165_s26  ;;  %s2405_s22 = sld [smem:[#allocation8 + %s3174_s8]]  ;;  %v1643_v11 = vld [vmem:[%s3176_s1 + $0x120] sm:$0x1]  ;;  %s3238_s0 = sadd.s32 1, %s2298_s15 }
  0xc9   : > { %684 = vrot.lane.b32.xlu1 %v1633_v6, %s3165_s26  ;;  %3231 = sst [smem:[#allocation32_spill]] %s2392_s7  ;;  %s3171_s26 = scalar_lea.vmem [#allocation3], %s2353_s14 }
  0xca   : > { %v1637_v8 = vld [vmem:[%s3171_s26 + $0xd8] sm:$0x1]  ;;  %s2411_s21 = sld [smem:[#allocation8 + %s3175_s9]]  ;;  %s3177_s26 = scalar_lea.vmem [#allocation3], %s2385_s2 }
  0xcb   : > { %v1635_v10 = vld [vmem:[%s3177_s26 + $0xc0] sm:$0x1]  ;;  %s3178_s8 = scalar_lea.vmem [#allocation3], %s2392_s7  ;;  %s2426_s9 = sld [smem:[#allocation8 + %s3179_s25]] }
  0xcc   : > { %v1645_v12 = vld [vmem:[%s3178_s8 + $0x138] sm:$0x1]  ;;  %s3236_s25 = sadd.s32 2, %s2298_s15  ;;  %s2447_s10 = sld [smem:[#allocation7 + %s2298_s15]] }
  0xcd   : > { %s2444_s11 = sld [smem:[#allocation7 + %s3236_s25]]  ;;  %s3244_s19 = sadd.s32 8, %s2298_s15 }
  0xce   : > { %3233 = sst [smem:[#allocation33_spill]] %s2405_s22  ;;  %s3181_s1 = scalar_lea.vmem [#allocation3], %s2405_s22 }
  0xcf   : > { %696 = vrot.lane.b32.xlu2 %v1635_v10, %s3232_s30  ;;  %v1641_v13 = vld [vmem:[%s3181_s1 + $0x108] sm:$0x1]  ;;  %s3237_s1 = sadd.s32 4, %s2298_s15  ;;  %s3243_s22 = sadd.s32 9, %s2298_s15 }
  0xd0   : > { %708 = vrot.lane.b32.xlu0 %v1637_v8, %s3232_s30  ;;  %3234 = sst [smem:[#allocation34_spill]] %s2411_s21  ;;  %s3182_s26 = scalar_lea.vmem [#allocation3], %s2411_s21 }
  0xd1   : > { %720 = vrot.lane.b32.xlu1 %v1639_v9, %s3232_s30  ;;  %3235 = sst [smem:[#allocation35_spill]] %s2426_s9  ;;  %v1649_v14 = vld [vmem:[%s3182_s26 + $0x168] sm:$0x1]  ;;  %s3184_s8 = scalar_lea.vmem [#allocation3], %s2426_s9 }
  0xd2   : > { %v1647_v15 = vld [vmem:[%s3184_s8 + $0x150] sm:$0x1]  ;;  %s2451_s26 = sld [smem:[#allocation7 + %s3237_s1]]  ;;  %s3240_s21 = sadd.s32 5, %s2298_s15 }
  0xd3   : > { %s2455_s8 = sld [smem:[#allocation7 + %s3238_s0]]  ;;  %s3189_s7 = scalar_lea.vmem [#allocation2], %s2447_s10 }
  0xd4   : > { %s2463_s9 = sld [smem:[#allocation7 + %s3240_s21]]  ;;  %v593_v16 = vld [vmem:[%s3189_s7] sm:$0x1]  ;;  %s3191_s1 = scalar_lea.vmem [#allocation2], %s2444_s11 }
  0xd5   : > { %v1622_v17 = vld [vmem:[%s3191_s1 + $0x50] sm:$0x1]  ;;  %595 = vst.msk [vmem:[#allocation4] sm:$0x1] %vm594_vm0, %v593_v16  ;;  %s3241_s0 = sadd.s32 6, %s2298_s15  ;;  %s3242_s21 = sadd.s32 7, %s2298_s15 }
  0xd6   : > { %s2474_s17 = sld [smem:[#allocation7 + %s3241_s0]]  ;;  %619 = vst.msk [vmem:[#allocation4 + $0x2] sm:$0x1] %vm594_vm0, %v1622_v17  ;;  %s3246_s24 = sadd.s32 11, %s2298_s15  ;;  %v2699_v17 = vld [vmem:[%s3141_s5] sm:$0x7] }
  0xd7   : > { %732 = vrot.lane.b32.xlu2 %v1641_v13, %s3232_s30  ;;  %s2483_s7 = sld [smem:[#allocation7 + %s3242_s21]]  ;;  %s3247_s28 = sadd.s32 10, %s2298_s15  ;;  %v969_v24 = vperm.slane %v2699_v17, 0 }
  0xd8   : > { %744 = vrot.lane.b32.xlu0 %v1643_v11, %s3232_s30  ;;  %s2487_s1 = sld [smem:[#allocation7 + %s3243_s22]] }
  0xd9   : > { %756 = vrot.lane.b32.xlu1 %v1645_v12, %s3232_s30  ;;  %s2491_s14 = sld [smem:[#allocation7 + %s3244_s19]]  ;;  %s3199_s0 = scalar_lea.vmem [#allocation2], %s2455_s8 }
  0xda   : > { %v1620_v19 = vld [vmem:[%s3199_s0 + $0x28] sm:$0x1]  ;;  %s3245_s4 = sld [smem:[#allocation37_spill]]  ;;  %s3203_s2 = scalar_lea.vmem [#allocation2], %s2463_s9 }
  0xdb   : > { %607 = vst.msk [vmem:[#allocation4 + $0x1] sm:$0x1] %vm594_vm0, %v1620_v19  ;;  %v1628_v33 = vld [vmem:[%s3203_s2 + $0xc8] sm:$0x1]  ;;  %s2554_s27 = sld [smem:[#allocation7 + %s3246_s24]]  ;;  %s3248_s2 = sadd.s32 12, %s2298_s15 }
  0xdc   : > { %s3202_s19 = scalar_lea.vmem [#allocation2], %s2474_s17  ;;  %655 = vst.msk [vmem:[#allocation4 + $0x5] sm:$0x1] %vm594_vm0, %v1628_v33  ;;  %s2560_s12 = sld [smem:[#allocation7 + %s3247_s28]] }
  0xdd   : > { %v1630_v34 = vld [vmem:[%s3202_s19 + $0xf0] sm:$0x1]  ;;  %s2575_s23 = sld [smem:[#allocation7 + %s3248_s2]]  ;;  %s3205_s28 = scalar_lea.vmem [#allocation2], %s2483_s7 }
  0xde   : > { %667 = vst.msk [vmem:[#allocation4 + $0x6] sm:$0x1] %vm594_vm0, %v1630_v34  ;;  %v1632_v38 = vld [vmem:[%s3205_s28 + $0x118] sm:$0x1]  ;;  %s3249_s0 = sadd.s32 13, %s2298_s15  ;;  %s3206_s2 = scalar_lea.vmem [#allocation2], %s2487_s1 }
  0xdf   : > { %768 = vrot.lane.b32.xlu2 %v1647_v15, %s3232_s30  ;;  %679 = vst.msk [vmem:[#allocation4 + $0x7] sm:$0x1] %vm594_vm0, %v1632_v38  ;;  %s1541_s19 = scalar_lea.vmem [#allocation2], %s2491_s14  ;;  %v1636_v51 = vld [vmem:[%s3206_s2 + $0x168] sm:$0x1]  ;;  %s3251_s24 = sadd.s32 15, %s2298_s15 }
  0xe0   : > { %780 = vrot.lane.b32.xlu0 %v1649_v14, %s3232_s30  ;;  %s3239_s30 = sadd.s32 3, %s2298_s15  ;;  %v812_v20 = vld [vmem:[%s3245_s4] sm:$0xff]  ;;  %v813_v21 = vld [vmem:[%s3245_s4 + $0x8] sm:$0xff]  ;;  %v814_v40 = vld [vmem:[%s3245_s4 + $0x10] sm:$0xff]  ;;  %s3250_s4 = sadd.s32 14, %s2298_s15 }
  0xe1   : > { %s2459_s25 = sld [smem:[#allocation7 + %s3239_s30]]  ;;  %s3197_s30 = scalar_lea.vmem [#allocation2], %s2451_s26  ;;  %837 = vmatpush.msra.mxu0 %v812_v20  ;;  %860 = vmatpush.msra.mxu1 %v813_v21  ;;  %v1634_v50 = vld [vmem:[%s1541_s19 + $0x140] sm:$0x1]  ;;  %703 = vst.msk [vmem:[#allocation4 + $0x9] sm:$0x1] %vm594_vm0, %v1636_v51 }
  0xe2   : > { %v1626_v18 = vld [vmem:[%s3197_s30 + $0xa0] sm:$0x1]  ;;  %1650 = vmatmul.msk.f32.vlgmr.msra.gmra.mxu0 %vm815_vm1, %v810_v23  ;;  %1652 = vmatmul.msk.f32.vlgmr.msra.gmra.mxu1 %vm815_vm1, %v810_v23  ;;  %s2625_s28 = sld [smem:[#allocation7 + %s3250_s4]]  ;;  %691 = vst.msk [vmem:[#allocation4 + $0x8] sm:$0x1] %vm594_vm0, %v1634_v50  ;;  %s1553_s2 = scalar_lea.vmem [#allocation2], %s2554_s27 }
  0xe3   : > { %643 = vst.msk [vmem:[#allocation4 + $0x4] sm:$0x1] %vm594_vm0, %v1626_v18  ;;  %929 = vmatpush.msrb.mxu0 %v2516_v25  ;;  %952 = vmatpush.msrb.mxu1 %v809_v26  ;;  %s2633_s30 = sld [smem:[#allocation7 + %s3251_s24]]  ;;  %v1640_v56 = vld [vmem:[%s1553_s2 + $0x1b8] sm:$0x1]  ;;  %s1549_s21 = scalar_lea.vmem [#allocation2], %s2560_s12 }
  0xe4   : > { %883 = vmatpush.msra.mxu2 %v814_v40  ;;  %v1638_v57 = vld [vmem:[%s1549_s21 + $0x190] sm:$0x1]  ;;  %727 = vst.msk [vmem:[#allocation4 + $0xb] sm:$0x1] %vm594_vm0, %v1640_v56  ;;  %s1557_s4 = scalar_lea.vmem [#allocation2], %s2575_s23  ;;  %v970_v18 = vperm.slane %v2699_v17, 1 }
  0xe5   : > { %930 = vmatpush.msrb.mxu0 %v2528_v28  ;;  %953 = vmatpush.msrb.mxu1 %v806_v29  ;;  %v1642_v58 = vld [vmem:[%s1557_s4 + $0x1e0] sm:$0x1]  ;;  %715 = vst.msk [vmem:[#allocation4 + $0xa] sm:$0x1] %vm594_vm0, %v1638_v57  ;;  %v971_v56 = vperm.slane %v2699_v17, 2  ;;  %s3253_s24 = scalar_lea.vmem [#allocation2], %s2455_s8 }
  0xe6   : > { %1654 = vmatmul.msk.f32.vlgmr.msra.gmra.mxu2 %vm815_vm1, %v810_v23  ;;  %739 = vst.msk [vmem:[#allocation4 + $0xc] sm:$0x1] %vm594_vm0, %v1642_v58  ;;  %v2709_v58 = vld [vmem:[%s3142_s6] ss:$0 sm:$0xff]  ;;  %s1822_s8 = smov 96   ;;  %s3263_s23 = sld [smem:[#allocation23_spill]] }
  0xe7   : > { %s3198_s22 = scalar_lea.vmem [#allocation2], %s2459_s25  ;;  %931 = vmatpush.msrb.mxu0 %v2539_v31  ;;  %954 = vmatpush.msrb.mxu1 %v803_v32  ;;  %s3264_s14 = sld [smem:[#allocation26_spill]] }
  0xe8   : > { %v1624_v22 = vld [vmem:[%s3198_s22 + $0x78] sm:$0x1]  ;;  %s2605_s22 = sld [smem:[#allocation7 + %s3249_s0]]  ;;  %1703 = vmatpush.msrb.mxu2 %v2516_v25  ;;  %s3208_s15 = scalar_lea.vmem [#allocation2], %s2625_s28 }
  0xe9   : > { %631 = vst.msk [vmem:[#allocation4 + $0x3] sm:$0x1] %vm594_vm0, %v1624_v22  ;;  %932 = vmatpush.msrb.mxu0 %v2568_v36  ;;  %955 = vmatpush.msrb.mxu1 %v800_v37  ;;  %v1646_v62 = vld [vmem:[%s3208_s15 + $0x230] sm:$0x1]  ;;  %s3207_s29 = scalar_lea.vmem [#allocation2], %s2633_s30  ;;  %s3254_s15 = scalar_lea.vmem [#allocation2], %s2444_s11 }
  0xea   : > { %1651 = vmatmul.msk.f32.gmra.mxu0 %vm815_vm1, %v811_v39  ;;  %1653 = vmatmul.msk.f32.gmra.mxu1 %vm815_vm1, %v811_v39  ;;  %v1648_v0 = vld [vmem:[%s3207_s29 + $0x258] sm:$0x1]  ;;  %763 = vst.msk [vmem:[#allocation4 + $0xe] sm:$0x1] %vm594_vm0, %v1646_v62  ;;  %s3252_s29 = scalar_lea.vmem [#allocation2], %s2447_s10  ;;  %s3255_s10 = scalar_lea.vmem [#allocation2], %s2459_s25 }
  0xeb   : > { %933 = vmatpush.msrb.mxu0 %v796_v42  ;;  %956 = vmatpush.msrb.mxu1 %v797_v43  ;;  %775 = vst.msk [vmem:[#allocation4 + $0xf] sm:$0x1] %vm594_vm0, %v1648_v0  ;;  %s3256_s11 = scalar_lea.vmem [#allocation2], %s2451_s26  ;;  %s3257_s25 = scalar_lea.vmem [#allocation2], %s2463_s9 }
  0xec   : > { %1704 = vmatpush.msrb.mxu2 %v2528_v28  ;;  %s3259_s26 = scalar_lea.vmem [#allocation2], %s2483_s7  ;;  %s3260_s7 = scalar_lea.vmem [#allocation2], %s2487_s1 }
  0xed   : > { %934 = vmatpush.msrb.mxu0 %v793_v45  ;;  %957 = vmatpush.msrb.mxu1 %v794_v46  ;;  %s3261_s9 = scalar_lea.vmem [#allocation2], %s2625_s28  ;;  %s3265_s1 = sld [smem:[#allocation29_spill]] }
  0xee   : > { %1705 = vmatpush.msrb.mxu2 %v2539_v31  ;;  %s1561_s0 = scalar_lea.vmem [#allocation2], %s2605_s22  ;;  %s3266_s27 = sld [smem:[#allocation24_spill]] }
  0xef   : > { %935 = vmatpush.msrb.mxu0 %v790_v49  ;;  %958 = vmatpush.msrb.mxu1 %v791_v52  ;;  %v1644_v63 = vld [vmem:[%s1561_s0 + $0x208] sm:$0x1]  ;;  %s3267_s12 = sld [smem:[#allocation25_spill]]  ;;  %s3271_s28 = scalar_lea.vmem [#allocation3], %s2306_s18 }
  0xf0   : > { %1706 = vmatpush.msrb.mxu2 %v2568_v36  ;;  %751 = vst.msk [vmem:[#allocation4 + $0xd] sm:$0x1] %vm594_vm0, %v1644_v63  ;;  %s3268_s22 = sld [smem:[#allocation31_spill]] }
  0xf1   : > { %936 = vmatpush.msrb.mxu0 %v787_v54  ;;  %959 = vmatpush.msrb.mxu1 %v788_v55  ;;  %s3280_s18 = sld [smem:[#allocation35_spill]] }
  0xf2   : > { %1655 = vmatmul.msk.f32.gmra.mxu2 %vm815_vm1, %v811_v39 }
  0xf3   : > { %1707 = vmatpush.msrb.mxu2 %v796_v42 }
  0xf5   : > { %1708 = vmatpush.msrb.mxu2 %v793_v45 }
  0xf7   : > { %1709 = vmatpush.msrb.mxu2 %v790_v49 }
  0xf9   : > { %1710 = vmatpush.msrb.mxu2 %v787_v54 }
 0x119   : > { %v649_v48 = vpop.permute.xlu2 %648 }
 0x11a   : > { %651 = vst.msk [vmem:[#allocation4 + $0x4] sm:$0x1] %vm602_vm2, %v649_v48 }
 0x121   : > { %v661_v59 = vpop.permute.xlu2 %660 }
 0x122   : > { %663 = vst.msk [vmem:[#allocation4 + $0x5] sm:$0x1] %vm602_vm2, %v661_v59 }
 0x129   : > { %v697_v1 = vpop.permute.xlu2 %696 }
 0x12a   : > { %v600_v60 = vpop.permute.xlu0 %599  ;;  %699 = vst.msk [vmem:[#allocation4 + $0x8] sm:$0x1] %vm602_vm2, %v697_v1 }
 0x12b   : > { %603 = vst.msk [vmem:[#allocation4] sm:$0x1] %vm602_vm2, %v600_v60  ;;  %v625_v61 = vpop.permute.xlu1 %624 }
 0x12c   : > { %627 = vst.msk [vmem:[#allocation4 + $0x2] sm:$0x1] %vm602_vm2, %v625_v61 }
 0x131   : > { %v733_v4 = vpop.permute.xlu2 %732 }
 0x132   : > { %v613_v2 = vpop.permute.xlu0 %612  ;;  %735 = vst.msk [vmem:[#allocation4 + $0xb] sm:$0x1] %vm602_vm2, %v733_v4 }
 0x133   : > { %615 = vst.msk [vmem:[#allocation4 + $0x1] sm:$0x1] %vm602_vm2, %v613_v2  ;;  %v637_v3 = vpop.permute.xlu1 %636 }
 0x134   : > { %639 = vst.msk [vmem:[#allocation4 + $0x3] sm:$0x1] %vm602_vm2, %v637_v3 }
 0x139   : > { %v769_v7 = vpop.permute.xlu2 %768 }
 0x13a   : > { %v673_v5 = vpop.permute.xlu0 %672  ;;  %771 = vst.msk [vmem:[#allocation4 + $0xe] sm:$0x1] %vm602_vm2, %v769_v7 }
 0x13b   : > { %675 = vst.msk [vmem:[#allocation4 + $0x6] sm:$0x1] %vm602_vm2, %v673_v5  ;;  %v685_v6 = vpop.permute.xlu1 %684 }
 0x13c   : > { %687 = vst.msk [vmem:[#allocation4 + $0x7] sm:$0x1] %vm602_vm2, %v685_v6 }
 0x142   : > { %v709_v8 = vpop.permute.xlu0 %708 }
 0x143   : > { %711 = vst.msk [vmem:[#allocation4 + $0x9] sm:$0x1] %vm602_vm2, %v709_v8  ;;  %v784_v9 = vld [vmem:[#allocation4] sm:$0xff]  ;;  %v721_v10 = vpop.permute.xlu1 %720 }
 0x144   : > { %1656 = vmatmul.msk.f32.vlgmr.msra.gmra.mxu3 %vm891_vm3, %v784_v9  ;;  %1658 = vmatmul.msk.f32.vlgmr.msrb.gmra.mxu0 %vm891_vm3, %v784_v9  ;;  %723 = vst.msk [vmem:[#allocation4 + $0xa] sm:$0x1] %vm602_vm2, %v721_v10 }
 0x145   : > { %1660 = vmatmul.msk.f32.vlgmr.msrb.gmra.mxu1 %vm891_vm3, %v784_v9  ;;  %v1071_v9 = vlaneseq }
 0x14a   : > { %v745_v11 = vpop.permute.xlu0 %744 }
 0x14b   : > { %747 = vst.msk [vmem:[#allocation4 + $0xc] sm:$0x1] %vm602_vm2, %v745_v11  ;;  %v757_v12 = vpop.permute.xlu1 %756 }
 0x14c   : > { %759 = vst.msk [vmem:[#allocation4 + $0xd] sm:$0x1] %vm602_vm2, %v757_v12  ;;  %v2714_v12 = vand.u32 127, %v1071_v9 }
 0x14e   : > { %vm1082_vm12 = vcmp.ge.s32.totalorder %v2714_v12, 32  ;;  %vm1075_vm13 = vcmp.lt.s32.totalorder %v2714_v12, 32 }
 0x152   : > { %v781_v13 = vpop.permute.xlu0 %780 }
 0x153   : > { %783 = vst.msk [vmem:[#allocation4 + $0xf] sm:$0x1] %vm602_vm2, %v781_v13 }
 0x15a   : > { %v785_v14 = vld [vmem:[#allocation4 + $0x8] sm:$0xff] }
 0x15b   : > { %1657 = vmatmul.msk.f32.gmra.mxu3 %vm891_vm3, %v785_v14  ;;  %1659 = vmatmul.msk.f32.vlgmr.msrb.gmra.mxu2 %vm891_vm3, %v785_v14 }
 0x15c   : > { %1661 = vmatmul.msk.f32.gmra.mxu1 %vm891_vm3, %v785_v14 }
 0x15f   : > { %v839_v15 = vpop.f32.mrf.mxu0  ;;  %v862_v19 = vpop.f32.mrf.mxu1 }
 0x167   : > { %v842_v16 = vpop.f32.mrf.mxu0  ;;  %v865_v35 = vpop.f32.mrf.mxu1 }
 0x169   : > { %v885_v28 = vpop.f32.mrf.mxu2 }
 0x175   : > { %v2703_v33 = vpop.f32.mrf.mxu2 }
 0x1c1   : > { %v938_v20 = vpop.f32.mrf.mxu0 }
 0x1c2   : > { %v939_v21 = vadd.f32 %v938_v20, %v862_v19  ;;  %v961_v46 = vpop.f32.mrf.mxu1 }
 0x1c3   : > { %v962_v55 = vadd.f32 %v961_v46, %v885_v28 }
 0x1c4   : > { %v976_v22 = vadd.f32 %v970_v18, %v939_v21 }
 0x1c5   : > { %v977_v63 = vadd.f32 %v971_v56, %v962_v55 }
 0x1c6   : > { %v1664_v23 = vmul.f32 -1.442695, %v976_v22 }
 0x1c7   : > { %v915_v25 = vpop.f32.mrf.mxu3 }
 0x1c8   : > { %1725 = vpow2.f32 %v1664_v23  ;;  %v916_v26 = vadd.f32 %v915_v25, %v839_v15 }
 0x1ca   : > { %v975_v27 = vadd.f32 %v969_v24, %v916_v26 }
 0x1cc   : > { %v1662_v29 = vmul.f32 -1.442695, %v975_v27 }
 0x1ce   : > { %v1726_v30 = vpop.eup %1725  ;;  %1727 = vpow2.f32 %v1662_v29 }
 0x1cf   : > { %v1025_v31 = vadd.f32 1.0, %v1726_v30 }
 0x1d1   : > { %1729 = vrcp.f32 %v1025_v31  ;;  %v1038_v0 = vand.u32 2147483648, %v1025_v31  ;;  %vm1032_vm9 = vweird.f32 %v1025_v31  ;;  %v1036_v2 = vand.u32 2147483647, %v1025_v31 }
 0x1d3   : > { %v1039_v8 = vor.u32 1.1754944e-38, %v1038_v0  ;;  %vm1037_vm11 = vcmp.eq.f32.partialorder %v1036_v2, 8.507059e+37 }
 0x1d4   : > { %v1728_v32 = vpop.eup %1727 }
 0x1d5   : > { %v987_v34 = vadd.f32 1.0, %v1728_v32 }
 0x1d7   : > { %1731 = vrcp.f32 %v987_v34  ;;  %v1730_v36 = vpop.eup %1729  ;;  %v1000_v47 = vand.u32 2147483648, %v987_v34  ;;  %v998_v51 = vand.u32 2147483647, %v987_v34  ;;  %vm994_vm5 = vweird.f32 %v987_v34 }
 0x1d8   : > { %v1028_v37 = vmul.f32 %v1730_v36, %v1025_v31  ;;  %vm1033_vm8 = vweird.f32 %v1730_v36 }
 0x1d9   : > { %v1001_v59 = vor.u32 1.1754944e-38, %v1000_v47  ;;  %vm999_vm7 = vcmp.eq.f32.partialorder %v998_v51, 8.507059e+37  ;;  %vm1034_vm10 = vmor %vm1032_vm9, %vm1033_vm8  ;;  %v964_v25 = vpop.f32.mrf.mxu1 }
 0x1da   : > { %v1029_v44 = vsub.f32 1.0, %v1028_v37  ;;  %v965_v31 = vadd.f32 %v964_v25, %v2703_v33 }
 0x1dc   : > { %v1030_v54 = vmul.f32 %v1730_v36, %v1029_v44 }
 0x1dd   : > { %v1732_v38 = vpop.eup %1731 }
 0x1de   : > { %v990_v39 = vmul.f32 %v1732_v38, %v987_v34  ;;  %v918_v40 = vpop.f32.mrf.mxu3  ;;  %v941_v41 = vpop.f32.mrf.mxu2  ;;  %vm995_vm4 = vweird.f32 %v1732_v38  ;;  %v1031_v62 = vadd.f32 %v1730_v36, %v1030_v54 }
 0x1df   : > { %v919_v42 = vadd.f32 %v918_v40, %v842_v16  ;;  %v942_v43 = vadd.f32 %v941_v41, %v865_v35  ;;  %vm996_vm6 = vmor %vm994_vm5, %vm995_vm4 }
 0x1e0   : > { %v991_v45 = vsub.f32 1.0, %v990_v39  ;;  %v1035_v5 = vsel %vm1034_vm10, %v1730_v36, %v1031_v62 }
 0x1e1   : > { %v978_v48 = vadd.f32 %v969_v24, %v919_v42  ;;  %v979_v49 = vadd.f32 %v970_v18, %v942_v43  ;;  %v1040_v11 = vsel %vm1037_vm11, %v1039_v8, %v1035_v5 }
 0x1e2   : > { %v992_v50 = vmul.f32 %v1732_v38, %v991_v45  ;;  %v1067_v13 = vsub.f32 1.0, %v1040_v11 }
 0x1e3   : > { %v1663_v52 = vmul.f32 -1.442695, %v978_v48  ;;  %v1665_v53 = vmul.f32 -1.442695, %v979_v49 }
 0x1e4   : > { %v993_v57 = vadd.f32 %v1732_v38, %v992_v50 }
 0x1e5   : > { %1733 = vpow2.f32 %v1663_v52 }
 0x1e6   : > { %1735 = vpow2.f32 %v1665_v53  ;;  %v997_v60 = vsel %vm996_vm6, %v1732_v38, %v993_v57  ;;  %v980_v38 = vadd.f32 %v971_v56, %v965_v31 }
 0x1e7   : > { %v1002_v61 = vsel %vm999_vm7, %v1001_v59, %v997_v60 }
 0x1e8   : > { %v1061_v1 = vmul.f32 %v2709_v58, %v1002_v61 }
 0x1ea   : > { %v1063_v3 = vadd.f32 %v1061_v1, %v977_v63 }
 0x1eb   : > { %v1734_v4 = vpop.eup %1733 }
 0x1ec   : > { %v1736_v6 = vpop.eup %1735  ;;  %v988_v7 = vadd.f32 1.0, %v1734_v4  ;;  %1737 = vtanh.f32 %v1063_v3 }
 0x1ed   : > { %v1026_v10 = vadd.f32 1.0, %v1736_v6 }
 0x1ee   : > { %1739 = vrcp.f32 %v988_v7  ;;  %v1015_v26 = vand.u32 2147483648, %v988_v7  ;;  %v1013_v29 = vand.u32 2147483647, %v988_v7  ;;  %vm1009_vm15 = vweird.f32 %v988_v7 }
 0x1ef   : > { %1741 = vrcp.f32 %v1026_v10  ;;  %v1053_v39 = vand.u32 2147483648, %v1026_v10  ;;  %vm1047_vm4 = vweird.f32 %v1026_v10  ;;  %v1051_v41 = vand.u32 2147483647, %v1026_v10 }
 0x1f0   : > { %v1016_v34 = vor.u32 1.1754944e-38, %v1015_v26  ;;  %vm1014_vm2 = vcmp.eq.f32.partialorder %v1013_v29, 8.507059e+37 }
 0x1f1   : > { %v1054_v43 = vor.u32 1.1754944e-38, %v1053_v39  ;;  %vm1052_vm6 = vcmp.eq.f32.partialorder %v1051_v41, 8.507059e+37 }
 0x1f2   : > { %v1738_v14 = vpop.eup %1737 }
 0x1f3   : > { %v2716_v15 = vmul.f32 %v1738_v14, %v1067_v13 }
 0x1f4   : > { %v1740_v16 = vpop.eup %1739 }
 0x1f5   : > { %v1742_v18 = vpop.eup %1741  ;;  %v1005_v19 = vmul.f32 %v1740_v16, %v988_v7  ;;  %v1073_v20 = vmul.f32 %v2716_v15, %v2716_v15  ;;  %vm1010_vm14 = vweird.f32 %v1740_v16 }
 0x1f6   : > { %v1043_v21 = vmul.f32 %v1742_v18, %v1026_v10  ;;  %vm1011_vm1 = vmor %vm1009_vm15, %vm1010_vm14  ;;  %vm1048_vm3 = vweird.f32 %v1742_v18 }
 0x1f7   : > { %v1006_v22 = vsub.f32 1.0, %v1005_v19  ;;  %v1083_v23 = vsel %vm1082_vm12, %v1073_v20, 0.0  ;;  %v1076_v24 = vsel %vm1075_vm13, %v1073_v20, 0.0  ;;  %vm1049_vm5 = vmor %vm1047_vm4, %vm1048_vm3 }
 0x1f8   : > { %1085 = vadd.xlane.f32.xlu2 %v1083_v23  ;;  %1078 = vadd.xlane.f32.xlu1 %v1076_v24  ;;  %v1044_v27 = vsub.f32 1.0, %v1043_v21 }
 0x1f9   : > { %v1007_v28 = vmul.f32 %v1740_v16, %v1006_v22 }
 0x1fa   : > { %v1045_v30 = vmul.f32 %v1742_v18, %v1044_v27 }
 0x1fb   : > { %v1008_v32 = vadd.f32 %v1740_v16, %v1007_v28 }
 0x1fc   : > { %v1046_v37 = vadd.f32 %v1742_v18, %v1045_v30 }
 0x1fd   : > { %v1012_v35 = vsel %vm1011_vm1, %v1740_v16, %v1008_v32 }
 0x1fe   : > { %v1017_v36 = vsel %vm1014_vm2, %v1016_v34, %v1012_v35  ;;  %v1050_v33 = vsel %vm1049_vm5, %v1742_v18, %v1046_v37 }
 0x1ff   : > { %v1062_v40 = vmul.f32 %v2709_v58, %v1017_v36  ;;  %v1055_v44 = vsel %vm1052_vm6, %v1054_v43, %v1050_v33 }
 0x200   : > { %v1068_v45 = vsub.f32 1.0, %v1055_v44 }
 0x201   : > { %v1064_v42 = vadd.f32 %v1062_v40, %v980_v38 }
 0x203   : > { %1743 = vtanh.f32 %v1064_v42 }
 0x209   : > { %v1744_v46 = vpop.eup %1743 }
 0x20a   : > { %v2730_v47 = vmul.f32 %v1744_v46, %v1068_v45 }
 0x20c   : > { %v1074_v17 = vmul.f32 %v2730_v47, %v2730_v47 }
 0x20e   : > { %v1077_v48 = vsel %vm1075_vm13, %v1074_v17, 0.0  ;;  %v1084_v49 = vsel %vm1082_vm12, %v1074_v17, 0.0 }
 0x20f   : > { %1080 = vadd.xlane.f32.xlu0 %v1077_v48  ;;  %1087 = vadd.xlane.f32.xlu2 %v1084_v49 }
 0x26b   : > { %v1086_v50 = vpop.xlane.xlu2 %1085  ;;  %v1079_v51 = vpop.xlane.xlu1 %1078 }
 0x26c   : > { %v1111_v52 = vmax.f32 %v1086_v50, 1e-24  ;;  %v1089_v53 = vmax.f32 %v1079_v51, 1e-24 }
 0x26e   : > { %1745 = vrsqrt.f32 %v1111_v52  ;;  %vm1119_vm9 = vweird.f32 %v1111_v52  ;;  %vm1097_vm11 = vweird.f32 %v1089_v53 }
 0x26f   : > { %1747 = vrsqrt.f32 %v1089_v53 }
 0x274   : > { %v1746_v54 = vpop.eup %1745 }
 0x275   : > { %v1748_v55 = vpop.eup %1747  ;;  %v1114_v56 = vmul.f32 %v1746_v54, %v1111_v52  ;;  %vm1120_vm7 = vweird.f32 %v1746_v54 }
 0x276   : > { %v1092_v57 = vmul.f32 %v1748_v55, %v1089_v53  ;;  %vm1098_vm8 = vweird.f32 %v1748_v55  ;;  %vm1121_vm10 = vmor %vm1119_vm9, %vm1120_vm7 }
 0x277   : > { %v1115_v58 = vmul.f32 %v1746_v54, %v1114_v56  ;;  %vm1099_vm12 = vmor %vm1097_vm11, %vm1098_vm8 }
 0x278   : > { %v1093_v59 = vmul.f32 %v1748_v55, %v1092_v57 }
 0x279   : > { %v1116_v60 = vmul.f32 0.5, %v1115_v58 }
 0x27a   : > { %v1094_v61 = vmul.f32 0.5, %v1093_v59 }
 0x27b   : > { %v1117_v62 = vsub.f32 1.5, %v1116_v60 }
 0x27c   : > { %v1095_v63 = vsub.f32 1.5, %v1094_v61 }
 0x27d   : > { %v1118_v0 = vmul.f32 %v1746_v54, %v1117_v62 }
 0x27e   : > { %v1096_v1 = vmul.f32 %v1748_v55, %v1095_v63 }
 0x27f   : > { %v1122_v2 = vsel %vm1121_vm10, %v1746_v54, %v1118_v0 }
 0x280   : > { %v1100_v3 = vsel %vm1099_vm12, %v1748_v55, %v1096_v1 }
 0x281   : > { %v1133_v4 = vsel %vm1075_vm13, %v1100_v3, %v1122_v2 }
 0x282   : > { %v1135_v5 = vmul.f32 %v1133_v4, %v2716_v15  ;;  %v1081_v6 = vpop.xlane.xlu0 %1080  ;;  %v1088_v7 = vpop.xlane.xlu2 %1087 }
 0x283   : > { %v1090_v8 = vmax.f32 %v1081_v6, 1e-24  ;;  %v1112_v9 = vmax.f32 %v1088_v7, 1e-24 }
 0x284   : > { %1137 = vst [vmem:[%s1910_s13] sm:$0xff] %v1135_v5 }
 0x285   : > { %1749 = vrsqrt.f32 %v1090_v8  ;;  %vm1107_vm1 = vweird.f32 %v1090_v8  ;;  %vm1129_vm3 = vweird.f32 %v1112_v9 }
 0x286   : > { %1751 = vrsqrt.f32 %v1112_v9 }
 0x28b   : > { %v1750_v10 = vpop.eup %1749  ;;  %v1139_v11 = vld [vmem:[%s1910_s13] sm:$0x1]  ;;  %v1147_v13 = vld [vmem:[%s1910_s13 + $0x1] sm:$0x1]  ;;  %v1155_v16 = vld [vmem:[%s1910_s13 + $0x2] sm:$0x1] }
 0x28c   : > { %v1752_v14 = vpop.eup %1751  ;;  %1140 = vst.msk [vmem:[%s3252_s29] sm:$0x1] %vm594_vm0, %v1139_v11  ;;  %v1102_v15 = vmul.f32 %v1750_v10, %v1090_v8  ;;  %v1163_v18 = vld [vmem:[%s1910_s13 + $0x3] sm:$0x1]  ;;  %v1171_v20 = vld [vmem:[%s1910_s13 + $0x4] sm:$0x1]  ;;  %vm1108_vm14 = vweird.f32 %v1750_v10 }
 0x28d   : > { %1666 = vst.msk [vmem:[%s3253_s24 + $0x28] sm:$0x1] %vm594_vm0, %v1147_v13  ;;  %v1124_v19 = vmul.f32 %v1752_v14, %v1112_v9  ;;  %v1157_v22 = vld [vmem:[%s1910_s13 + $0x2] sm:$0x1]  ;;  %v1149_v24 = vld [vmem:[%s1910_s13 + $0x1] sm:$0x1]  ;;  %vm1130_vm15 = vweird.f32 %v1752_v14  ;;  %vm1109_vm2 = vmor %vm1107_vm1, %vm1108_vm14 }
 0x28e   : > { %1668 = vst.msk [vmem:[%s3254_s15 + $0x50] sm:$0x1] %vm594_vm0, %v1155_v16  ;;  %v1103_v21 = vmul.f32 %v1750_v10, %v1102_v15  ;;  %1159 = vrot.lane.b32.xlu0 %v1157_v22, %s1822_s8  ;;  %v1141_v25 = vld [vmem:[%s1910_s13] sm:$0x1]  ;;  %v1179_v26 = vld [vmem:[%s1910_s13 + $0x5] sm:$0x1]  ;;  %vm1131_vm4 = vmor %vm1129_vm3, %vm1130_vm15 }
 0x28f   : > { %1670 = vst.msk [vmem:[%s3255_s10 + $0x78] sm:$0x1] %vm594_vm0, %v1163_v18  ;;  %v1125_v23 = vmul.f32 %v1752_v14, %v1124_v19  ;;  %1151 = vrot.lane.b32.xlu2 %v1149_v24, %s1822_s8  ;;  %1143 = vrot.lane.b32.xlu1 %v1141_v25, %s1822_s8  ;;  %v1187_v28 = vld [vmem:[%s1910_s13 + $0x6] sm:$0x1]  ;;  %s3258_s15 = scalar_lea.vmem [#allocation2], %s2474_s17  ;;  %s3262_s17 = scalar_lea.vmem [#allocation2], %s2633_s30 }
 0x290   : > { %1672 = vst.msk [vmem:[%s3256_s11 + $0xa0] sm:$0x1] %vm594_vm0, %v1171_v20  ;;  %v1104_v27 = vmul.f32 0.5, %v1103_v21  ;;  %v1195_v30 = vld [vmem:[%s1910_s13 + $0x7] sm:$0x1]  ;;  %s3272_s30 = sld [smem:[#allocation27_spill]] }
 0x291   : > { %1674 = vst.msk [vmem:[%s3257_s25 + $0xc8] sm:$0x1] %vm594_vm0, %v1179_v26  ;;  %v1126_v29 = vmul.f32 0.5, %v1125_v23  ;;  %v1173_v37 = vld [vmem:[%s1910_s13 + $0x4] sm:$0x1]  ;;  %s3278_s29 = sld [smem:[#allocation30_spill]] }
 0x292   : > { %1676 = vst.msk [vmem:[%s3258_s15 + $0xf0] sm:$0x1] %vm594_vm0, %v1187_v28  ;;  %v1105_v31 = vsub.f32 1.5, %v1104_v27  ;;  %v1181_v39 = vld [vmem:[%s1910_s13 + $0x5] sm:$0x1]  ;;  %s3281_s24 = scalar_lea.vmem [#allocation3], %s3266_s27 }
 0x293   : > { %1678 = vst.msk [vmem:[%s3259_s26 + $0x118] sm:$0x1] %vm594_vm0, %v1195_v30  ;;  %v1127_v32 = vsub.f32 1.5, %v1126_v29  ;;  %v1165_v40 = vld [vmem:[%s1910_s13 + $0x3] sm:$0x1]  ;;  %s3282_s10 = scalar_lea.vmem [#allocation3], %s3267_s12 }
 0x294   : > { %v1106_v34 = vmul.f32 %v1750_v10, %v1105_v31  ;;  %v1197_v33 = vld [vmem:[%s1910_s13 + $0x7] sm:$0x1]  ;;  %v1189_v43 = vld [vmem:[%s1910_s13 + $0x6] sm:$0x1]  ;;  %s3284_s11 = scalar_lea.vmem [#allocation3], %s3268_s22 }
 0x295   : > { %v1128_v35 = vmul.f32 %v1752_v14, %v1127_v32 }
 0x296   : > { %v1110_v36 = vsel %vm1109_vm2, %v1750_v10, %v1106_v34  ;;  %1175 = vrot.lane.b32.xlu0 %v1173_v37, %s1822_s8  ;;  %s3285_s25 = scalar_lea.vmem [#allocation3], %s3272_s30 }
 0x297   : > { %v1132_v38 = vsel %vm1131_vm4, %v1752_v14, %v1128_v35  ;;  %1183 = vrot.lane.b32.xlu2 %v1181_v39, %s1822_s8  ;;  %1167 = vrot.lane.b32.xlu1 %v1165_v40, %s1822_s8 }
 0x298   : > { %v1134_v41 = vsel %vm1075_vm13, %v1110_v36, %v1132_v38 }
 0x299   : > { %v1136_v42 = vmul.f32 %v1134_v41, %v2730_v47 }
 0x29b   : > { %1138 = vst [vmem:[%s1910_s13 + $0x8] sm:$0xff] %v1136_v42 }
 0x29e   : > { %1199 = vrot.lane.b32.xlu0 %v1197_v33, %s1822_s8 }
 0x29f   : > { %1191 = vrot.lane.b32.xlu1 %v1189_v43, %s1822_s8 }
 0x2a2   : > { %v1203_v12 = vld [vmem:[%s1910_s13 + $0x8] sm:$0x1]  ;;  %v1211_v44 = vld [vmem:[%s1910_s13 + $0x9] sm:$0x1]  ;;  %v1219_v45 = vld [vmem:[%s1910_s13 + $0xa] sm:$0x1] }
 0x2a3   : > { %1680 = vst.msk [vmem:[%s1541_s19 + $0x140] sm:$0x1] %vm594_vm0, %v1203_v12  ;;  %v1227_v46 = vld [vmem:[%s1910_s13 + $0xb] sm:$0x1]  ;;  %v1235_v47 = vld [vmem:[%s1910_s13 + $0xc] sm:$0x1] }
 0x2a4   : > { %1682 = vst.msk [vmem:[%s3260_s7 + $0x168] sm:$0x1] %vm594_vm0, %v1211_v44  ;;  %v1205_v17 = vld [vmem:[%s1910_s13 + $0x8] sm:$0x1]  ;;  %v1221_v48 = vld [vmem:[%s1910_s13 + $0xa] sm:$0x1] }
 0x2a5   : > { %1684 = vst.msk [vmem:[%s1549_s21 + $0x190] sm:$0x1] %vm594_vm0, %v1219_v45  ;;  %1207 = vrot.lane.b32.xlu2 %v1205_v17, %s1822_s8  ;;  %v1213_v49 = vld [vmem:[%s1910_s13 + $0x9] sm:$0x1]  ;;  %v1243_v50 = vld [vmem:[%s1910_s13 + $0xd] sm:$0x1] }
 0x2a6   : > { %1686 = vst.msk [vmem:[%s1553_s2 + $0x1b8] sm:$0x1] %vm594_vm0, %v1227_v46  ;;  %1223 = vrot.lane.b32.xlu0 %v1221_v48, %s1822_s8  ;;  %v1251_v51 = vld [vmem:[%s1910_s13 + $0xe] sm:$0x1]  ;;  %v1259_v52 = vld [vmem:[%s1910_s13 + $0xf] sm:$0x1] }
 0x2a7   : > { %1688 = vst.msk [vmem:[%s1557_s4 + $0x1e0] sm:$0x1] %vm594_vm0, %v1235_v47  ;;  %1215 = vrot.lane.b32.xlu1 %v1213_v49, %s1822_s8  ;;  %v1229_v53 = vld [vmem:[%s1910_s13 + $0xb] sm:$0x1]  ;;  %v1245_v54 = vld [vmem:[%s1910_s13 + $0xd] sm:$0x1] }
 0x2a8   : > { %1690 = vst.msk [vmem:[%s1561_s0 + $0x208] sm:$0x1] %vm594_vm0, %v1243_v50  ;;  %v1237_v55 = vld [vmem:[%s1910_s13 + $0xc] sm:$0x1]  ;;  %v1253_v56 = vld [vmem:[%s1910_s13 + $0xe] sm:$0x1] }
 0x2a9   : > { %1692 = vst.msk [vmem:[%s3261_s9 + $0x230] sm:$0x1] %vm594_vm0, %v1251_v51  ;;  %v1261_v57 = vld [vmem:[%s1910_s13 + $0xf] sm:$0x1]  ;;  %s3269_s19 = scalar_lea.vmem [#allocation3], %s2301_s16  ;;  %s3270_s2 = scalar_lea.vmem [#allocation3], %s2311_s20 }
 0x2aa   : > { %1694 = vst.msk [vmem:[%s3262_s17 + $0x258] sm:$0x1] %vm594_vm0, %v1259_v52  ;;  %s3273_s13 = sld [smem:[#allocation28_spill]]  ;;  %s3275_s4 = scalar_lea.vmem [#allocation3], %s3263_s23 }
 0x2ab   : > { %s3274_s21 = sld [smem:[#allocation33_spill]]  ;;  %s3276_s0 = scalar_lea.vmem [#allocation3], %s3264_s14 }
 0x2ac   : > { %s3277_s16 = scalar_lea.vmem [#allocation3], %s3265_s1  ;;  %s3279_s20 = sld [smem:[#allocation32_spill]] }
 0x2ad   : > { %1231 = vrot.lane.b32.xlu2 %v1229_v53, %s1822_s8  ;;  %s3288_s7 = scalar_lea.vmem [#allocation3], %s3278_s29  ;;  %s3290_s17 = scalar_lea.vmem [#allocation3], %s3280_s18 }
 0x2ae   : > { %1247 = vrot.lane.b32.xlu0 %v1245_v54, %s1822_s8  ;;  %s3292_s14 = sld [smem:[#allocation22_spill]] }
 0x2af   : > { %1239 = vrot.lane.b32.xlu1 %v1237_v55, %s1822_s8 }
 0x2b0   : > { %s3286_s15 = scalar_lea.vmem [#allocation3], %s3273_s13 }
 0x2b1   : > { %s3287_s26 = scalar_lea.vmem [#allocation3], %s3274_s21 }
 0x2b2   : > { %s3289_s9 = scalar_lea.vmem [#allocation3], %s3279_s20 }
 0x2b4   : > { %p1696_p5 = scmp.ne.s32.totalorder %s3292_s14, 7 }
 0x2b5   : > { %1255 = vrot.lane.b32.xlu2 %v1253_v56, %s1822_s8  ;;  %s3293_s12 = sld [smem:[#allocation41_spill]] (!%p1696_p5) }
 0x2b7   : > { %1263 = vrot.lane.b32.xlu1 %v1261_v57, %s1822_s8  ;;  %s3283_s8 = sld [smem:[#allocation34_spill]] }
 0x2bd   : > { %s3291_s23 = scalar_lea.vmem [#allocation3], %s3283_s8 }
 0x2e9   : > { %v1152_v58 = vpop.permute.xlu2 %1151 }
 0x2f1   : > { %v1184_v61 = vpop.permute.xlu2 %1183 }
 0x2ff   : > { %v1208_v0 = vpop.permute.xlu2 %1207 }
 0x300   : > { %v1160_v59 = vpop.permute.xlu0 %1159 }
 0x301   : > { %v1144_v60 = vpop.permute.xlu1 %1143 }
 0x302   : > { %1146 = vst.msk [vmem:[%s3269_s19] sm:$0x1] %vm594_vm0, %v1144_v60 }
 0x303   : > { %1667 = vst.msk [vmem:[%s3270_s2 + $0x18] sm:$0x1] %vm594_vm0, %v1152_v58 }
 0x304   : > { %1669 = vst.msk [vmem:[%s3271_s28 + $0x30] sm:$0x1] %vm594_vm0, %v1160_v59 }
 0x307   : > { %v1232_v4 = vpop.permute.xlu2 %1231 }
 0x308   : > { %v1176_v62 = vpop.permute.xlu0 %1175 }
 0x309   : > { %v1168_v63 = vpop.permute.xlu1 %1167 }
 0x30a   : > { %1671 = vst.msk [vmem:[%s3275_s4 + $0x48] sm:$0x1] %vm594_vm0, %v1168_v63 }
 0x30b   : > { %1673 = vst.msk [vmem:[%s3276_s0 + $0x60] sm:$0x1] %vm594_vm0, %v1176_v62 }
 0x30c   : > { %1675 = vst.msk [vmem:[%s3277_s16 + $0x78] sm:$0x1] %vm594_vm0, %v1184_v61 }
 0x30f   : > { %v1256_v8 = vpop.permute.xlu2 %1255 }
 0x310   : > { %v1200_v1 = vpop.permute.xlu0 %1199 }
 0x311   : > { %v1192_v2 = vpop.permute.xlu1 %1191 }
 0x312   : > { %1677 = vst.msk [vmem:[%s3281_s24 + $0x90] sm:$0x1] %vm594_vm0, %v1192_v2 }
 0x313   : > { %1679 = vst.msk [vmem:[%s3282_s10 + $0xa8] sm:$0x1] %vm594_vm0, %v1200_v1 }
 0x314   : > { %1681 = vst.msk [vmem:[%s3284_s11 + $0xc0] sm:$0x1] %vm594_vm0, %v1208_v0 }
 0x318   : > { %v1224_v3 = vpop.permute.xlu0 %1223 }
 0x319   : > { %v1216_v5 = vpop.permute.xlu1 %1215 }
 0x31a   : > { %1683 = vst.msk [vmem:[%s3285_s25 + $0xd8] sm:$0x1] %vm594_vm0, %v1216_v5 }
 0x31b   : > { %1685 = vst.msk [vmem:[%s3286_s15 + $0xf0] sm:$0x1] %vm594_vm0, %v1224_v3 }
 0x31c   : > { %1687 = vst.msk [vmem:[%s3287_s26 + $0x108] sm:$0x1] %vm594_vm0, %v1232_v4 }
 0x320   : > { %v1248_v6 = vpop.permute.xlu0 %1247 }
 0x321   : > { %v1240_v7 = vpop.permute.xlu1 %1239 }
 0x322   : > { %1689 = vst.msk [vmem:[%s3288_s7 + $0x120] sm:$0x1] %vm594_vm0, %v1240_v7 }
 0x323   : > { %1691 = vst.msk [vmem:[%s3289_s9 + $0x138] sm:$0x1] %vm594_vm0, %v1248_v6 }
 0x324   : > { %1693 = vst.msk [vmem:[%s3290_s17 + $0x150] sm:$0x1] %vm594_vm0, %v1256_v8 }
 0x326   : > { %1270 = sbr.rel (%p1696_p5) target bundleno = 904 (0x388), region = 86 }
 0x329   : > { %v1264_v9 = vpop.permute.xlu1 %1263 }
 0x32a   : > { %1695 = vst.msk [vmem:[%s3291_s23 + $0x168] sm:$0x1] %vm594_vm0, %v1264_v9 }
 0x32b   : > { %v1281_v10 = vld [vmem:[#allocation2] sm:$0xff]  ;;  %v1283_v11 = vld [vmem:[#allocation2 + $0x8] sm:$0xff]  ;;  %v1285_v13 = vld [vmem:[#allocation2 + $0x10] sm:$0xff] }
 0x32c   : > { %1282 = vst [vmem:[%s3293_s12] sm:$0xff] %v1281_v10  ;;  %v1287_v14 = vld [vmem:[#allocation2 + $0x18] sm:$0xff]  ;;  %v1289_v15 = vld [vmem:[#allocation2 + $0x20] sm:$0xff]  ;;  %v1291_v16 = vld [vmem:[#allocation2 + $0x28] sm:$0xff] }
 0x32d   : > { %1284 = vst [vmem:[%s3293_s12 + $0x8] sm:$0xff] %v1283_v11  ;;  %v1293_v18 = vld [vmem:[#allocation2 + $0x30] sm:$0xff]  ;;  %v1295_v19 = vld [vmem:[#allocation2 + $0x38] sm:$0xff]  ;;  %v1297_v20 = vld [vmem:[#allocation2 + $0x40] sm:$0xff] }
 0x32e   : > { %1286 = vst [vmem:[%s3293_s12 + $0x10] sm:$0xff] %v1285_v13  ;;  %v1299_v21 = vld [vmem:[#allocation2 + $0x48] sm:$0xff]  ;;  %v1301_v22 = vld [vmem:[#allocation2 + $0x50] sm:$0xff]  ;;  %v1303_v23 = vld [vmem:[#allocation2 + $0x58] sm:$0xff] }
 0x32f   : > { %1288 = vst [vmem:[%s3293_s12 + $0x18] sm:$0xff] %v1287_v14  ;;  %v1305_v24 = vld [vmem:[#allocation2 + $0x60] sm:$0xff]  ;;  %v1307_v25 = vld [vmem:[#allocation2 + $0x68] sm:$0xff]  ;;  %v1309_v26 = vld [vmem:[#allocation2 + $0x70] sm:$0xff] }
 0x330   : > { %1290 = vst [vmem:[%s3293_s12 + $0x20] sm:$0xff] %v1289_v15  ;;  %v1311_v27 = vld [vmem:[#allocation2 + $0x78] sm:$0xff]  ;;  %v1313_v28 = vld [vmem:[#allocation2 + $0x80] sm:$0xff]  ;;  %v1315_v29 = vld [vmem:[#allocation2 + $0x88] sm:$0xff] }
 0x331   : > { %1292 = vst [vmem:[%s3293_s12 + $0x28] sm:$0xff] %v1291_v16  ;;  %v1317_v30 = vld [vmem:[#allocation2 + $0x90] sm:$0xff]  ;;  %v1319_v31 = vld [vmem:[#allocation2 + $0x98] sm:$0xff]  ;;  %v1321_v32 = vld [vmem:[#allocation2 + $0xa0] sm:$0xff] }
 0x332   : > { %1294 = vst [vmem:[%s3293_s12 + $0x30] sm:$0xff] %v1293_v18  ;;  %v1323_v34 = vld [vmem:[#allocation2 + $0xa8] sm:$0xff]  ;;  %v1325_v35 = vld [vmem:[#allocation2 + $0xb0] sm:$0xff]  ;;  %v1327_v36 = vld [vmem:[#allocation2 + $0xb8] sm:$0xff] }
 0x333   : > { %1296 = vst [vmem:[%s3293_s12 + $0x38] sm:$0xff] %v1295_v19  ;;  %v1329_v37 = vld [vmem:[#allocation2 + $0xc0] sm:$0xff]  ;;  %v1331_v38 = vld [vmem:[#allocation2 + $0xc8] sm:$0xff]  ;;  %v1333_v39 = vld [vmem:[#allocation2 + $0xd0] sm:$0xff] }
 0x334   : > { %1298 = vst [vmem:[%s3293_s12 + $0x40] sm:$0xff] %v1297_v20  ;;  %v1335_v40 = vld [vmem:[#allocation2 + $0xd8] sm:$0xff]  ;;  %v1337_v41 = vld [vmem:[#allocation2 + $0xe0] sm:$0xff]  ;;  %v1339_v42 = vld [vmem:[#allocation2 + $0xe8] sm:$0xff] }
 0x335   : > { %1300 = vst [vmem:[%s3293_s12 + $0x48] sm:$0xff] %v1299_v21  ;;  %v1341_v33 = vld [vmem:[#allocation2 + $0xf0] sm:$0xff]  ;;  %v1343_v43 = vld [vmem:[#allocation2 + $0xf8] sm:$0xff]  ;;  %v1345_v12 = vld [vmem:[#allocation2 + $0x100] sm:$0xff] }
 0x336   : > { %1302 = vst [vmem:[%s3293_s12 + $0x50] sm:$0xff] %v1301_v22  ;;  %v1347_v44 = vld [vmem:[#allocation2 + $0x108] sm:$0xff]  ;;  %v1349_v45 = vld [vmem:[#allocation2 + $0x110] sm:$0xff]  ;;  %v1351_v46 = vld [vmem:[#allocation2 + $0x118] sm:$0xff] }
 0x337   : > { %1304 = vst [vmem:[%s3293_s12 + $0x58] sm:$0xff] %v1303_v23  ;;  %v1353_v47 = vld [vmem:[#allocation2 + $0x120] sm:$0xff]  ;;  %v1355_v17 = vld [vmem:[#allocation2 + $0x128] sm:$0xff]  ;;  %v1357_v48 = vld [vmem:[#allocation2 + $0x130] sm:$0xff] }
 0x338   : > { %1306 = vst [vmem:[%s3293_s12 + $0x60] sm:$0xff] %v1305_v24  ;;  %v1359_v49 = vld [vmem:[#allocation2 + $0x138] sm:$0xff]  ;;  %v1361_v50 = vld [vmem:[#allocation2 + $0x140] sm:$0xff]  ;;  %v1363_v51 = vld [vmem:[#allocation2 + $0x148] sm:$0xff] }
 0x339   : > { %1308 = vst [vmem:[%s3293_s12 + $0x68] sm:$0xff] %v1307_v25  ;;  %v1365_v52 = vld [vmem:[#allocation2 + $0x150] sm:$0xff]  ;;  %v1367_v53 = vld [vmem:[#allocation2 + $0x158] sm:$0xff]  ;;  %v1369_v54 = vld [vmem:[#allocation2 + $0x160] sm:$0xff] }
 0x33a   : > { %1310 = vst [vmem:[%s3293_s12 + $0x70] sm:$0xff] %v1309_v26  ;;  %v1371_v55 = vld [vmem:[#allocation2 + $0x168] sm:$0xff]  ;;  %v1373_v56 = vld [vmem:[#allocation2 + $0x170] sm:$0xff]  ;;  %v1375_v57 = vld [vmem:[#allocation2 + $0x178] sm:$0xff] }
 0x33b   : > { %1312 = vst [vmem:[%s3293_s12 + $0x78] sm:$0xff] %v1311_v27  ;;  %v1377_v58 = vld [vmem:[#allocation2 + $0x180] sm:$0xff]  ;;  %v1379_v59 = vld [vmem:[#allocation2 + $0x188] sm:$0xff]  ;;  %v1381_v60 = vld [vmem:[#allocation2 + $0x190] sm:$0xff] }
 0x33c   : > { %1314 = vst [vmem:[%s3293_s12 + $0x80] sm:$0xff] %v1313_v28  ;;  %v1383_v61 = vld [vmem:[#allocation2 + $0x198] sm:$0xff]  ;;  %v1385_v62 = vld [vmem:[#allocation2 + $0x1a0] sm:$0xff]  ;;  %v1387_v63 = vld [vmem:[#allocation2 + $0x1a8] sm:$0xff] }
 0x33d   : > { %1316 = vst [vmem:[%s3293_s12 + $0x88] sm:$0xff] %v1315_v29  ;;  %v1389_v0 = vld [vmem:[#allocation2 + $0x1b0] sm:$0xff]  ;;  %v1391_v1 = vld [vmem:[#allocation2 + $0x1b8] sm:$0xff]  ;;  %v1393_v2 = vld [vmem:[#allocation2 + $0x1c0] sm:$0xff] }
 0x33e   : > { %1318 = vst [vmem:[%s3293_s12 + $0x90] sm:$0xff] %v1317_v30  ;;  %v1395_v3 = vld [vmem:[#allocation2 + $0x1c8] sm:$0xff]  ;;  %v1397_v4 = vld [vmem:[#allocation2 + $0x1d0] sm:$0xff]  ;;  %v1399_v5 = vld [vmem:[#allocation2 + $0x1d8] sm:$0xff] }
 0x33f   : > { %1320 = vst [vmem:[%s3293_s12 + $0x98] sm:$0xff] %v1319_v31  ;;  %v1401_v6 = vld [vmem:[#allocation2 + $0x1e0] sm:$0xff]  ;;  %v1403_v7 = vld [vmem:[#allocation2 + $0x1e8] sm:$0xff]  ;;  %v1405_v8 = vld [vmem:[#allocation2 + $0x1f0] sm:$0xff] }
 0x340   : > { %1322 = vst [vmem:[%s3293_s12 + $0xa0] sm:$0xff] %v1321_v32  ;;  %v1407_v9 = vld [vmem:[#allocation2 + $0x1f8] sm:$0xff]  ;;  %v1409_v10 = vld [vmem:[#allocation2 + $0x200] sm:$0xff]  ;;  %v1411_v11 = vld [vmem:[#allocation2 + $0x208] sm:$0xff] }
 0x341   : > { %1324 = vst [vmem:[%s3293_s12 + $0xa8] sm:$0xff] %v1323_v34  ;;  %v1413_v13 = vld [vmem:[#allocation2 + $0x210] sm:$0xff]  ;;  %v1415_v14 = vld [vmem:[#allocation2 + $0x218] sm:$0xff]  ;;  %v1417_v15 = vld [vmem:[#allocation2 + $0x220] sm:$0xff] }
 0x342   : > { %1326 = vst [vmem:[%s3293_s12 + $0xb0] sm:$0xff] %v1325_v35  ;;  %v1419_v16 = vld [vmem:[#allocation2 + $0x228] sm:$0xff]  ;;  %v1421_v18 = vld [vmem:[#allocation2 + $0x230] sm:$0xff]  ;;  %v1423_v19 = vld [vmem:[#allocation2 + $0x238] sm:$0xff] }
 0x343   : > { %1328 = vst [vmem:[%s3293_s12 + $0xb8] sm:$0xff] %v1327_v36  ;;  %v1425_v20 = vld [vmem:[#allocation2 + $0x240] sm:$0xff]  ;;  %v1427_v21 = vld [vmem:[#allocation2 + $0x248] sm:$0xff]  ;;  %v1429_v22 = vld [vmem:[#allocation2 + $0x250] sm:$0xff] }
 0x344   : > { %1330 = vst [vmem:[%s3293_s12 + $0xc0] sm:$0xff] %v1329_v37  ;;  %v1431_v23 = vld [vmem:[#allocation2 + $0x258] sm:$0xff]  ;;  %v1433_v24 = vld [vmem:[#allocation2 + $0x260] sm:$0xff]  ;;  %v1435_v25 = vld [vmem:[#allocation2 + $0x268] sm:$0xff] }
 0x345   : > { %1332 = vst [vmem:[%s3293_s12 + $0xc8] sm:$0xff] %v1331_v38  ;;  %v1437_v26 = vld [vmem:[#allocation2 + $0x270] sm:$0xff]  ;;  %v1439_v27 = vld [vmem:[#allocation2 + $0x278] sm:$0xff] }
 0x346   : > { %1334 = vst [vmem:[%s3293_s12 + $0xd0] sm:$0xff] %v1333_v39 }
 0x347   : > { %1336 = vst [vmem:[%s3293_s12 + $0xd8] sm:$0xff] %v1335_v40 }
 0x348   : > { %1338 = vst [vmem:[%s3293_s12 + $0xe0] sm:$0xff] %v1337_v41 }
 0x349   : > { %1340 = vst [vmem:[%s3293_s12 + $0xe8] sm:$0xff] %v1339_v42 }
 0x34a   : > { %1342 = vst [vmem:[%s3293_s12 + $0xf0] sm:$0xff] %v1341_v33 }
 0x34b   : > { %1344 = vst [vmem:[%s3293_s12 + $0xf8] sm:$0xff] %v1343_v43 }
 0x34c   : > { %1346 = vst [vmem:[%s3293_s12 + $0x100] sm:$0xff] %v1345_v12 }
 0x34d   : > { %1348 = vst [vmem:[%s3293_s12 + $0x108] sm:$0xff] %v1347_v44 }
 0x34e   : > { %1350 = vst [vmem:[%s3293_s12 + $0x110] sm:$0xff] %v1349_v45 }
 0x34f   : > { %1352 = vst [vmem:[%s3293_s12 + $0x118] sm:$0xff] %v1351_v46 }
 0x350   : > { %1354 = vst [vmem:[%s3293_s12 + $0x120] sm:$0xff] %v1353_v47 }
 0x351   : > { %1356 = vst [vmem:[%s3293_s12 + $0x128] sm:$0xff] %v1355_v17 }
 0x352   : > { %1358 = vst [vmem:[%s3293_s12 + $0x130] sm:$0xff] %v1357_v48 }
 0x353   : > { %1360 = vst [vmem:[%s3293_s12 + $0x138] sm:$0xff] %v1359_v49 }
 0x354   : > { %1362 = vst [vmem:[%s3293_s12 + $0x140] sm:$0xff] %v1361_v50 }
 0x355   : > { %1364 = vst [vmem:[%s3293_s12 + $0x148] sm:$0xff] %v1363_v51 }
 0x356   : > { %1366 = vst [vmem:[%s3293_s12 + $0x150] sm:$0xff] %v1365_v52 }
 0x357   : > { %1368 = vst [vmem:[%s3293_s12 + $0x158] sm:$0xff] %v1367_v53 }
 0x358   : > { %1370 = vst [vmem:[%s3293_s12 + $0x160] sm:$0xff] %v1369_v54 }
 0x359   : > { %1372 = vst [vmem:[%s3293_s12 + $0x168] sm:$0xff] %v1371_v55 }
 0x35a   : > { %1374 = vst [vmem:[%s3293_s12 + $0x170] sm:$0xff] %v1373_v56 }
 0x35b   : > { %1376 = vst [vmem:[%s3293_s12 + $0x178] sm:$0xff] %v1375_v57 }
 0x35c   : > { %1378 = vst [vmem:[%s3293_s12 + $0x180] sm:$0xff] %v1377_v58 }
 0x35d   : > { %1380 = vst [vmem:[%s3293_s12 + $0x188] sm:$0xff] %v1379_v59 }
 0x35e   : > { %1382 = vst [vmem:[%s3293_s12 + $0x190] sm:$0xff] %v1381_v60 }
 0x35f   : > { %1384 = vst [vmem:[%s3293_s12 + $0x198] sm:$0xff] %v1383_v61 }
 0x360   : > { %1386 = vst [vmem:[%s3293_s12 + $0x1a0] sm:$0xff] %v1385_v62 }
 0x361   : > { %1388 = vst [vmem:[%s3293_s12 + $0x1a8] sm:$0xff] %v1387_v63 }
 0x362   : > { %1390 = vst [vmem:[%s3293_s12 + $0x1b0] sm:$0xff] %v1389_v0 }
 0x363   : > { %1392 = vst [vmem:[%s3293_s12 + $0x1b8] sm:$0xff] %v1391_v1 }
 0x364   : > { %1394 = vst [vmem:[%s3293_s12 + $0x1c0] sm:$0xff] %v1393_v2 }
 0x365   : > { %1396 = vst [vmem:[%s3293_s12 + $0x1c8] sm:$0xff] %v1395_v3 }
 0x366   : > { %1398 = vst [vmem:[%s3293_s12 + $0x1d0] sm:$0xff] %v1397_v4 }
 0x367   : > { %1400 = vst [vmem:[%s3293_s12 + $0x1d8] sm:$0xff] %v1399_v5 }
 0x368   : > { %1402 = vst [vmem:[%s3293_s12 + $0x1e0] sm:$0xff] %v1401_v6 }
 0x369   : > { %1404 = vst [vmem:[%s3293_s12 + $0x1e8] sm:$0xff] %v1403_v7 }
 0x36a   : > { %1406 = vst [vmem:[%s3293_s12 + $0x1f0] sm:$0xff] %v1405_v8 }
 0x36b   : > { %1408 = vst [vmem:[%s3293_s12 + $0x1f8] sm:$0xff] %v1407_v9 }
 0x36c   : > { %1410 = vst [vmem:[%s3293_s12 + $0x200] sm:$0xff] %v1409_v10 }
 0x36d   : > { %1412 = vst [vmem:[%s3293_s12 + $0x208] sm:$0xff] %v1411_v11 }
 0x36e   : > { %1414 = vst [vmem:[%s3293_s12 + $0x210] sm:$0xff] %v1413_v13 }
 0x36f   : > { %1416 = vst [vmem:[%s3293_s12 + $0x218] sm:$0xff] %v1415_v14 }
 0x370   : > { %1418 = vst [vmem:[%s3293_s12 + $0x220] sm:$0xff] %v1417_v15 }
 0x371   : > { %1420 = vst [vmem:[%s3293_s12 + $0x228] sm:$0xff] %v1419_v16 }
 0x372   : > { %1422 = vst [vmem:[%s3293_s12 + $0x230] sm:$0xff] %v1421_v18 }
 0x373   : > { %1424 = vst [vmem:[%s3293_s12 + $0x238] sm:$0xff] %v1423_v19 }
 0x374   : > { %1426 = vst [vmem:[%s3293_s12 + $0x240] sm:$0xff] %v1425_v20 }
 0x375   : > { %1428 = vst [vmem:[%s3293_s12 + $0x248] sm:$0xff] %v1427_v21 }
 0x376   : > { %1430 = vst [vmem:[%s3293_s12 + $0x250] sm:$0xff] %v1429_v22 }
 0x377   : > { %1432 = vst [vmem:[%s3293_s12 + $0x258] sm:$0xff] %v1431_v23 }
 0x378   : > { %1434 = vst [vmem:[%s3293_s12 + $0x260] sm:$0xff] %v1433_v24 }
 0x379   : > { %1436 = vst [vmem:[%s3293_s12 + $0x268] sm:$0xff] %v1435_v25 }
 0x37a   : > { %1438 = vst [vmem:[%s3293_s12 + $0x270] sm:$0xff] %v1437_v26 }
 0x37b   : > { %1440 = vst [vmem:[%s3293_s12 + $0x278] sm:$0xff] %v1439_v27 }
 0x37c   : > { %1446 = vsyncadd [#allocation5], 10240  ;;  %s3294_s1 = sld [smem:[#allocation42_spill]]  ;;  %s1823_s22 = smov [#allocation3]  }
 0x37d   : > { %s1455_s19 = sshll.u32 %s1823_s22, 4  ;;  %s1456_s19 = int_to_ptr.vmem [resolvable:$true] %s1455_s19 }
 0x382   : > { %s1457_s27 = sshll.u32 %s3294_s1, 4  ;;  %s1458_s27 = int_to_ptr.hbm [resolvable:$true] %s1457_s27 }
 0x383   : > { %1460 = dma.vmem_to_hbm [thread:$0]  %s1456_s19, 6144, %s1458_s27, [#allocation5 + $0x1] }
 0x384   : > { %1811 = dma.done.wait [#allocation5], 10240 }
 0x385   : > { %1812 = vsyncadd [#allocation5], 4294957056 }
 0x386   : > { %1813 = dma.done.wait [#allocation5 + $0x1], 6144 }
 0x387   : > { %1814 = vsyncadd [#allocation5 + $0x1], 4294961152 }
 0x388 PF: > { %s3295_s2 = sld [smem:[#allocation21_spill]] }
 0x38e   : > { %s35_s25 = sadd.s32 1, %s3295_s2  }
 0x38f   : > { %p32_p6 = scmp.ge.s32.totalorder %s35_s25, 10  }
 0x391   :  { %34 = sbr.rel (!%p32_p6) target bundleno = 14 (0xe), region = 186 }
 0x396   :  { %1488 = vsyncmov [#allocation5] }
 0x399   :  { %s1489_s28 = vpop.sfrf %1488 }
 0x39a   :  { %p1699_p7 = scmp.ne.s32.totalorder %s1489_s28, 0 }
 0x39c   :  { %1493 = shalt.err (%p1699_p7)  }
 0x39d   :  { %1495 = vsyncmov [#allocation5 + $0x1] }
 0x3a0   :  { %s1496_s30 = vpop.sfrf %1495 }
 0x3a1   :  { %p1700_p8 = scmp.ne.s32.totalorder %s1496_s30, 0 }
 0x3a3   :  { %1500 = shalt.err (%p1700_p8)  }

</bundles_post_ra>
